<compile_context>
chip_gen: v7x
topology: tpu7x:2x2x1
jax: 0.10.0
libtpu: 0.0.40
codegen_flags: <defaults>
</compile_context>

<pallas_src>
import functools

import numpy as np
import jax
import jax.numpy as jnp
from jax.experimental import pallas as pl
from jax.experimental.pallas import tpu as pltpu

NUM_BOND_TYPE = 6
NUM_BOND_DIRECTION = 3
NUM_ATOM_TYPE = 120
NUM_CHIRALITY_TAG = 3

BN_EPS = 1e-5

_VMEM_LIMIT = 32 * 1024 * 1024   # safe on v5e/v6e (128 MiB) and v7x (64 MiB/TC)


# ---------------------------------------------------------------------------
# Pallas kernels
# ---------------------------------------------------------------------------
def _gin_layer_kernel(tile_ref, blk_ref,                    # scalar prefetch
                      dst_ref, msg_ref,                     # edge stream
                      w1_ref, b1_ref, w2_ref, b2_ref,       # MLP (BN folded)
                      out_ref, acc_ref, *, tn, apply_relu):
    """One GIN layer, ragged 1-D grid over (node_tile, edge_block) pairs.

    aggr[n] = sum_{e : dst[e]==n} msg[e]   (tile-local one-hot @ msg on MXU)
    h       = W2' @ relu(W1 @ aggr + b1) + b2'   (eval BatchNorm pre-folded)
    Dropout is identity in eval mode.
    """
    s = pl.program_id(0)
    ns = pl.num_programs(0)
    t = tile_ref[s]
    t_prev = tile_ref[jnp.maximum(s - 1, 0)]
    t_next = tile_ref[jnp.minimum(s + 1, ns - 1)]
    is_first = jnp.logical_or(s == 0, t != t_prev)
    is_last = jnp.logical_or(s == ns - 1, t != t_next)

    @pl.when(is_first)
    def _():
        acc_ref[...] = jnp.zeros(acc_ref.shape, acc_ref.dtype)

    te = dst_ref.shape[-1]
    rows = t * tn + jax.lax.broadcasted_iota(jnp.int32, (tn, te), 0)
    # Padded edges carry dst = -1 and foreign edges fall outside this tile's
    # row range, so the direct bool->bf16 cast already masks them.
    onehot = (rows == dst_ref[...]).astype(jnp.bfloat16)
    acc_ref[...] += jnp.dot(onehot, msg_ref[...],
                            preferred_element_type=jnp.float32)

    @pl.when(is_last)
    def _():
        aggr = acc_ref[...].astype(jnp.bfloat16)
        h1 = jnp.dot(aggr, w1_ref[...],
                     preferred_element_type=jnp.float32) + b1_ref[...]
        h1 = jnp.maximum(h1, 0.0).astype(jnp.bfloat16)
        h2 = jnp.dot(h1, w2_ref[...],
                     preferred_element_type=jnp.float32) + b2_ref[...]
        if apply_relu:
            h2 = jnp.maximum(h2, 0.0)
        # TODO(synk): train-mode stochastic dropout (drop_ratio) not emulated.
        out_ref[...] = h2.astype(out_ref.dtype)


def _pool_readout_kernel(batch_ref, h_ref, wr1_ref, br1_ref, wr2_ref, br2_ref,
                         out_ref, acc_ref, *, g_pad, tn):
    """global_add_pool (accumulated per node tile) + readout MLP."""
    i = pl.program_id(0)

    @pl.when(i == 0)
    def _():
        acc_ref[...] = jnp.zeros(acc_ref.shape, acc_ref.dtype)

    rows = jax.lax.broadcasted_iota(jnp.int32, (g_pad, tn), 0)
    onehot = (rows == batch_ref[...]).astype(jnp.bfloat16)   # batch=-1 -> masked
    acc_ref[...] += jnp.dot(onehot, h_ref[...],
                            preferred_element_type=jnp.float32)

    @pl.when(i == pl.num_programs(0) - 1)
    def _():
        g = acc_ref[...].astype(jnp.bfloat16)
        r = jnp.dot(g, wr1_ref[...],
                    preferred_element_type=jnp.float32) + br1_ref[...]
        r = jnp.maximum(r, 0.0).astype(jnp.bfloat16)
        out_ref[...] = jnp.dot(r, wr2_ref[...],
                               preferred_element_type=jnp.float32) + br2_ref[...]


# ---------------------------------------------------------------------------
# pallas_call wrappers
# ---------------------------------------------------------------------------
def gin_layer(tile_ids, blk_ids, dst2d, msg, lp, *, apply_relu,
              tn, te, n_pad, d_pad, h_pad):
    total_steps = int(tile_ids.shape[0])
    nt = n_pad // tn
    kernel = functools.partial(_gin_layer_kernel, tn=tn, apply_relu=apply_relu)

    flops = (2 * total_steps * tn * te * d_pad
             + nt * (2 * tn * d_pad * h_pad + 2 * tn * h_pad * d_pad))
    bytes_acc = (total_steps * (te * d_pad * 2 + te * 4)
                 + n_pad * d_pad * 2 + 2 * d_pad * h_pad * 2)

    return pl.pallas_call(
        kernel,
        out_shape=jax.ShapeDtypeStruct((n_pad, d_pad), jnp.bfloat16),
        grid_spec=pltpu.PrefetchScalarGridSpec(
            num_scalar_prefetch=2,
            grid=(total_steps,),
            in_specs=[
                pl.BlockSpec((1, te), lambda s, t, b: (0, b[s])),
                pl.BlockSpec((te, d_pad), lambda s, t, b: (b[s], 0)),
                pl.BlockSpec((d_pad, h_pad), lambda s, t, b: (0, 0)),
                pl.BlockSpec((1, h_pad), lambda s, t, b: (0, 0)),
                pl.BlockSpec((h_pad, d_pad), lambda s, t, b: (0, 0)),
                pl.BlockSpec((1, d_pad), lambda s, t, b: (0, 0)),
            ],
            out_specs=pl.BlockSpec((tn, d_pad), lambda s, t, b: (t[s], 0)),
            scratch_shapes=[pltpu.VMEM((tn, d_pad), jnp.float32)],
        ),
        compiler_params=pltpu.CompilerParams(
            dimension_semantics=("arbitrary",),
            vmem_limit_bytes=_VMEM_LIMIT),
        cost_estimate=pl.CostEstimate(flops=int(flops), transcendentals=0,
                                      bytes_accessed=int(bytes_acc)),
    )(tile_ids, blk_ids, dst2d, msg, lp["w1"], lp["b1"], lp["w2"], lp["b2"])


def pool_readout(batch2d, h, rp, *, tn, g_pad, d_pad, n_pad):
    nt = n_pad // tn
    kernel = functools.partial(_pool_readout_kernel, g_pad=g_pad, tn=tn)
    return pl.pallas_call(
        kernel,
        out_shape=jax.ShapeDtypeStruct((g_pad, d_pad), jnp.float32),
        grid_spec=pltpu.PrefetchScalarGridSpec(
            num_scalar_prefetch=0,
            grid=(nt,),
            in_specs=[
                pl.BlockSpec((1, tn), lambda i: (0, i)),
                pl.BlockSpec((tn, d_pad), lambda i: (i, 0)),
                pl.BlockSpec((d_pad, d_pad), lambda i: (0, 0)),
                pl.BlockSpec((1, d_pad), lambda i: (0, 0)),
                pl.BlockSpec((d_pad, d_pad), lambda i: (0, 0)),
                pl.BlockSpec((1, d_pad), lambda i: (0, 0)),
            ],
            out_specs=pl.BlockSpec((g_pad, d_pad), lambda i: (0, 0)),
            scratch_shapes=[pltpu.VMEM((g_pad, d_pad), jnp.float32)],
        ),
        compiler_params=pltpu.CompilerParams(
            dimension_semantics=("arbitrary",),
            vmem_limit_bytes=_VMEM_LIMIT),
    )(batch2d, h, rp["w1"], rp["b1"], rp["w2"], rp["b2"])


# ---------------------------------------------------------------------------
# Parameters (torch-shaped logical params; eval BN folded; zero-padded tiles)
# ---------------------------------------------------------------------------
def init_params(key, num_layer, emb_dim, d_pad, h_pad):
    glorot = jax.nn.initializers.glorot_uniform()

    def pad2(a, r, c, dtype=jnp.bfloat16):
        out = jnp.zeros((r, c), dtype)
        return out.at[:a.shape[0], :a.shape[1]].set(a.astype(dtype))

    def padrow(a, c, dtype=jnp.float32):
        out = jnp.zeros((1, c), dtype)
        return out.at[:, :a.shape[-1]].set(a.reshape(1, -1).astype(dtype))

    def lin_raw(k, fan_in, fan_out):
        kw, kb = jax.random.split(k)
        bound = 1.0 / float(np.sqrt(fan_in))
        w = jax.random.uniform(kw, (fan_in, fan_out), jnp.float32, -bound, bound)
        b = jax.random.uniform(kb, (fan_out,), jnp.float32, -bound, bound)
        return w, b

    keys = jax.random.split(key, 3 + 3 * num_layer)
    params = {
        "x_emb1": pad2(glorot(keys[0], (NUM_ATOM_TYPE, emb_dim), jnp.float32),
                       NUM_ATOM_TYPE, d_pad),
        "x_emb2": pad2(glorot(keys[1], (NUM_CHIRALITY_TAG, emb_dim), jnp.float32),
                       NUM_CHIRALITY_TAG, d_pad),
        "layers": [],
    }
    for layer in range(num_layer):
        k0, k1, k2 = keys[2 + 3 * layer: 5 + 3 * layer]
        km1, km2 = jax.random.split(k2)
        w1, b1 = lin_raw(km1, emb_dim, 2 * emb_dim)
        w2, b2 = lin_raw(km2, 2 * emb_dim, emb_dim)
        # Eval-mode BatchNorm1d (running stats; freshly initialized here) folded
        # into the second Linear:  BN(x@W2 + b2) = x@(W2*s) + (b2 - mean)*s + beta
        gamma = jnp.ones((emb_dim,), jnp.float32)
        beta = jnp.zeros((emb_dim,), jnp.float32)
        mean = jnp.zeros((emb_dim,), jnp.float32)
        var = jnp.ones((emb_dim,), jnp.float32)
        scale = gamma * jax.lax.rsqrt(var + BN_EPS)
        w2f = w2 * scale[None, :]
        b2f = (b2 - mean) * scale + beta
        params["layers"].append({
            "ee1": pad2(glorot(k0, (NUM_BOND_TYPE, emb_dim), jnp.float32),
                        NUM_BOND_TYPE, d_pad),
            "ee2": pad2(glorot(k1, (NUM_BOND_DIRECTION, emb_dim), jnp.float32),
                        NUM_BOND_DIRECTION, d_pad),
            "w1": pad2(w1, d_pad, h_pad), "b1": padrow(b1, h_pad),
            "w2": pad2(w2f, h_pad, d_pad), "b2": padrow(b2f, d_pad),
        })
    kr1, kr2 = jax.random.split(keys[2 + 3 * num_layer])
    rw1, rb1 = lin_raw(kr1, emb_dim, emb_dim)
    rw2, rb2 = lin_raw(kr2, emb_dim, emb_dim)
    params["readout"] = {"w1": pad2(rw1, d_pad, d_pad), "b1": padrow(rb1, d_pad),
                         "w2": pad2(rw2, d_pad, d_pad), "b2": padrow(rb2, d_pad)}
    return params


# ---------------------------------------------------------------------------
# Host-side CSR preprocessing (self loops, sort by destination, ragged steps)
# ---------------------------------------------------------------------------
def preprocess_graph(x_nodes, edge_index, edge_attr, batch, num_graphs, tn, te):
    x_nodes = np.asarray(x_nodes)
    edge_index = np.asarray(edge_index)
    edge_attr = np.asarray(edge_attr)
    batch = np.asarray(batch)
    N = x_nodes.shape[0]

    loops = np.arange(N, dtype=edge_index.dtype)
    ei = np.concatenate([edge_index, np.stack([loops, loops], axis=0)], axis=1)
    sl_attr = np.zeros((N, 2), dtype=edge_attr.dtype)
    sl_attr[:, 0] = 4                              # self-loop bond type 4, dir 0
    ea = np.concatenate([edge_attr, sl_attr], axis=0)

    src, dst = ei[0], ei[1]
    order = np.argsort(dst, kind="stable")
    src_s, dst_s, ea_s = src[order], dst[order], ea[order]

    E = int(src_s.shape[0])
    E_pad = max(te, -(-E // te) * te)
    N_pad = max(tn, -(-N // tn) * tn)
    nt = N_pad // tn
    nb_total = E_pad // te

    src_p = np.zeros((E_pad,), np.int32); src_p[:E] = src_s
    dst_p = np.full((E_pad,), -1, np.int32); dst_p[:E] = dst_s   # -1 = padded
    ea_p = np.zeros((E_pad, 2), np.int32); ea_p[:E] = ea_s

    # Per node-tile range of edge blocks that may contain its incoming edges.
    bounds = np.searchsorted(dst_s, np.arange(nt + 1) * tn, side="left")
    e_lo, e_hi = bounds[:-1], bounds[1:]
    blk_lo = np.minimum(e_lo // te, nb_total - 1)
    blk_hi = np.maximum(-(-e_hi // te), blk_lo + 1)   # >= 1 block per tile

    # Ragged 1-D schedule: one grid step per occupied (node_tile, edge_block).
    tile_ids, blk_ids = [], []
    for t in range(nt):
        for b in range(int(blk_lo[t]), int(blk_hi[t])):
            tile_ids.append(t)
            blk_ids.append(b)
    tile_ids = np.asarray(tile_ids, np.int32)
    blk_ids = np.asarray(blk_ids, np.int32)

    x_p = np.zeros((N_pad, 2), np.int32); x_p[:N] = x_nodes
    batch_p = np.full((1, N_pad), -1, np.int32); batch_p[0, :N] = batch
    g_pad = max(8, -(-num_graphs // 8) * 8)

    return dict(
        x_nodes=jnp.asarray(x_p),
        src=jnp.asarray(src_p),
        dst1d=jnp.asarray(dst_p),
        dst2d=jnp.asarray(dst_p.reshape(1, E_pad)),
        ea=jnp.asarray(ea_p),
        tile_ids=jnp.asarray(tile_ids),
        blk_ids=jnp.asarray(blk_ids),
        batch1d=jnp.asarray(batch_p[0]),
        batch2d=jnp.asarray(batch_p),
        n_pad=N_pad, e_pad=E_pad, g_pad=g_pad, nt=nt,
    )


def _pick_pool_tile(n_pad):
    for c in (1024, 512, 256, 128):
        if n_pad % c == 0:
            return c
    return n_pad


# ---------------------------------------------------------------------------
# Forward (glue in JAX; hot path in the two tiled Pallas kernels)
# ---------------------------------------------------------------------------
def gnn_forward(params, x_nodes_p, src_p, dst2d, ea_p, tile_ids, blk_ids,
                batch2d, *, num_layer, tn, te, n_pad, d_pad, h_pad, g_pad,
                tn_pool):
    h = (params["x_emb1"][x_nodes_p[:, 0]]
         + params["x_emb2"][x_nodes_p[:, 1]]).astype(jnp.bfloat16)   # [N_pad, D]

    for layer in range(num_layer):
        lp = params["layers"][layer]
        # TODO(synk): per-layer h[src] gather + edge-embedding lookup still run
        # as XLA gathers that materialize msg in HBM; an in-kernel per-edge-block
        # DMA gather would remove this round trip and fuse all layers.
        eemb = lp["ee1"][ea_p[:, 0]] + lp["ee2"][ea_p[:, 1]]
        msg = (h[src_p] + eemb).astype(jnp.bfloat16)                  # [E_pad, D]
        h = gin_layer(tile_ids, blk_ids, dst2d, msg, lp,
                      apply_relu=(layer != num_layer - 1),
                      tn=tn, te=te, n_pad=n_pad, d_pad=d_pad, h_pad=h_pad)

    # JK == 'last' -> node_representation = h
    return pool_readout(batch2d, h, params["readout"],
                        tn=tn_pool, g_pad=g_pad, d_pad=d_pad, n_pad=n_pad)


# ---------------------------------------------------------------------------
# Pure-JAX reference (same folded params, f32 math) for a tolerance check
# ---------------------------------------------------------------------------
def gnn_reference(params, x_nodes_p, src_p, dst1d, ea_p, batch1d,
                  *, num_layer, n_pad, g_pad):
    h = (params["x_emb1"][x_nodes_p[:, 0]]
         + params["x_emb2"][x_nodes_p[:, 1]]).astype(jnp.float32)
    valid_e = (dst1d >= 0)
    dst_c = jnp.where(valid_e, dst1d, 0)
    for layer in range(num_layer):
        lp = params["layers"][layer]
        eemb = (lp["ee1"][ea_p[:, 0]] + lp["ee2"][ea_p[:, 1]]).astype(jnp.float32)
        msg = (h[src_p] + eemb) * valid_e[:, None]
        aggr = jax.ops.segment_sum(msg, dst_c, num_segments=n_pad)
        h1 = jnp.maximum(aggr @ lp["w1"].astype(jnp.float32) + lp["b1"], 0.0)
        h2 = h1 @ lp["w2"].astype(jnp.float32) + lp["b2"]
        if layer != num_layer - 1:
            h2 = jnp.maximum(h2, 0.0)
        h = h2
    valid_n = (batch1d >= 0)
    b_c = jnp.where(valid_n, batch1d, 0)
    pooled = jax.ops.segment_sum(h * valid_n[:, None], b_c, num_segments=g_pad)
    rp = params["readout"]
    r = jnp.maximum(pooled @ rp["w1"].astype(jnp.float32) + rp["b1"], 0.0)
    return r @ rp["w2"].astype(jnp.float32) + rp["b2"]


# ---------------------------------------------------------------------------
if __name__ == "__main__":
    num_layer = 2
    emb_dim = 32
    N = 16            # nodes
    E = 24            # edges (before self loops)
    num_graphs = 2

    # Large edge blocks amortize per-step overhead; 256-wide node tiles fill
    # the v6e/v7x MXU, falling back to 128 when there would be <2 node tiles
    # (keeps both v7x TensorCores/megacore usable on small batches).
    TE = 1024
    TN = 256 if -(-N // 256) >= 2 else 128
    D_PAD = max(128, -(-emb_dim // 128) * 128)          # lane-dense feature dim
    H_PAD = max(128, -(-(2 * emb_dim) // 128) * 128)    # MLP hidden dim

    key = jax.random.PRNGKey(0)
    kp, k1, k2, k3, k4, k5, k6 = jax.random.split(key, 7)
    params = init_params(kp, num_layer, emb_dim, D_PAD, H_PAD)

    # node features: [atom_type, chirality_tag]
    x_nodes = jnp.stack(
        [jax.random.randint(k1, (N,), 0, NUM_ATOM_TYPE, dtype=jnp.int32),
         jax.random.randint(k2, (N,), 0, NUM_CHIRALITY_TAG, dtype=jnp.int32)],
        axis=1)
    # edges within the two graphs (nodes 0..7 -> graph 0, 8..15 -> graph 1)
    src0 = jax.random.randint(k3, (E,), 0, N // 2, dtype=jnp.int32)
    dst0 = jax.random.randint(k4, (E,), 0, N // 2, dtype=jnp.int32)
    half = E // 2
    offset = jnp.where(jnp.arange(E) < half, 0, N // 2).astype(jnp.int32)
    edge_index = jnp.stack([src0 + offset, dst0 + offset], axis=0)
    # edge attrs: [bond_type, bond_direction]
    edge_attr = jnp.stack(
        [jax.random.randint(k5, (E,), 0, NUM_BOND_TYPE, dtype=jnp.int32),
         jax.random.randint(k6, (E,), 0, NUM_BOND_DIRECTION, dtype=jnp.int32)],
        axis=1)
    batch = jnp.concatenate(
        [jnp.zeros((N // 2,), jnp.int32), jnp.ones((N // 2,), jnp.int32)])

    prep = preprocess_graph(x_nodes, edge_index, edge_attr, batch,
                            num_graphs, TN, TE)
    TN_POOL = _pick_pool_tile(prep["n_pad"])

    fwd = jax.jit(functools.partial(
        gnn_forward, num_layer=num_layer, tn=TN, te=TE,
        n_pad=prep["n_pad"], d_pad=D_PAD, h_pad=H_PAD, g_pad=prep["g_pad"],
        tn_pool=TN_POOL))

    out_padded = fwd(params, prep["x_nodes"], prep["src"], prep["dst2d"],
                     prep["ea"], prep["tile_ids"], prep["blk_ids"],
                     prep["batch2d"])
    out = out_padded[:num_graphs, :emb_dim]
    jax.block_until_ready(out)

    # Tolerance-asserted pure-JAX reference (bf16 kernel vs f32 reference).
    ref_padded = gnn_reference(params, prep["x_nodes"], prep["src"],
                               prep["dst1d"], prep["ea"], prep["batch1d"],
                               num_layer=num_layer, n_pad=prep["n_pad"],
                               g_pad=prep["g_pad"])
    ref = ref_padded[:num_graphs, :emb_dim]
    max_err = float(jnp.max(jnp.abs(out.astype(jnp.float32) - ref)))
    tol = 2e-2 + 0.15 * float(jnp.max(jnp.abs(ref)))

    assert out.shape == (num_graphs, emb_dim)
    assert bool(jnp.all(jnp.isfinite(out)))
    assert max_err < tol, (max_err, tol)
    print("KERNEL_OK")
</pallas_src>

<mosaic_0001>
module attributes {stable_mosaic.version = 11 : i64} {
  func.func @_gin_layer_kernel(%arg0: i32, %arg1: memref<1xi32, #tpu.memory_space<smem>>, %arg2: memref<1xi32, #tpu.memory_space<smem>>, %arg3: memref<1x1024xi32, #tpu.memory_space<vmem>>, %arg4: memref<1024x128xbf16, #tpu.memory_space<vmem>>, %arg5: memref<128x128xbf16, #tpu.memory_space<vmem>>, %arg6: memref<1x128xf32, #tpu.memory_space<vmem>>, %arg7: memref<128x128xbf16, #tpu.memory_space<vmem>>, %arg8: memref<1x128xf32, #tpu.memory_space<vmem>>, %arg9: memref<128x128xbf16, #tpu.memory_space<vmem>>, %arg10: memref<128x128xf32, #tpu.memory_space<vmem>>) attributes {dimension_semantics = [#tpu.dimension_semantics<arbitrary>], iteration_bounds = array<i64: 1>, scalar_prefetch = 2 : i64, scratch_operands = 1 : i64, tpu.core_type = #tpu.core_type<tc>, window_params = [{transform_indices = @transform_0, window_bounds = array<i64: 1, 1024>}, {transform_indices = @transform_1, window_bounds = array<i64: 1024, 128>}, {pipeline_mode = #tpu.pipeline_mode<synchronous>, transform_indices = @transform_2, window_bounds = array<i64: 128, 128>}, {pipeline_mode = #tpu.pipeline_mode<synchronous>, transform_indices = @transform_3, window_bounds = array<i64: 1, 128>}, {pipeline_mode = #tpu.pipeline_mode<synchronous>, transform_indices = @transform_4, window_bounds = array<i64: 128, 128>}, {pipeline_mode = #tpu.pipeline_mode<synchronous>, transform_indices = @transform_5, window_bounds = array<i64: 1, 128>}, {transform_indices = @transform_6, window_bounds = array<i64: 128, 128>}]} {
    %0 = arith.index_cast %arg0 : i32 to index
    %1 = memref.load %arg1[%0] : memref<1xi32, #tpu.memory_space<smem>>
    %c1_i32 = arith.constant 1 : i32
    %2 = arith.subi %arg0, %c1_i32 : i32
    %c0_i32 = arith.constant 0 : i32
    %3 = arith.maxsi %2, %c0_i32 : i32
    %4 = arith.index_cast %3 : i32 to index
    %5 = memref.load %arg1[%4] : memref<1xi32, #tpu.memory_space<smem>>
    %c1_i32_0 = arith.constant 1 : i32
    %6 = arith.addi %arg0, %c1_i32_0 : i32
    %c0_i32_1 = arith.constant 0 : i32
    %7 = arith.minsi %6, %c0_i32_1 : i32
    %8 = arith.index_cast %7 : i32 to index
    %9 = memref.load %arg1[%8] : memref<1xi32, #tpu.memory_space<smem>>
    %c0_i32_2 = arith.constant 0 : i32
    %10 = arith.cmpi eq, %arg0, %c0_i32_2 : i32
    %11 = arith.cmpi ne, %1, %5 : i32
    %12 = arith.ori %10, %11 : i1
    %c0_i32_3 = arith.constant 0 : i32
    %13 = arith.cmpi eq, %arg0, %c0_i32_3 : i32
    %14 = arith.cmpi ne, %1, %9 : i32
    %15 = arith.ori %13, %14 : i1
    %16 = arith.extui %12 : i1 to i32
    %c0_i32_4 = arith.constant 0 : i32
    %17 = arith.cmpi ne, %16, %c0_i32_4 : i32
    scf.if %17 {
      %cst_13 = arith.constant 0.000000e+00 : f32
      %35 = vector.broadcast %cst_13 : f32 to vector<128x128xf32>
      %c0_14 = arith.constant 0 : index
      %c0_15 = arith.constant 0 : index
      %36 = vector.load %arg10[%c0_14, %c0_15] : memref<128x128xf32, #tpu.memory_space<vmem>>, vector<128x128xf32>
      tpu.vector_store %arg10[%c0_14, %c0_15], %35 {strides = array<i32>} : memref<128x128xf32, #tpu.memory_space<vmem>>, vector<128x128xf32>,
    } else {
    }
    %c128_i32 = arith.constant 128 : i32
    %18 = arith.muli %1, %c128_i32 : i32
    %19 = tpu.iota {dimensions = array<i32: 0>} : vector<128x1024xi32>
    %20 = vector.broadcast %18 : i32 to vector<128x1024xi32>
    %21 = arith.addi %20, %19 : vector<128x1024xi32>
    %c0 = arith.constant 0 : index
    %c0_5 = arith.constant 0 : index
    %22 = vector.load %arg3[%c0, %c0_5] : memref<1x1024xi32, #tpu.memory_space<vmem>>, vector<1x1024xi32>
    %23 = vector.broadcast %22 : vector<1x1024xi32> to vector<128x1024xi32>
    %24 = arith.cmpi eq, %21, %23 : vector<128x1024xi32>
    %25 = arith.extui %24 : vector<128x1024xi1> to vector<128x1024xi32>
    %26 = arith.sitofp %25 : vector<128x1024xi32> to vector<128x1024xf32>
    %27 = arith.truncf %26 : vector<128x1024xf32> to vector<128x1024xbf16>
    %c0_6 = arith.constant 0 : index
    %c0_7 = arith.constant 0 : index
    %28 = vector.load %arg10[%c0_6, %c0_7] : memref<128x128xf32, #tpu.memory_space<vmem>>, vector<128x128xf32>
    %c0_8 = arith.constant 0 : index
    %c0_9 = arith.constant 0 : index
    %29 = vector.load %arg4[%c0_8, %c0_9] : memref<1024x128xbf16, #tpu.memory_space<vmem>>, vector<1024x128xbf16>
    %cst = arith.constant dense<0.000000e+00> : vector<128x128xf32>
    %30 = tpu.matmul %27, %29, %cst {dimension_numbers = #tpu.dot_dimension_numbers<[1], [0], [0], [1], [0, 0, 1, 1], [], []>} : vector<128x1024xbf16>, vector<1024x128xbf16>, vector<128x128xf32> -> vector<128x128xf32>
    %31 = arith.addf %28, %30 : vector<128x128xf32>
    %c0_10 = arith.constant 0 : index
    %c0_11 = arith.constant 0 : index
    %32 = vector.load %arg10[%c0_10, %c0_11] : memref<128x128xf32, #tpu.memory_space<vmem>>, vector<128x128xf32>
    tpu.vector_store %arg10[%c0_10, %c0_11], %31 {strides = array<i32>} : memref<128x128xf32, #tpu.memory_space<vmem>>, vector<128x128xf32>,
    %33 = arith.extui %15 : i1 to i32
    %c0_i32_12 = arith.constant 0 : i32
    %34 = arith.cmpi ne, %33, %c0_i32_12 : i32
    scf.if %34 {
      %c0_13 = arith.constant 0 : index
      %c0_14 = arith.constant 0 : index
      %35 = vector.load %arg10[%c0_13, %c0_14] : memref<128x128xf32, #tpu.memory_space<vmem>>, vector<128x128xf32>
      %36 = arith.truncf %35 : vector<128x128xf32> to vector<128x128xbf16>
      %c0_15 = arith.constant 0 : index
      %c0_16 = arith.constant 0 : index
      %37 = vector.load %arg5[%c0_15, %c0_16] : memref<128x128xbf16, #tpu.memory_space<vmem>>, vector<128x128xbf16>
      %cst_17 = arith.constant dense<0.000000e+00> : vector<128x128xf32>
      %38 = tpu.matmul %36, %37, %cst_17 {dimension_numbers = #tpu.dot_dimension_numbers<[1], [0], [0], [1], [0, 0, 1, 1], [], []>} : vector<128x128xbf16>, vector<128x128xbf16>, vector<128x128xf32> -> vector<128x128xf32>
      %c0_18 = arith.constant 0 : index
      %c0_19 = arith.constant 0 : index
      %39 = vector.load %arg6[%c0_18, %c0_19] : memref<1x128xf32, #tpu.memory_space<vmem>>, vector<1x128xf32>
      %40 = vector.broadcast %39 : vector<1x128xf32> to vector<128x128xf32>
      %41 = arith.addf %38, %40 : vector<128x128xf32>
      %cst_20 = arith.constant 0.000000e+00 : f32
      %42 = vector.broadcast %cst_20 : f32 to vector<128x128xf32>
      %43 = arith.maximumf %41, %42 : vector<128x128xf32>
      %44 = arith.truncf %43 : vector<128x128xf32> to vector<128x128xbf16>
      %c0_21 = arith.constant 0 : index
      %c0_22 = arith.constant 0 : index
      %45 = vector.load %arg7[%c0_21, %c0_22] : memref<128x128xbf16, #tpu.memory_space<vmem>>, vector<128x128xbf16>
      %cst_23 = arith.constant dense<0.000000e+00> : vector<128x128xf32>
      %46 = tpu.matmul %44, %45, %cst_23 {dimension_numbers = #tpu.dot_dimension_numbers<[1], [0], [0], [1], [0, 0, 1, 1], [], []>} : vector<128x128xbf16>, vector<128x128xbf16>, vector<128x128xf32> -> vector<128x128xf32>
      %c0_24 = arith.constant 0 : index
      %c0_25 = arith.constant 0 : index
      %47 = vector.load %arg8[%c0_24, %c0_25] : memref<1x128xf32, #tpu.memory_space<vmem>>, vector<1x128xf32>
      %48 = vector.broadcast %47 : vector<1x128xf32> to vector<128x128xf32>
      %49 = arith.addf %46, %48 : vector<128x128xf32>
      %50 = arith.truncf %49 : vector<128x128xf32> to vector<128x128xbf16>
      %c0_26 = arith.constant 0 : index
      %c0_27 = arith.constant 0 : index
      %51 = vector.load %arg9[%c0_26, %c0_27] : memref<128x128xbf16, #tpu.memory_space<vmem>>, vector<128x128xbf16>
      tpu.vector_store %arg9[%c0_26, %c0_27], %50 {strides = array<i32>} : memref<128x128xbf16, #tpu.memory_space<vmem>>, vector<128x128xbf16>,
    } else {
    }
    return
  }
  func.func @transform_0(%arg0: i32, %arg1: memref<1xi32, #tpu.memory_space<smem>>, %arg2: memref<1xi32, #tpu.memory_space<smem>>) -> (i32, i32) {
    %0 = arith.index_cast %arg0 : i32 to index
    %1 = memref.load %arg2[%0] : memref<1xi32, #tpu.memory_space<smem>>
    %c0_i32 = arith.constant 0 : i32
    %c0_i32_0 = arith.constant 0 : i32
    return %c0_i32, %1 : i32, i32
  }
  func.func @transform_1(%arg0: i32, %arg1: memref<1xi32, #tpu.memory_space<smem>>, %arg2: memref<1xi32, #tpu.memory_space<smem>>) -> (i32, i32) {
    %0 = arith.index_cast %arg0 : i32 to index
    %1 = memref.load %arg2[%0] : memref<1xi32, #tpu.memory_space<smem>>
    %c0_i32 = arith.constant 0 : i32
    %c0_i32_0 = arith.constant 0 : i32
    return %1, %c0_i32 : i32, i32
  }
  func.func @transform_2(%arg0: i32, %arg1: memref<1xi32, #tpu.memory_space<smem>>, %arg2: memref<1xi32, #tpu.memory_space<smem>>) -> (i32, i32) {
    %c0_i32 = arith.constant 0 : i32
    %c0_i32_0 = arith.constant 0 : i32
    %c0_i32_1 = arith.constant 0 : i32
    return %c0_i32, %c0_i32_0 : i32, i32
  }
  func.func @transform_3(%arg0: i32, %arg1: memref<1xi32, #tpu.memory_space<smem>>, %arg2: memref<1xi32, #tpu.memory_space<smem>>) -> (i32, i32) {
    %c0_i32 = arith.constant 0 : i32
    %c0_i32_0 = arith.constant 0 : i32
    %c0_i32_1 = arith.constant 0 : i32
    return %c0_i32, %c0_i32_0 : i32, i32
  }
  func.func @transform_4(%arg0: i32, %arg1: memref<1xi32, #tpu.memory_space<smem>>, %arg2: memref<1xi32, #tpu.memory_space<smem>>) -> (i32, i32) {
    %c0_i32 = arith.constant 0 : i32
    %c0_i32_0 = arith.constant 0 : i32
    %c0_i32_1 = arith.constant 0 : i32
    return %c0_i32, %c0_i32_0 : i32, i32
  }
  func.func @transform_5(%arg0: i32, %arg1: memref<1xi32, #tpu.memory_space<smem>>, %arg2: memref<1xi32, #tpu.memory_space<smem>>) -> (i32, i32) {
    %c0_i32 = arith.constant 0 : i32
    %c0_i32_0 = arith.constant 0 : i32
    %c0_i32_1 = arith.constant 0 : i32
    return %c0_i32, %c0_i32_0 : i32, i32
  }
  func.func @transform_6(%arg0: i32, %arg1: memref<1xi32, #tpu.memory_space<smem>>, %arg2: memref<1xi32, #tpu.memory_space<smem>>) -> (i32, i32) {
    %0 = arith.index_cast %arg0 : i32 to index
    %1 = memref.load %arg1[%0] : memref<1xi32, #tpu.memory_space<smem>>
    %c0_i32 = arith.constant 0 : i32
    %c0_i32_0 = arith.constant 0 : i32
    return %1, %c0_i32 : i32, i32
  }
}

module attributes {stable_mosaic.version = 11 : i64} {
  func.func @_pool_readout_kernel(%arg0: i32, %arg1: memref<1x128xi32, #tpu.memory_space<vmem>>, %arg2: memref<128x128xbf16, #tpu.memory_space<vmem>>, %arg3: memref<128x128xbf16, #tpu.memory_space<vmem>>, %arg4: memref<1x128xf32, #tpu.memory_space<vmem>>, %arg5: memref<128x128xbf16, #tpu.memory_space<vmem>>, %arg6: memref<1x128xf32, #tpu.memory_space<vmem>>, %arg7: memref<8x128xf32, #tpu.memory_space<vmem>>, %arg8: memref<8x128xf32, #tpu.memory_space<vmem>>) attributes {dimension_semantics = [#tpu.dimension_semantics<arbitrary>], iteration_bounds = array<i64: 1>, scalar_prefetch = 0 : i64, scratch_operands = 1 : i64, tpu.core_type = #tpu.core_type<tc>, window_params = [{transform_indices = @transform_0, window_bounds = array<i64: 1, 128>}, {transform_indices = @transform_1, window_bounds = array<i64: 128, 128>}, {pipeline_mode = #tpu.pipeline_mode<synchronous>, transform_indices = @transform_2, window_bounds = array<i64: 128, 128>}, {pipeline_mode = #tpu.pipeline_mode<synchronous>, transform_indices = @transform_3, window_bounds = array<i64: 1, 128>}, {pipeline_mode = #tpu.pipeline_mode<synchronous>, transform_indices = @transform_4, window_bounds = array<i64: 128, 128>}, {pipeline_mode = #tpu.pipeline_mode<synchronous>, transform_indices = @transform_5, window_bounds = array<i64: 1, 128>}, {pipeline_mode = #tpu.pipeline_mode<synchronous>, transform_indices = @transform_6, window_bounds = array<i64: 8, 128>}]} {
    %c0_i32 = arith.constant 0 : i32
    %0 = arith.cmpi eq, %arg0, %c0_i32 : i32
    %1 = arith.extui %0 : i1 to i32
    %c0_i32_0 = arith.constant 0 : i32
    %2 = arith.cmpi ne, %1, %c0_i32_0 : i32
    scf.if %2 {
      %cst_10 = arith.constant 0.000000e+00 : f32
      %18 = vector.broadcast %cst_10 : f32 to vector<8x128xf32>
      %c0_11 = arith.constant 0 : index
      %c0_12 = arith.constant 0 : index
      %19 = vector.load %arg8[%c0_11, %c0_12] : memref<8x128xf32, #tpu.memory_space<vmem>>, vector<8x128xf32>
      tpu.vector_store %arg8[%c0_11, %c0_12], %18 {strides = array<i32>} : memref<8x128xf32, #tpu.memory_space<vmem>>, vector<8x128xf32>,
    } else {
    }
    %3 = tpu.iota {dimensions = array<i32: 0>} : vector<8x128xi32>
    %c0 = arith.constant 0 : index
    %c0_1 = arith.constant 0 : index
    %4 = vector.load %arg1[%c0, %c0_1] : memref<1x128xi32, #tpu.memory_space<vmem>>, vector<1x128xi32>
    %5 = vector.broadcast %4 : vector<1x128xi32> to vector<8x128xi32>
    %6 = arith.cmpi eq, %3, %5 : vector<8x128xi32>
    %7 = arith.extui %6 : vector<8x128xi1> to vector<8x128xi32>
    %8 = arith.sitofp %7 : vector<8x128xi32> to vector<8x128xf32>
    %9 = arith.truncf %8 : vector<8x128xf32> to vector<8x128xbf16>
    %c0_2 = arith.constant 0 : index
    %c0_3 = arith.constant 0 : index
    %10 = vector.load %arg8[%c0_2, %c0_3] : memref<8x128xf32, #tpu.memory_space<vmem>>, vector<8x128xf32>
    %c0_4 = arith.constant 0 : index
    %c0_5 = arith.constant 0 : index
    %11 = vector.load %arg2[%c0_4, %c0_5] : memref<128x128xbf16, #tpu.memory_space<vmem>>, vector<128x128xbf16>
    %cst = arith.constant dense<0.000000e+00> : vector<8x128xf32>
    %12 = tpu.matmul %9, %11, %cst {dimension_numbers = #tpu.dot_dimension_numbers<[1], [0], [0], [1], [0, 0, 1, 1], [], []>} : vector<8x128xbf16>, vector<128x128xbf16>, vector<8x128xf32> -> vector<8x128xf32>
    %13 = arith.addf %10, %12 : vector<8x128xf32>
    %c0_6 = arith.constant 0 : index
    %c0_7 = arith.constant 0 : index
    %14 = vector.load %arg8[%c0_6, %c0_7] : memref<8x128xf32, #tpu.memory_space<vmem>>, vector<8x128xf32>
    tpu.vector_store %arg8[%c0_6, %c0_7], %13 {strides = array<i32>} : memref<8x128xf32, #tpu.memory_space<vmem>>, vector<8x128xf32>,
    %c0_i32_8 = arith.constant 0 : i32
    %15 = arith.cmpi eq, %arg0, %c0_i32_8 : i32
    %16 = arith.extui %15 : i1 to i32
    %c0_i32_9 = arith.constant 0 : i32
    %17 = arith.cmpi ne, %16, %c0_i32_9 : i32
    scf.if %17 {
      %c0_10 = arith.constant 0 : index
      %c0_11 = arith.constant 0 : index
      %18 = vector.load %arg8[%c0_10, %c0_11] : memref<8x128xf32, #tpu.memory_space<vmem>>, vector<8x128xf32>
      %19 = arith.truncf %18 : vector<8x128xf32> to vector<8x128xbf16>
      %c0_12 = arith.constant 0 : index
      %c0_13 = arith.constant 0 : index
      %20 = vector.load %arg3[%c0_12, %c0_13] : memref<128x128xbf16, #tpu.memory_space<vmem>>, vector<128x128xbf16>
      %cst_14 = arith.constant dense<0.000000e+00> : vector<8x128xf32>
      %21 = tpu.matmul %19, %20, %cst_14 {dimension_numbers = #tpu.dot_dimension_numbers<[1], [0], [0], [1], [0, 0, 1, 1], [], []>} : vector<8x128xbf16>, vector<128x128xbf16>, vector<8x128xf32> -> vector<8x128xf32>
      %c0_15 = arith.constant 0 : index
      %c0_16 = arith.constant 0 : index
      %22 = vector.load %arg4[%c0_15, %c0_16] : memref<1x128xf32, #tpu.memory_space<vmem>>, vector<1x128xf32>
      %23 = vector.broadcast %22 : vector<1x128xf32> to vector<8x128xf32>
      %24 = arith.addf %21, %23 : vector<8x128xf32>
      %cst_17 = arith.constant 0.000000e+00 : f32
      %25 = vector.broadcast %cst_17 : f32 to vector<8x128xf32>
      %26 = arith.maximumf %24, %25 : vector<8x128xf32>
      %27 = arith.truncf %26 : vector<8x128xf32> to vector<8x128xbf16>
      %c0_18 = arith.constant 0 : index
      %c0_19 = arith.constant 0 : index
      %28 = vector.load %arg5[%c0_18, %c0_19] : memref<128x128xbf16, #tpu.memory_space<vmem>>, vector<128x128xbf16>
      %cst_20 = arith.constant dense<0.000000e+00> : vector<8x128xf32>
      %29 = tpu.matmul %27, %28, %cst_20 {dimension_numbers = #tpu.dot_dimension_numbers<[1], [0], [0], [1], [0, 0, 1, 1], [], []>} : vector<8x128xbf16>, vector<128x128xbf16>, vector<8x128xf32> -> vector<8x128xf32>
      %c0_21 = arith.constant 0 : index
      %c0_22 = arith.constant 0 : index
      %30 = vector.load %arg6[%c0_21, %c0_22] : memref<1x128xf32, #tpu.memory_space<vmem>>, vector<1x128xf32>
      %31 = vector.broadcast %30 : vector<1x128xf32> to vector<8x128xf32>
      %32 = arith.addf %29, %31 : vector<8x128xf32>
      %c0_23 = arith.constant 0 : index
      %c0_24 = arith.constant 0 : index
      %33 = vector.load %arg7[%c0_23, %c0_24] : memref<8x128xf32, #tpu.memory_space<vmem>>, vector<8x128xf32>
      tpu.vector_store %arg7[%c0_23, %c0_24], %32 {strides = array<i32>} : memref<8x128xf32, #tpu.memory_space<vmem>>, vector<8x128xf32>,
    } else {
    }
    return
  }
  func.func @transform_0(%arg0: i32) -> (i32, i32) {
    %c0_i32 = arith.constant 0 : i32
    %c0_i32_0 = arith.constant 0 : i32
    return %c0_i32, %arg0 : i32, i32
  }
  func.func @transform_1(%arg0: i32) -> (i32, i32) {
    %c0_i32 = arith.constant 0 : i32
    %c0_i32_0 = arith.constant 0 : i32
    return %arg0, %c0_i32 : i32, i32
  }
  func.func @transform_2(%arg0: i32) -> (i32, i32) {
    %c0_i32 = arith.constant 0 : i32
    %c0_i32_0 = arith.constant 0 : i32
    %c0_i32_1 = arith.constant 0 : i32
    return %c0_i32, %c0_i32_0 : i32, i32
  }
  func.func @transform_3(%arg0: i32) -> (i32, i32) {
    %c0_i32 = arith.constant 0 : i32
    %c0_i32_0 = arith.constant 0 : i32
    %c0_i32_1 = arith.constant 0 : i32
    return %c0_i32, %c0_i32_0 : i32, i32
  }
  func.func @transform_4(%arg0: i32) -> (i32, i32) {
    %c0_i32 = arith.constant 0 : i32
    %c0_i32_0 = arith.constant 0 : i32
    %c0_i32_1 = arith.constant 0 : i32
    return %c0_i32, %c0_i32_0 : i32, i32
  }
  func.func @transform_5(%arg0: i32) -> (i32, i32) {
    %c0_i32 = arith.constant 0 : i32
    %c0_i32_0 = arith.constant 0 : i32
    %c0_i32_1 = arith.constant 0 : i32
    return %c0_i32, %c0_i32_0 : i32, i32
  }
  func.func @transform_6(%arg0: i32) -> (i32, i32) {
    %c0_i32 = arith.constant 0 : i32
    %c0_i32_0 = arith.constant 0 : i32
    %c0_i32_1 = arith.constant 0 : i32
    return %c0_i32, %c0_i32_0 : i32, i32
  }
}

module attributes {stable_mosaic.version = 11 : i64} {
  func.func @_gin_layer_kernel(%arg0: i32, %arg1: memref<1xi32, #tpu.memory_space<smem>>, %arg2: memref<1xi32, #tpu.memory_space<smem>>, %arg3: memref<1x1024xi32, #tpu.memory_space<vmem>>, %arg4: memref<1024x128xbf16, #tpu.memory_space<vmem>>, %arg5: memref<128x128xbf16, #tpu.memory_space<vmem>>, %arg6: memref<1x128xf32, #tpu.memory_space<vmem>>, %arg7: memref<128x128xbf16, #tpu.memory_space<vmem>>, %arg8: memref<1x128xf32, #tpu.memory_space<vmem>>, %arg9: memref<128x128xbf16, #tpu.memory_space<vmem>>, %arg10: memref<128x128xf32, #tpu.memory_space<vmem>>) attributes {dimension_semantics = [#tpu.dimension_semantics<arbitrary>], iteration_bounds = array<i64: 1>, scalar_prefetch = 2 : i64, scratch_operands = 1 : i64, tpu.core_type = #tpu.core_type<tc>, window_params = [{transform_indices = @transform_0, window_bounds = array<i64: 1, 1024>}, {transform_indices = @transform_1, window_bounds = array<i64: 1024, 128>}, {pipeline_mode = #tpu.pipeline_mode<synchronous>, transform_indices = @transform_2, window_bounds = array<i64: 128, 128>}, {pipeline_mode = #tpu.pipeline_mode<synchronous>, transform_indices = @transform_3, window_bounds = array<i64: 1, 128>}, {pipeline_mode = #tpu.pipeline_mode<synchronous>, transform_indices = @transform_4, window_bounds = array<i64: 128, 128>}, {pipeline_mode = #tpu.pipeline_mode<synchronous>, transform_indices = @transform_5, window_bounds = array<i64: 1, 128>}, {transform_indices = @transform_6, window_bounds = array<i64: 128, 128>}]} {
    %0 = arith.index_cast %arg0 : i32 to index
    %1 = memref.load %arg1[%0] : memref<1xi32, #tpu.memory_space<smem>>
    %c1_i32 = arith.constant 1 : i32
    %2 = arith.subi %arg0, %c1_i32 : i32
    %c0_i32 = arith.constant 0 : i32
    %3 = arith.maxsi %2, %c0_i32 : i32
    %4 = arith.index_cast %3 : i32 to index
    %5 = memref.load %arg1[%4] : memref<1xi32, #tpu.memory_space<smem>>
    %c1_i32_0 = arith.constant 1 : i32
    %6 = arith.addi %arg0, %c1_i32_0 : i32
    %c0_i32_1 = arith.constant 0 : i32
    %7 = arith.minsi %6, %c0_i32_1 : i32
    %8 = arith.index_cast %7 : i32 to index
    %9 = memref.load %arg1[%8] : memref<1xi32, #tpu.memory_space<smem>>
    %c0_i32_2 = arith.constant 0 : i32
    %10 = arith.cmpi eq, %arg0, %c0_i32_2 : i32
    %11 = arith.cmpi ne, %1, %5 : i32
    %12 = arith.ori %10, %11 : i1
    %c0_i32_3 = arith.constant 0 : i32
    %13 = arith.cmpi eq, %arg0, %c0_i32_3 : i32
    %14 = arith.cmpi ne, %1, %9 : i32
    %15 = arith.ori %13, %14 : i1
    %16 = arith.extui %12 : i1 to i32
    %c0_i32_4 = arith.constant 0 : i32
    %17 = arith.cmpi ne, %16, %c0_i32_4 : i32
    scf.if %17 {
      %cst_13 = arith.constant 0.000000e+00 : f32
      %35 = vector.broadcast %cst_13 : f32 to vector<128x128xf32>
      %c0_14 = arith.constant 0 : index
      %c0_15 = arith.constant 0 : index
      %36 = vector.load %arg10[%c0_14, %c0_15] : memref<128x128xf32, #tpu.memory_space<vmem>>, vector<128x128xf32>
      tpu.vector_store %arg10[%c0_14, %c0_15], %35 {strides = array<i32>} : memref<128x128xf32, #tpu.memory_space<vmem>>, vector<128x128xf32>,
    } else {
    }
    %c128_i32 = arith.constant 128 : i32
    %18 = arith.muli %1, %c128_i32 : i32
    %19 = tpu.iota {dimensions = array<i32: 0>} : vector<128x1024xi32>
    %20 = vector.broadcast %18 : i32 to vector<128x1024xi32>
    %21 = arith.addi %20, %19 : vector<128x1024xi32>
    %c0 = arith.constant 0 : index
    %c0_5 = arith.constant 0 : index
    %22 = vector.load %arg3[%c0, %c0_5] : memref<1x1024xi32, #tpu.memory_space<vmem>>, vector<1x1024xi32>
    %23 = vector.broadcast %22 : vector<1x1024xi32> to vector<128x1024xi32>
    %24 = arith.cmpi eq, %21, %23 : vector<128x1024xi32>
    %25 = arith.extui %24 : vector<128x1024xi1> to vector<128x1024xi32>
    %26 = arith.sitofp %25 : vector<128x1024xi32> to vector<128x1024xf32>
    %27 = arith.truncf %26 : vector<128x1024xf32> to vector<128x1024xbf16>
    %c0_6 = arith.constant 0 : index
    %c0_7 = arith.constant 0 : index
    %28 = vector.load %arg10[%c0_6, %c0_7] : memref<128x128xf32, #tpu.memory_space<vmem>>, vector<128x128xf32>
    %c0_8 = arith.constant 0 : index
    %c0_9 = arith.constant 0 : index
    %29 = vector.load %arg4[%c0_8, %c0_9] : memref<1024x128xbf16, #tpu.memory_space<vmem>>, vector<1024x128xbf16>
    %cst = arith.constant dense<0.000000e+00> : vector<128x128xf32>
    %30 = tpu.matmul %27, %29, %cst {dimension_numbers = #tpu.dot_dimension_numbers<[1], [0], [0], [1], [0, 0, 1, 1], [], []>} : vector<128x1024xbf16>, vector<1024x128xbf16>, vector<128x128xf32> -> vector<128x128xf32>
    %31 = arith.addf %28, %30 : vector<128x128xf32>
    %c0_10 = arith.constant 0 : index
    %c0_11 = arith.constant 0 : index
    %32 = vector.load %arg10[%c0_10, %c0_11] : memref<128x128xf32, #tpu.memory_space<vmem>>, vector<128x128xf32>
    tpu.vector_store %arg10[%c0_10, %c0_11], %31 {strides = array<i32>} : memref<128x128xf32, #tpu.memory_space<vmem>>, vector<128x128xf32>,
    %33 = arith.extui %15 : i1 to i32
    %c0_i32_12 = arith.constant 0 : i32
    %34 = arith.cmpi ne, %33, %c0_i32_12 : i32
    scf.if %34 {
      %c0_13 = arith.constant 0 : index
      %c0_14 = arith.constant 0 : index
      %35 = vector.load %arg10[%c0_13, %c0_14] : memref<128x128xf32, #tpu.memory_space<vmem>>, vector<128x128xf32>
      %36 = arith.truncf %35 : vector<128x128xf32> to vector<128x128xbf16>
      %c0_15 = arith.constant 0 : index
      %c0_16 = arith.constant 0 : index
      %37 = vector.load %arg5[%c0_15, %c0_16] : memref<128x128xbf16, #tpu.memory_space<vmem>>, vector<128x128xbf16>
      %cst_17 = arith.constant dense<0.000000e+00> : vector<128x128xf32>
      %38 = tpu.matmul %36, %37, %cst_17 {dimension_numbers = #tpu.dot_dimension_numbers<[1], [0], [0], [1], [0, 0, 1, 1], [], []>} : vector<128x128xbf16>, vector<128x128xbf16>, vector<128x128xf32> -> vector<128x128xf32>
      %c0_18 = arith.constant 0 : index
      %c0_19 = arith.constant 0 : index
      %39 = vector.load %arg6[%c0_18, %c0_19] : memref<1x128xf32, #tpu.memory_space<vmem>>, vector<1x128xf32>
      %40 = vector.broadcast %39 : vector<1x128xf32> to vector<128x128xf32>
      %41 = arith.addf %38, %40 : vector<128x128xf32>
      %cst_20 = arith.constant 0.000000e+00 : f32
      %42 = vector.broadcast %cst_20 : f32 to vector<128x128xf32>
      %43 = arith.maximumf %41, %42 : vector<128x128xf32>
      %44 = arith.truncf %43 : vector<128x128xf32> to vector<128x128xbf16>
      %c0_21 = arith.constant 0 : index
      %c0_22 = arith.constant 0 : index
      %45 = vector.load %arg7[%c0_21, %c0_22] : memref<128x128xbf16, #tpu.memory_space<vmem>>, vector<128x128xbf16>
      %cst_23 = arith.constant dense<0.000000e+00> : vector<128x128xf32>
      %46 = tpu.matmul %44, %45, %cst_23 {dimension_numbers = #tpu.dot_dimension_numbers<[1], [0], [0], [1], [0, 0, 1, 1], [], []>} : vector<128x128xbf16>, vector<128x128xbf16>, vector<128x128xf32> -> vector<128x128xf32>
      %c0_24 = arith.constant 0 : index
      %c0_25 = arith.constant 0 : index
      %47 = vector.load %arg8[%c0_24, %c0_25] : memref<1x128xf32, #tpu.memory_space<vmem>>, vector<1x128xf32>
      %48 = vector.broadcast %47 : vector<1x128xf32> to vector<128x128xf32>
      %49 = arith.addf %46, %48 : vector<128x128xf32>
      %cst_26 = arith.constant 0.000000e+00 : f32
      %50 = vector.broadcast %cst_26 : f32 to vector<128x128xf32>
      %51 = arith.maximumf %49, %50 : vector<128x128xf32>
      %52 = arith.truncf %51 : vector<128x128xf32> to vector<128x128xbf16>
      %c0_27 = arith.constant 0 : index
      %c0_28 = arith.constant 0 : index
      %53 = vector.load %arg9[%c0_27, %c0_28] : memref<128x128xbf16, #tpu.memory_space<vmem>>, vector<128x128xbf16>
      tpu.vector_store %arg9[%c0_27, %c0_28], %52 {strides = array<i32>} : memref<128x128xbf16, #tpu.memory_space<vmem>>, vector<128x128xbf16>,
    } else {
    }
    return
  }
  func.func @transform_0(%arg0: i32, %arg1: memref<1xi32, #tpu.memory_space<smem>>, %arg2: memref<1xi32, #tpu.memory_space<smem>>) -> (i32, i32) {
    %0 = arith.index_cast %arg0 : i32 to index
    %1 = memref.load %arg2[%0] : memref<1xi32, #tpu.memory_space<smem>>
    %c0_i32 = arith.constant 0 : i32
    %c0_i32_0 = arith.constant 0 : i32
    return %c0_i32, %1 : i32, i32
  }
  func.func @transform_1(%arg0: i32, %arg1: memref<1xi32, #tpu.memory_space<smem>>, %arg2: memref<1xi32, #tpu.memory_space<smem>>) -> (i32, i32) {
    %0 = arith.index_cast %arg0 : i32 to index
    %1 = memref.load %arg2[%0] : memref<1xi32, #tpu.memory_space<smem>>
    %c0_i32 = arith.constant 0 : i32
    %c0_i32_0 = arith.constant 0 : i32
    return %1, %c0_i32 : i32, i32
  }
  func.func @transform_2(%arg0: i32, %arg1: memref<1xi32, #tpu.memory_space<smem>>, %arg2: memref<1xi32, #tpu.memory_space<smem>>) -> (i32, i32) {
    %c0_i32 = arith.constant 0 : i32
    %c0_i32_0 = arith.constant 0 : i32
    %c0_i32_1 = arith.constant 0 : i32
    return %c0_i32, %c0_i32_0 : i32, i32
  }
  func.func @transform_3(%arg0: i32, %arg1: memref<1xi32, #tpu.memory_space<smem>>, %arg2: memref<1xi32, #tpu.memory_space<smem>>) -> (i32, i32) {
    %c0_i32 = arith.constant 0 : i32
    %c0_i32_0 = arith.constant 0 : i32
    %c0_i32_1 = arith.constant 0 : i32
    return %c0_i32, %c0_i32_0 : i32, i32
  }
  func.func @transform_4(%arg0: i32, %arg1: memref<1xi32, #tpu.memory_space<smem>>, %arg2: memref<1xi32, #tpu.memory_space<smem>>) -> (i32, i32) {
    %c0_i32 = arith.constant 0 : i32
    %c0_i32_0 = arith.constant 0 : i32
    %c0_i32_1 = arith.constant 0 : i32
    return %c0_i32, %c0_i32_0 : i32, i32
  }
  func.func @transform_5(%arg0: i32, %arg1: memref<1xi32, #tpu.memory_space<smem>>, %arg2: memref<1xi32, #tpu.memory_space<smem>>) -> (i32, i32) {
    %c0_i32 = arith.constant 0 : i32
    %c0_i32_0 = arith.constant 0 : i32
    %c0_i32_1 = arith.constant 0 : i32
    return %c0_i32, %c0_i32_0 : i32, i32
  }
  func.func @transform_6(%arg0: i32, %arg1: memref<1xi32, #tpu.memory_space<smem>>, %arg2: memref<1xi32, #tpu.memory_space<smem>>) -> (i32, i32) {
    %0 = arith.index_cast %arg0 : i32 to index
    %1 = memref.load %arg1[%0] : memref<1xi32, #tpu.memory_space<smem>>
    %c0_i32 = arith.constant 0 : i32
    %c0_i32_0 = arith.constant 0 : i32
    return %1, %c0_i32 : i32, i32
  }
}

</mosaic_0001>

<bundles_post_ra>
// kernel: gnn_forward.5
= control target key start
LH: loop header
LB: loop body
LE: loop exit
PB: predicated region body
PF: predicated region fallthrough
CT: control target
= control target key end

     0   :  { %v561_v1 = vmov 0.0   ;;  %vm562_vm0 = vmmov 0   ;;  %v30_v11 = vlaneseq  ;;  %s723_s0 = inlined_call_operand.vmem [shape: s32[1,128], index: 0, kind: input, shape index: {}]   ;;  %s724_s1 = inlined_call_operand.vmem [shape: bf16[128,128], index: 1, kind: input, shape index: {}]   ;;  %s725_s2 = inlined_call_operand.vmem [shape: bf16[128,128], index: 2, kind: input, shape index: {}]   ;;  %s726_s3 = inlined_call_operand.vmem [shape: f32[1,128], index: 3, kind: input, shape index: {}]   ;;  %s727_s4 = inlined_call_operand.vmem [shape: bf16[128,128], index: 4, kind: input, shape index: {}]   ;;  %s728_s5 = inlined_call_operand.vmem [shape: f32[1,128], index: 5, kind: input, shape index: {}]   ;;  %s729_s6 = inlined_call_operand.hbm [shape: f32[8,128], index: 6, kind: output, shape index: {}]  }
   0x1   :  { %v513_v0 = vld [vmem:[%s724_s1] sm:$0xff]   ;;  %449 = vmatprep.subr.bf16.mxu0 %v561_v1  ;;  %469 = vmatprep.subr.bf16.mxu1 %v561_v1  ;;  %v514_v2 = vld [vmem:[%s724_s1 + $0x8] sm:$0xff]   ;;  %v515_v3 = vld [vmem:[%s724_s1 + $0x10] sm:$0xff]  }
   0x2   :  { %450 = vmatpush3.bf16.msra.mxu0 %v513_v0  ;;  %465 = vmatprep.mubr.msk.bf16.mxu0 %vm562_vm0, %v561_v1  ;;  %v521_v4 = vld [vmem:[%s725_s2] sm:$0xff]   ;;  %v516_v5 = vld [vmem:[%s724_s1 + $0x18] sm:$0xff]   ;;  %v522_v6 = vld [vmem:[%s725_s2 + $0x8] sm:$0xff]  }
   0x3   :  { %451 = vmatprep.subr.bf16.mxu0 %v561_v1  ;;  %485 = vmatprep.mubr.msk.bf16.mxu1 %vm562_vm0, %v561_v1  ;;  %v517_v7 = vld [vmem:[%s724_s1 + $0x20] sm:$0xff]   ;;  %v523_v8 = vld [vmem:[%s725_s2 + $0x10] sm:$0xff]   ;;  %v518_v9 = vld [vmem:[%s724_s1 + $0x28] sm:$0xff]  }
   0x4   :  { %470 = vmatpush3.bf16.msra.mxu1 %v521_v4  ;;  %v524_v10 = vld [vmem:[%s725_s2 + $0x18] sm:$0xff]   ;;  %v519_v12 = vld [vmem:[%s724_s1 + $0x30] sm:$0xff]  }
   0x5   :  { %471 = vmatprep.subr.bf16.mxu1 %v561_v1 }
   0x6   :  { %452 = vmatpush3.bf16.msra.mxu0 %v514_v2 }
   0x7   :  { %453 = vmatprep.subr.bf16.mxu0 %v561_v1 }
   0x8   :  { %472 = vmatpush3.bf16.msra.mxu1 %v522_v6 }
   0x9   :  { %473 = vmatprep.subr.bf16.mxu1 %v561_v1 }
   0xa   :  { %454 = vmatpush3.bf16.msra.mxu0 %v515_v3 }
   0xb   :  { %455 = vmatprep.subr.bf16.mxu0 %v561_v1 }
   0xc   :  { %474 = vmatpush3.bf16.msra.mxu1 %v523_v8 }
   0xd   :  { %475 = vmatprep.subr.bf16.mxu1 %v561_v1 }
   0xe   :  { %456 = vmatpush3.bf16.msra.mxu0 %v516_v5 }
   0xf   :  { %457 = vmatprep.subr.bf16.mxu0 %v561_v1 }
  0x12   :  { %458 = vmatpush3.bf16.msra.mxu0 %v517_v7 }
  0x13   :  { %459 = vmatprep.subr.bf16.mxu0 %v561_v1 }
  0x16   :  { %460 = vmatpush3.bf16.msra.mxu0 %v518_v9 }
  0x17   :  { %11 = vsyncpa [#allocation4], 0  ;;  %461 = vmatprep.subr.bf16.mxu0 %v561_v1  ;;  %v31_v13 = vshrl.u32 %v30_v11, 7  ;;  %476 = vmatpush3.bf16.msra.mxu1 %v524_v10  ;;  %v525_v14 = vld [vmem:[%s725_s2 + $0x20] sm:$0xff]   ;;  %v520_v16 = vld [vmem:[%s724_s1 + $0x38] sm:$0xff]   ;;  %s564_s24 = smov [#allocation3]  }
  0x18   :  { %v392_v15 = vld [vmem:[%s723_s0] ss:$0 sm:$0xff]  ;;  %477 = vmatprep.subr.bf16.mxu1 %v561_v1  ;;  %v526_v17 = vld [vmem:[%s725_s2 + $0x28] sm:$0xff]   ;;  %v527_v18 = vld [vmem:[%s725_s2 + $0x30] sm:$0xff]   ;;  %v563_v19 = vmov 1.0|1.0  }
  0x19   :  { %vm37_vm1 = vcmp.eq.s32.totalorder %v31_v13, %v392_v15  ;;  %v528_v20 = vld [vmem:[%s725_s2 + $0x38] sm:$0xff]   ;;  %v529_v21 = vld [vmem:[%s727_s4] sm:$0xff]   ;;  %v530_v22 = vld [vmem:[%s727_s4 + $0x8] sm:$0xff]   ;;  %s384_s25 = sshll.u32 %s564_s24, 4  ;;  %s385_s25 = int_to_ptr.vmem [resolvable:$true] %s384_s25 }
  0x1a   :  { %462 = vmatpush3.bf16.msra.mxu0 %v519_v12  ;;  %vm402_vm2 = vmpackc.low %vm37_vm1, %vm37_vm1  ;;  %v531_v23 = vld [vmem:[%s727_s4 + $0x10] sm:$0xff]   ;;  %v532_v24 = vld [vmem:[%s727_s4 + $0x18] sm:$0xff]   ;;  %p542_p1 = scmp.lt.s32.totalorder %s385_s25, %s385_s25 }
  0x1b   :  { %463 = vmatprep.subr.bf16.mxu0 %v561_v1  ;;  %478 = vmatpush3.bf16.msra.mxu1 %v525_v14  ;;  %v533_v25 = vld [vmem:[%s727_s4 + $0x20] sm:$0xff]   ;;  %v534_v26 = vld [vmem:[%s727_s4 + $0x28] sm:$0xff]   ;;  %v535_v32 = vld [vmem:[%s727_s4 + $0x30] sm:$0xff]  }
  0x1c   :  { %479 = vmatprep.subr.bf16.mxu1 %v561_v1  ;;  %v536_v33 = vld [vmem:[%s727_s4 + $0x38] sm:$0xff]   ;;  %v404_v34 = vld [vmem:[%s726_s3] ss:$0 sm:$0xff]  ;;  %s537_s3 = scalar_lea.vmem %s385_s25, 128 }
  0x1d   :  { %v413_v42 = vld [vmem:[%s728_s5] ss:$0 sm:$0xff]  ;;  %p538_p0 = scmp.ne.s32.totalorder %s385_s25, %s537_s3  ;;  %p543_p2 = scmp.lt.s32.totalorder %s537_s3, %s537_s3 }
  0x1e   :  { %464 = vmatpush3.bf16.msra.mxu0 %v520_v16 }
  0x1f   :  { %480 = vmatpush3.bf16.msra.mxu1 %v526_v17  ;;  %489 = vmatprep.subr.bf16.mxu0 %v561_v1  ;;  %p544_p3 = por %p543_p2, %p542_p1 }
  0x20   :  { %481 = vmatprep.subr.bf16.mxu1 %v561_v1 }
  0x21   :  { %466 = vmatmul.mubr.msk.bf16.vlgmr.msra.gmra.mrb[0].mxu0 %vm402_vm2, %v563_v19  ;;  %p545_p4 = pnand %p544_p3, %p538_p0 }
  0x22   :  { %505 = vmatprep.mubr.msk.bf16.mxu0 %vm562_vm0, %v561_v1  ;;  %490 = vmatpush3.bf16.msra.mxu0 %v529_v21 }
  0x23   :  { %482 = vmatpush3.bf16.msra.mxu1 %v527_v18  ;;  %491 = vmatprep.subr.bf16.mxu0 %v561_v1 }
  0x24   :  { %483 = vmatprep.subr.bf16.mxu1 %v561_v1 }
  0x26   :  { %492 = vmatpush3.bf16.msra.mxu0 %v530_v22 }
  0x27   :  { %484 = vmatpush3.bf16.msra.mxu1 %v528_v20  ;;  %493 = vmatprep.subr.bf16.mxu0 %v561_v1 }
  0x2a   :  { %494 = vmatpush3.bf16.msra.mxu0 %v531_v23 }
  0x2b   :  { %495 = vmatprep.subr.bf16.mxu0 %v561_v1 }
  0x2e   :  { %496 = vmatpush3.bf16.msra.mxu0 %v532_v24 }
  0x2f   :  { %497 = vmatprep.subr.bf16.mxu0 %v561_v1 }
  0x32   :  { %498 = vmatpush3.bf16.msra.mxu0 %v533_v25 }
  0x33   :  { %499 = vmatprep.subr.bf16.mxu0 %v561_v1 }
  0x36   :  { %500 = vmatpush3.bf16.msra.mxu0 %v534_v26 }
  0x37   :  { %501 = vmatprep.subr.bf16.mxu0 %v561_v1 }
  0x3a   :  { %502 = vmatpush3.bf16.msra.mxu0 %v535_v32 }
  0x3b   :  { %503 = vmatprep.subr.bf16.mxu0 %v561_v1 }
  0x3e   :  { %504 = vmatpush3.bf16.msra.mxu0 %v536_v33 }
  0xf4   :  { %v140_v27 = vpop.f32.mrb[0].mxu0 }
  0xf5   :  { %v152_v28 = vpack.c.bf16 %v140_v27, %v140_v27  ;;  %v467_v29 = vpop.f32.mrb[1].mxu0 }
  0xf6   :  { %v143_v30 = vpop.f32.mrb[2].mxu0 }
  0xf7   :  { %v468_v31 = vpop.f32.mrb[3].mxu0  ;;  %486 = vmatmul.mubr.bf16.vlgmr.msra.gmra.mrb[0].mxu1 %v152_v28 }
 0x1ca   :  { %v258_v35 = vpop.f32.mrb[0].mxu1 }
 0x1cb   :  { %v259_v36 = vadd.f32 %v404_v34, %v258_v35  ;;  %v487_v37 = vpop.f32.mrb[1].mxu1 }
 0x1cc   :  { %v261_v38 = vpop.f32.mrb[2].mxu1 }
 0x1cd   :  { %v264_v39 = vmax.f32 %v259_v36, 0.0  ;;  %v488_v40 = vpop.f32.mrb[3].mxu1 }
 0x1cf   :  { %v265_v41 = vpack.c.bf16 %v264_v39, %v264_v39 }
 0x1d1   :  { %506 = vmatmul.mubr.bf16.vlgmr.msra.gmra.mrb[4].mxu0 %v265_v41 }
 0x2a4   :  { %v371_v43 = vpop.f32.mrb[4].mxu0 }
 0x2a5   :  { %v372_v44 = vadd.f32 %v413_v42, %v371_v43  ;;  %v507_v45 = vpop.f32.mrb[5].mxu0 }
 0x2a6   :  { %v374_v46 = vpop.f32.mrb[6].mxu0 }
 0x2a7   :  { %377 = vst [vmem:[#allocation3] sm:$0xff] %v372_v44  ;;  %v508_v47 = vpop.f32.mrb[7].mxu0 }
 0x2a8   :  { %548 = shalt.err (!%p545_p4)
}
 0x2a9   :  { %s549_s5 = scalar_lea.hbm %s729_s6, 128 }
 0x2aa   :  { %p550_p5 = scmp.ne.s32.totalorder %s729_s6, %s549_s5  ;;  %p553_p6 = scmp.lt.u32.totalorder %s549_s5, %s729_s6 }
 0x2ac   :  { %p555_p7 = pnand %p553_p6, %p550_p5 }
 0x2ae   :  { %558 = shalt.err (!%p555_p7)
}
 0x2af   :  { %387 = dma.vmem_to_hbm [thread:$0]  %s385_s25, 128, %s729_s6, [#allocation4]  }
 0x2b0   :  { %559 = dma.done.wait [#allocation4], 128  }
 0x2b1   :  { %560 = vsyncadd [#allocation4], 4294967168 }
 0x2b2   :  { %391 = vsyncpa [#allocation4], 1 }

// kernel: gnn_forward.3
= control target key start
LH: loop header
LB: loop body
LE: loop exit
PB: predicated region body
PF: predicated region fallthrough
CT: control target
= control target key end

     0   :  { %v117_v14 = vlaneseq  ;;  %v2954_v61 = vmov 1.0|1.0   ;;  %s4140_s1 = inlined_call_operand.<no memory space> [shape: s32[1], index: 1, kind: input, shape index: {}]   ;;  %s4141_s3 = inlined_call_operand.vmem [shape: bf16[1024,128], index: 3, kind: input, shape index: {}]   ;;  %s4142_s0 = inlined_call_operand.<no memory space> [shape: s32[1], index: 0, kind: input, shape index: {}]   ;;  %s4143_s2 = inlined_call_operand.vmem [shape: s32[1,1024], index: 2, kind: input, shape index: {}]   ;;  %s4144_s4 = inlined_call_operand.vmem [shape: bf16[128,128], index: 4, kind: input, shape index: {}]   ;;  %s4145_s6 = inlined_call_operand.vmem [shape: bf16[128,128], index: 6, kind: input, shape index: {}]   ;;  %s4146_s5 = inlined_call_operand.vmem [shape: f32[1,128], index: 5, kind: input, shape index: {}]   ;;  %s4147_s7 = inlined_call_operand.vmem [shape: f32[1,128], index: 7, kind: input, shape index: {}]   ;;  %s4148_s8 = inlined_call_operand.vmem [shape: bf16[128,128], index: 8, kind: output, shape index: {}]  }
   0x1   :  { %s2099_s29 = sshll.u32 %s4140_s1, 7  ;;  %s2098_s13 = sshll.u32 %s4140_s1, 3 }
   0x2   :  { %p68_p0 = scmp.lt.s32.totalorder %s2099_s29, 127  ;;  %v3029_v19 = vshrl.u32 %v117_v14, 7  ;;  %p3033_p1 = scmp.lt.s32.totalorder %s2098_s13, 7 }
   0x3   :  { %s2103_s16 = sshll.u32 %s4142_s0, 7  ;;  %s2101_s27 = sshll.u32 %s4142_s0, 4 }
   0x4   :  { %s4317_s29 = smov (!%p68_p0, %s2099_s29), 127  ;;  %v119_v24 = vadd.s32 8, %v3029_v19  ;;  %v158_v26 = vsub.s32 1, %v3029_v19  ;;  %v166_v28 = vsub.s32 3, %v3029_v19  ;;  %s4319_s13 = smov (!%p3033_p1, %s2098_s13), 7  ;;  %v154_v31 = vsub.s32 0, %v3029_v19 }
   0x5   :  { %s2100_s30 = sshll.u32 %s4317_s29, 2  ;;  %v162_v33 = vsub.s32 2, %v3029_v19  ;;  %v120_v35 = vadd.s32 16, %v3029_v19  ;;  %v3057_v37 = vstv %s2103_s16  ;;  %v121_v38 = vadd.s32 24, %v3029_v19  ;;  %s63_s19 = scalar_lea.vmem %s4143_s2, %s4319_s13 }
   0x6   :  { %s3006_s11 = scalar_lea.vmem %s4141_s3, %s2100_s30  ;;  %v170_v40 = vsub.s32 4, %v3029_v19  ;;  %v178_v42 = vsub.s32 6, %v3029_v19  ;;  %v3070_v44 = vadd.s32 %v3057_v37, %v3029_v19  ;;  %v3073_v45 = vadd.s32 %v3057_v37, %v119_v24  ;;  %v3075_v46 = vld [vmem:[%s63_s19] sm:$0xff]  ;;  %p76_p2 = scmp.lt.s32.totalorder %s2101_s27, 15 }
   0x7   :  { %v2874_v0 = vld [vmem:[%s3006_s11 + $0x40] sm:$0xff]   ;;  %v2878_v4 = vld [vmem:[%s3006_s11 + $0x48] sm:$0xff]   ;;  %v2882_v8 = vld [vmem:[%s3006_s11 + $0x50] sm:$0xff]   ;;  %v3078_v47 = vadd.s32 %v3057_v37, %v120_v35  ;;  %v3081_v48 = vadd.s32 %v3057_v37, %v121_v38  ;;  %v122_v49 = vadd.s32 32, %v3029_v19  ;;  %v3085_v50 = vrot.slane %v3075_v46, %v158_v26 }
   0x8   :  { %v2875_v1 = vld [vmem:[%s3006_s11 + $0xc0] sm:$0xff]   ;;  %2521 = vmatprep.subr.bf16.mxu0 %v2874_v0  ;;  %v2879_v5 = vld [vmem:[%s3006_s11 + $0xc8] sm:$0xff]   ;;  %v2883_v9 = vld [vmem:[%s3006_s11 + $0xd0] sm:$0xff]   ;;  %v3088_v51 = vrot.slane %v3075_v46, %v166_v28  ;;  %v3091_v52 = vrot.slane %v3075_v46, %v154_v31  ;;  %v3094_v53 = vrot.slane %v3075_v46, %v162_v33  ;;  %v123_v56 = vadd.s32 40, %v3029_v19  ;;  %s4321_s27 = smov (!%p76_p2, %s2101_s27), 15 }
   0x9   :  { %v2876_v2 = vld [vmem:[%s3006_s11] sm:$0xff]   ;;  %2585 = vmatprep.subr.bf16.mxu1 %v2875_v1  ;;  %v2880_v6 = vld [vmem:[%s3006_s11 + $0x8] sm:$0xff]   ;;  %v2884_v10 = vld [vmem:[%s3006_s11 + $0x10] sm:$0xff]   ;;  %v3100_v57 = vrot.slane %v3075_v46, %v170_v40  ;;  %v3103_v58 = vrot.slane %v3075_v46, %v178_v42  ;;  %vm185_vm0 = vcmp.eq.s32.totalorder %v3070_v44, %v3085_v50  ;;  %vm193_vm1 = vcmp.eq.s32.totalorder %v3073_v45, %v3085_v50  ;;  %s2102_s30 = sshll.u32 %s4321_s27, 2 }
   0xa   :  { %v2877_v3 = vld [vmem:[%s3006_s11 + $0x80] sm:$0xff]   ;;  %2522 = vmatpush3.bf16.msra.mxu0 %v2876_v2  ;;  %v2881_v7 = vld [vmem:[%s3006_s11 + $0x88] sm:$0xff]   ;;  %v2885_v11 = vld [vmem:[%s3006_s11 + $0x90] sm:$0xff]   ;;  %vm187_vm2 = vcmp.eq.s32.totalorder %v3070_v44, %v3088_v51  ;;  %vm195_vm3 = vcmp.eq.s32.totalorder %v3073_v45, %v3088_v51  ;;  %vm184_vm5 = vcmp.eq.s32.totalorder %v3070_v44, %v3091_v52  ;;  %vm192_vm6 = vcmp.eq.s32.totalorder %v3073_v45, %v3091_v52  ;;  %s4130_s10 = scalar_lea.vmem %s4148_s8, %s2102_s30 }
   0xb   :  { %2586 = vmatpush3.bf16.msra.mxu1 %v2877_v3  ;;  %2523 = vmatprep.subr.bf16.mxu0 %v2878_v4  ;;  %v2886_v12 = vld [vmem:[%s3006_s11 + $0x58] sm:$0xff]   ;;  %v2890_v17 = vld [vmem:[%s3006_s11 + $0x60] sm:$0xff]   ;;  %v2894_v22 = vld [vmem:[%s3006_s11 + $0x68] sm:$0xff]   ;;  %vm186_vm7 = vcmp.eq.s32.totalorder %v3070_v44, %v3094_v53  ;;  %vm194_vm8 = vcmp.eq.s32.totalorder %v3073_v45, %v3094_v53  ;;  %vm201_vm10 = vcmp.eq.s32.totalorder %v3078_v47, %v3085_v50  ;;  %v124_v4 = vadd.s32 48, %v3029_v19 }
   0xc   :  { %2587 = vmatprep.subr.bf16.mxu1 %v2879_v5  ;;  %v2887_v13 = vld [vmem:[%s3006_s11 + $0xd8] sm:$0xff]   ;;  %v2891_v18 = vld [vmem:[%s3006_s11 + $0xe0] sm:$0xff]   ;;  %v2895_v23 = vld [vmem:[%s3006_s11 + $0xe8] sm:$0xff]   ;;  %vm209_vm11 = vcmp.eq.s32.totalorder %v3081_v48, %v3085_v50  ;;  %vm203_vm13 = vcmp.eq.s32.totalorder %v3078_v47, %v3088_v51  ;;  %vm211_vm14 = vcmp.eq.s32.totalorder %v3081_v48, %v3088_v51  ;;  %v3135_v63 = vadd.s32 %v3057_v37, %v122_v49 }
   0xd   :  { %v2888_v15 = vld [vmem:[%s3006_s11 + $0x18] sm:$0xff]   ;;  %v2892_v20 = vld [vmem:[%s3006_s11 + $0x20] sm:$0xff]   ;;  %v2896_v25 = vld [vmem:[%s3006_s11 + $0x28] sm:$0xff]   ;;  %v3138_v0 = vadd.s32 %v3057_v37, %v123_v56  ;;  %v125_v5 = vadd.s32 56, %v3029_v19  ;;  %v127_v14 = vadd.s32 72, %v3029_v19  ;;  %v133_v42 = vadd.s32 120, %v3029_v19 }
   0xe   :  { %2524 = vmatpush3.bf16.msra.mxu0 %v2880_v6  ;;  %v2889_v16 = vld [vmem:[%s3006_s11 + $0x98] sm:$0xff]   ;;  %v2893_v21 = vld [vmem:[%s3006_s11 + $0xa0] sm:$0xff]   ;;  %v2897_v27 = vld [vmem:[%s3006_s11 + $0xa8] sm:$0xff]   ;;  %v4250_v38 = vmov 0 }
   0xf   :  { %2588 = vmatpush3.bf16.msra.mxu1 %v2881_v7  ;;  %2525 = vmatprep.subr.bf16.mxu0 %v2882_v8  ;;  %v2898_v29 = vld [vmem:[%s3006_s11 + $0x70] sm:$0xff]   ;;  %v2902_v36 = vld [vmem:[%s3006_s11 + $0x78] sm:$0xff]   ;;  %v2906_v54 = vld [vmem:[%s3006_s11 + $0x140] sm:$0xff]  }
  0x10   :  { %2589 = vmatprep.subr.bf16.mxu1 %v2883_v9  ;;  %v2899_v30 = vld [vmem:[%s3006_s11 + $0xf0] sm:$0xff]   ;;  %v2903_v39 = vld [vmem:[%s3006_s11 + $0xf8] sm:$0xff]   ;;  %v2907_v55 = vld [vmem:[%s3006_s11 + $0x100] sm:$0xff]   ;;  %v3181_v9 = vadd.s32 %v3057_v37, %v124_v4  ;;  %v174_v4 = vsub.s32 5, %v3029_v19 }
  0x11   :  { %v2900_v32 = vld [vmem:[%s3006_s11 + $0x30] sm:$0xff]   ;;  %v2904_v41 = vld [vmem:[%s3006_s11 + $0x38] sm:$0xff]   ;;  %v2908_v59 = vld [vmem:[%s3006_s11 + $0x1c0] sm:$0xff]  }
  0x12   :  { %2526 = vmatpush3.bf16.msra.mxu0 %v2884_v10  ;;  %v2901_v34 = vld [vmem:[%s3006_s11 + $0xb0] sm:$0xff]   ;;  %v2905_v43 = vld [vmem:[%s3006_s11 + $0xb8] sm:$0xff]   ;;  %vm2296_vm4 = vmpackc.low %vm193_vm1, %vm185_vm0  ;;  %vm200_vm1 = vcmp.eq.s32.totalorder %v3078_v47, %v3091_v52  ;;  %v3184_v10 = vadd.s32 %v3057_v37, %v125_v5 }
  0x13   :  { %2590 = vmatpush3.bf16.msra.mxu1 %v2885_v11  ;;  %2527 = vmatprep.subr.bf16.mxu0 %v2886_v12  ;;  %v2909_v60 = vld [vmem:[%s3006_s11 + $0x180] sm:$0xff]   ;;  %vm2328_vm9 = vmpackc.low %vm195_vm3, %vm187_vm2  ;;  %v2910_v62 = vld [vmem:[%s3006_s11 + $0x148] sm:$0xff]   ;;  %vm208_vm2 = vcmp.eq.s32.totalorder %v3081_v48, %v3091_v52 }
  0x14   :  { %2591 = vmatprep.subr.bf16.mxu1 %v2887_v13  ;;  %2297 = vmatprep.mubr.msk.bf16.mxu0 %vm2296_vm4, %v2954_v61  ;;  %vm2298_vm12 = vmpackc.low %vm192_vm6, %vm184_vm5  ;;  %v2911_v1 = vld [vmem:[%s3006_s11 + $0x108] sm:$0xff]   ;;  %vm202_vm4 = vcmp.eq.s32.totalorder %v3078_v47, %v3094_v53  ;;  %vm210_vm5 = vcmp.eq.s32.totalorder %v3081_v48, %v3094_v53  ;;  %vm217_vm6 = vcmp.eq.s32.totalorder %v3135_v63, %v3085_v50  ;;  %v2914_v6 = vld [vmem:[%s3006_s11 + $0x150] sm:$0xff]   ;;  %v126_v13 = vadd.s32 64, %v3029_v19 }
  0x15   :  { %2329 = vmatprep.mubr.msk.bf16.mxu1 %vm2328_vm9, %v2954_v61  ;;  %vm2330_vm15 = vmpackc.low %vm194_vm8, %vm186_vm7  ;;  %v2912_v2 = vld [vmem:[%s3006_s11 + $0x1c8] sm:$0xff]   ;;  %vm225_vm7 = vcmp.eq.s32.totalorder %v3138_v0, %v3085_v50  ;;  %vm219_vm9 = vcmp.eq.s32.totalorder %v3135_v63, %v3088_v51  ;;  %v2915_v7 = vld [vmem:[%s3006_s11 + $0x110] sm:$0xff]  }
  0x16   :  { %2528 = vmatpush3.bf16.msra.mxu0 %v2888_v15  ;;  %vm2300_vm0 = vmpackc.low %vm209_vm11, %vm201_vm10  ;;  %v2913_v3 = vld [vmem:[%s3006_s11 + $0x188] sm:$0xff]   ;;  %vm227_vm10 = vcmp.eq.s32.totalorder %v3138_v0, %v3088_v51  ;;  %v2916_v8 = vld [vmem:[%s3006_s11 + $0x1d0] sm:$0xff]   ;;  %v128_v15 = vadd.s32 80, %v3029_v19  ;;  %v3228_v24 = vadd.s32 %v3057_v37, %v126_v13  ;;  %v182_v13 = vsub.s32 7, %v3029_v19 }
  0x17   :  { %2592 = vmatpush3.bf16.msra.mxu1 %v2889_v16  ;;  %2529 = vmatprep.subr.bf16.mxu0 %v2890_v17  ;;  %vm2332_vm3 = vmpackc.low %vm211_vm14, %vm203_vm13  ;;  %vm216_vm14 = vcmp.eq.s32.totalorder %v3135_v63, %v3091_v52  ;;  %v2917_v11 = vld [vmem:[%s3006_s11 + $0x190] sm:$0xff]   ;;  %v2918_v12 = vld [vmem:[%s3006_s11 + $0x158] sm:$0xff]   ;;  %v3539_v16 = vrot.slane %v3075_v46, %v174_v4 }
  0x18   :  { %2593 = vmatprep.subr.bf16.mxu1 %v2891_v18  ;;  %vm2302_vm8 = vmpackc.low %vm208_vm2, %vm200_vm1  ;;  %vm226_vm1 = vcmp.eq.s32.totalorder %v3138_v0, %v3094_v53  ;;  %v2919_v18 = vld [vmem:[%s3006_s11 + $0x118] sm:$0xff]   ;;  %v3234_v26 = vadd.s32 %v3057_v37, %v128_v15  ;;  %v2922_v28 = vld [vmem:[%s3006_s11 + $0x160] sm:$0xff]  }
  0x19   :  { %vm2334_vm11 = vmpackc.low %vm210_vm5, %vm202_vm4  ;;  %vm241_vm4 = vcmp.eq.s32.totalorder %v3184_v10, %v3085_v50  ;;  %v2923_v31 = vld [vmem:[%s3006_s11 + $0x120] sm:$0xff]   ;;  %v2927_v49 = vld [vmem:[%s3006_s11 + $0x128] sm:$0xff]  }
  0x1a   :  { %2530 = vmatpush3.bf16.msra.mxu0 %v2892_v20  ;;  %vm2336_vm13 = vmpackc.low %vm227_vm10, %vm219_vm9  ;;  %v129_v20 = vadd.s32 88, %v3029_v19  ;;  %v2924_v33 = vld [vmem:[%s3006_s11 + $0x1e0] sm:$0xff]   ;;  %v2928_v56 = vld [vmem:[%s3006_s11 + $0x1e8] sm:$0xff]  }
  0x1b   :  { %2594 = vmatpush3.bf16.msra.mxu1 %v2893_v21  ;;  %2531 = vmatprep.subr.bf16.mxu0 %v2894_v22  ;;  %v2920_v21 = vld [vmem:[%s3006_s11 + $0x1d8] sm:$0xff]   ;;  %v2925_v35 = vld [vmem:[%s3006_s11 + $0x1a0] sm:$0xff]   ;;  %v2932_v5 = vld [vmem:[%s3006_s11 + $0x1f0] sm:$0xff]   ;;  %v4192_v22 = vmov 0 }
  0x1c   :  { %2595 = vmatprep.subr.bf16.mxu1 %v2895_v23  ;;  %v2921_v23 = vld [vmem:[%s3006_s11 + $0x198] sm:$0xff]  }
  0x1d   :  { %v2936_v15 = vld [vmem:[%s3006_s11 + $0x1f8] sm:$0xff]  }
  0x1e   :  { %2532 = vmatpush3.bf16.msra.mxu0 %v2896_v25  ;;  %v3231_v25 = vadd.s32 %v3057_v37, %v127_v14  ;;  %v2937_v17 = vld [vmem:[%s3006_s11 + $0x1b8] sm:$0xff]  }
  0x1f   :  { %2596 = vmatpush3.bf16.msra.mxu1 %v2897_v27  ;;  %2533 = vmatprep.subr.bf16.mxu0 %v2898_v29  ;;  %v3257_v29 = vadd.s32 %v3057_v37, %v129_v20  ;;  %v3562_v20 = vrot.slane %v3075_v46, %v182_v13  ;;  %v4184_v46 = vmov 0  ;;  %v4198_v27 = vmov 0 }
  0x20   :  { %2597 = vmatprep.subr.bf16.mxu1 %v2899_v30  ;;  %v130_v30 = vadd.s32 96, %v3029_v19 }
  0x22   :  { %2534 = vmatpush3.bf16.msra.mxu0 %v2900_v32  ;;  %v131_v32 = vadd.s32 104, %v3029_v19  ;;  %v3324_v40 = vadd.s32 %v3057_v37, %v130_v30  ;;  %v4205_v30 = vmov 0 }
  0x23   :  { %2598 = vmatpush3.bf16.msra.mxu1 %v2901_v34  ;;  %2535 = vmatprep.subr.bf16.mxu0 %v2902_v36  ;;  %v132_v34 = vadd.s32 112, %v3029_v19  ;;  %v2935_v19 = vld [vmem:[%s3006_s11 + $0x138] sm:$0xff]   ;;  %v4248_v36 = vmov 0 }
  0x24   :  { %2599 = vmatprep.subr.bf16.mxu1 %v2903_v39  ;;  %v2926_v39 = vld [vmem:[%s3006_s11 + $0x168] sm:$0xff]  }
  0x26   :  { %2536 = vmatpush3.bf16.msra.mxu0 %v2904_v41  ;;  %v3327_v41 = vadd.s32 %v3057_v37, %v131_v32 }
  0x27   :  { %2600 = vmatpush3.bf16.msra.mxu1 %v2905_v43  ;;  %2649 = vmatprep.subr.bf16.mxu0 %v2906_v54  ;;  %v3344_v54 = vadd.s32 %v3057_v37, %v132_v34  ;;  %v4233_v34 = vmov 0  ;;  %v4272_v43 = vmov 0 }
  0x28   :  { %2713 = vmatprep.subr.bf16.mxu1 %v2908_v59  ;;  %v2929_v59 = vld [vmem:[%s3006_s11 + $0x1a8] sm:$0xff]  }
  0x29   :  { %2299 = vmatmul.mubr.msk.bf16.vlgmr.msra.gmra.mrb[0].mxu0 %vm2298_vm12, %v2954_v61  ;;  %vm2304_vm12 = vmpackc.low %vm225_vm7, %vm217_vm6  ;;  %vm235_vm6 = vcmp.eq.s32.totalorder %v3181_v9, %v3088_v51  ;;  %vm243_vm7 = vcmp.eq.s32.totalorder %v3184_v10, %v3088_v51 }
  0x2a   :  { %2331 = vmatmul.mubr.msk.bf16.vlgmr.msra.gmra.mrb[0].mxu1 %vm2330_vm15, %v2954_v61  ;;  %2650 = vmatpush3.bf16.msra.mxu0 %v2907_v55  ;;  %vm224_vm15 = vcmp.eq.s32.totalorder %v3138_v0, %v3091_v52  ;;  %vm3236_vm9 = vmpackc.low %vm243_vm7, %vm235_vm6  ;;  %vm249_vm6 = vcmp.eq.s32.totalorder %v3228_v24, %v3085_v50  ;;  %vm257_vm7 = vcmp.eq.s32.totalorder %v3231_v25, %v3085_v50 }
  0x2b   :  { %2714 = vmatpush3.bf16.msra.mxu1 %v2909_v60  ;;  %2301 = vmatprep.mubr.msk.bf16.mxu0 %vm2300_vm0, %v2954_v61  ;;  %vm218_vm0 = vcmp.eq.s32.totalorder %v3135_v63, %v3094_v53  ;;  %vm3203_vm2 = vmpackc.low %vm224_vm15, %vm216_vm14  ;;  %vm232_vm14 = vcmp.eq.s32.totalorder %v3181_v9, %v3091_v52  ;;  %vm240_vm15 = vcmp.eq.s32.totalorder %v3184_v10, %v3091_v52 }
  0x2c   :  { %2333 = vmatprep.mubr.msk.bf16.mxu1 %vm2332_vm3, %v2954_v61  ;;  %2651 = vmatprep.subr.bf16.mxu0 %v2910_v62  ;;  %vm233_vm3 = vcmp.eq.s32.totalorder %v3181_v9, %v3085_v50  ;;  %vm3211_vm5 = vmpackc.low %vm226_vm1, %vm218_vm0  ;;  %vm234_vm0 = vcmp.eq.s32.totalorder %v3181_v9, %v3094_v53  ;;  %vm250_vm1 = vcmp.eq.s32.totalorder %v3228_v24, %v3094_v53  ;;  %v2944_v62 = vld [vmem:[%s4144_s4 + $0x30] sm:$0xff]  }
  0x2d   :  { %2715 = vmatprep.subr.bf16.mxu1 %v2912_v2  ;;  %v3394_v60 = vadd.s32 %v3057_v37, %v133_v42  ;;  %v4270_v42 = vmov 0 }
  0x2e   :  { %2652 = vmatpush3.bf16.msra.mxu0 %v2911_v1  ;;  %v2930_v1 = vld [vmem:[%s3006_s11 + $0x170] sm:$0xff]  }
  0x2f   :  { %2716 = vmatpush3.bf16.msra.mxu1 %v2913_v3  ;;  %2653 = vmatprep.subr.bf16.mxu0 %v2914_v6  ;;  %v2931_v3 = vld [vmem:[%s3006_s11 + $0x130] sm:$0xff]  }
  0x30   :  { %2717 = vmatprep.subr.bf16.mxu1 %v2916_v8 }
  0x31   :  { %2303 = vmatmul.mubr.msk.bf16.gmra.mrb[4].mxu0 %vm2302_vm8, %v2954_v61  ;;  %vm3222_vm8 = vmpackc.low %vm241_vm4, %vm233_vm3  ;;  %vm242_vm3 = vcmp.eq.s32.totalorder %v3184_v10, %v3094_v53  ;;  %vm259_vm4 = vcmp.eq.s32.totalorder %v3231_v25, %v3088_v51 }
  0x32   :  { %2335 = vmatmul.mubr.msk.bf16.gmra.mrb[4].mxu1 %vm2334_vm11, %v2954_v61  ;;  %2305 = vmatprep.mubr.msk.bf16.mxu0 %vm2304_vm12, %v2954_v61  ;;  %vm307_vm12 = vcmp.eq.s32.totalorder %v3394_v60, %v3088_v51  ;;  %vm213_vm11 = vcmp.eq.s32.totalorder %v3081_v48, %v3539_v16 }
  0x33   :  { %2337 = vmatprep.mubr.msk.bf16.mxu1 %vm2336_vm13, %v2954_v61  ;;  %2654 = vmatpush3.bf16.msra.mxu0 %v2915_v7  ;;  %v2933_v7 = vld [vmem:[%s3006_s11 + $0x1b0] sm:$0xff]  }
  0x34   :  { %2718 = vmatpush3.bf16.msra.mxu1 %v2917_v11  ;;  %2655 = vmatprep.subr.bf16.mxu0 %v2918_v12  ;;  %v2934_v12 = vld [vmem:[%s3006_s11 + $0x178] sm:$0xff]  }
  0x35   :  { %2719 = vmatprep.subr.bf16.mxu1 %v2920_v21  ;;  %v4190_v21 = vmov 0 }
  0x37   :  { %2656 = vmatpush3.bf16.msra.mxu0 %v2919_v18  ;;  %v4180_v18 = vmov 0 }
  0x38   :  { %2720 = vmatpush3.bf16.msra.mxu1 %v2921_v23  ;;  %2657 = vmatprep.subr.bf16.mxu0 %v2922_v28  ;;  %v4196_v23 = vmov 0  ;;  %v4200_v28 = vmov 0 }
  0x39   :  { %2307 = vmatmul.mubr.msk.bf16.gmra.mrb[8].mxu0 %vm3203_vm2, %v2954_v61  ;;  %2721 = vmatprep.subr.bf16.mxu1 %v2924_v33  ;;  %vm275_vm2 = vcmp.eq.s32.totalorder %v3257_v29, %v3088_v51  ;;  %v4230_v33 = vmov 0 }
  0x3a   :  { %2339 = vmatmul.mubr.msk.bf16.gmra.mrb[8].mxu1 %vm3211_vm5, %v2954_v61  ;;  %2309 = vmatprep.mubr.msk.bf16.mxu0 %vm3222_vm8, %v2954_v61  ;;  %vm251_vm8 = vcmp.eq.s32.totalorder %v3228_v24, %v3088_v51  ;;  %vm3300_vm5 = vmpackc.low %vm240_vm15, %vm232_vm14  ;;  %vm256_vm15 = vcmp.eq.s32.totalorder %v3231_v25, %v3091_v52 }
  0x3b   :  { %2341 = vmatprep.mubr.msk.bf16.mxu1 %vm3236_vm9, %v2954_v61  ;;  %2658 = vmatpush3.bf16.msra.mxu0 %v2923_v31  ;;  %vm3318_vm14 = vmpackc.low %vm242_vm3, %vm234_vm0  ;;  %vm289_vm3 = vcmp.eq.s32.totalorder %v3327_v41, %v3085_v50  ;;  %v4224_v31 = vmov 0 }
  0x3c   :  { %2722 = vmatpush3.bf16.msra.mxu1 %v2925_v35  ;;  %vm3338_vm0 = vmpackc.low %vm257_vm7, %vm249_vm6  ;;  %vm248_vm7 = vcmp.eq.s32.totalorder %v3228_v24, %v3091_v52  ;;  %2659 = vmatprep.subr.bf16.mxu0 %v2926_v39 }
  0x3d   :  { %vm3358_vm6 = vmpackc.low %vm259_vm4, %vm251_vm8  ;;  %vm258_vm4 = vcmp.eq.s32.totalorder %v3231_v25, %v3094_v53  ;;  %vm273_vm8 = vcmp.eq.s32.totalorder %v3257_v29, %v3085_v50  ;;  %2723 = vmatprep.subr.bf16.mxu1 %v2928_v56 }
  0x3f   :  { %2660 = vmatpush3.bf16.msra.mxu0 %v2927_v49  ;;  %v4274_v49 = vmov 0 }
  0x40   :  { %2724 = vmatpush3.bf16.msra.mxu1 %v2929_v59  ;;  %2661 = vmatprep.subr.bf16.mxu0 %v2930_v1  ;;  %v2942_v59 = vld [vmem:[%s4144_s4 + $0x20] sm:$0xff]   ;;  %v2945_v1 = vld [vmem:[%s4144_s4 + $0x38] sm:$0xff]  }
  0x41   :  { %2311 = vmatmul.mubr.msk.bf16.gmra.mrb[12].mxu0 %vm3300_vm5, %v2954_v61  ;;  %vm265_vm5 = vcmp.eq.s32.totalorder %v3234_v26, %v3085_v50  ;;  %2725 = vmatprep.subr.bf16.mxu1 %v2932_v5 }
  0x42   :  { %2343 = vmatmul.mubr.msk.bf16.gmra.mrb[12].mxu1 %vm3318_vm14, %v2954_v61  ;;  %2313 = vmatprep.mubr.msk.bf16.mxu0 %vm3338_vm0, %v2954_v61  ;;  %vm3405_vm14 = vmpackc.low %vm256_vm15, %vm248_vm7  ;;  %vm267_vm7 = vcmp.eq.s32.totalorder %v3234_v26, %v3088_v51  ;;  %vm281_vm0 = vcmp.eq.s32.totalorder %v3324_v40, %v3085_v50 }
  0x43   :  { %2345 = vmatprep.mubr.msk.bf16.mxu1 %vm3358_vm6, %v2954_v61  ;;  %vm3422_vm15 = vmpackc.low %vm258_vm4, %vm250_vm1  ;;  %vm264_vm6 = vcmp.eq.s32.totalorder %v3234_v26, %v3091_v52  ;;  %vm272_vm4 = vcmp.eq.s32.totalorder %v3257_v29, %v3091_v52  ;;  %2662 = vmatpush3.bf16.msra.mxu0 %v2931_v3 }
  0x44   :  { %vm3440_vm1 = vmpackc.low %vm273_vm8, %vm265_vm5  ;;  %vm266_vm8 = vcmp.eq.s32.totalorder %v3234_v26, %v3094_v53  ;;  %vm274_vm5 = vcmp.eq.s32.totalorder %v3257_v29, %v3094_v53  ;;  %2726 = vmatpush3.bf16.msra.mxu1 %v2933_v7  ;;  %2663 = vmatprep.subr.bf16.mxu0 %v2934_v12 }
  0x45   :  { %vm3467_vm9 = vmpackc.low %vm275_vm2, %vm267_vm7  ;;  %vm299_vm7 = vcmp.eq.s32.totalorder %v3344_v54, %v3088_v51  ;;  %2727 = vmatprep.subr.bf16.mxu1 %v2936_v15  ;;  %v2946_v15 = vld [vmem:[%s4145_s6] sm:$0xff]  }
  0x46   :  { %vm3486_vm2 = vmpackc.low %vm272_vm4, %vm264_vm6  ;;  %vm283_vm4 = vcmp.eq.s32.totalorder %v3324_v40, %v3088_v51 }
  0x47   :  { %vm3503_vm6 = vmpackc.low %vm274_vm5, %vm266_vm8  ;;  %vm290_vm8 = vcmp.eq.s32.totalorder %v3327_v41, %v3094_v53  ;;  %vm305_vm5 = vcmp.eq.s32.totalorder %v3394_v60, %v3085_v50  ;;  %2664 = vmatpush3.bf16.msra.mxu0 %v2935_v19 }
  0x48   :  { %2728 = vmatpush3.bf16.msra.mxu1 %v2937_v17 }
  0x49   :  { %2315 = vmatmul.mubr.msk.bf16.gmra.mrb[16].mxu0 %vm3405_vm14, %v2954_v61  ;;  %vm3521_vm14 = vmpackc.low %vm289_vm3, %vm281_vm0  ;;  %vm288_vm3 = vcmp.eq.s32.totalorder %v3327_v41, %v3091_v52  ;;  %vm282_vm0 = vcmp.eq.s32.totalorder %v3324_v40, %v3094_v53  ;;  %2841 = vmatprep.subr.bf16.mxu1 %v2946_v15 }
  0x4a   :  { %2347 = vmatmul.mubr.msk.bf16.gmra.mrb[16].mxu1 %vm3422_vm15, %v2954_v61  ;;  %2317 = vmatprep.mubr.msk.bf16.mxu0 %vm3440_vm1, %v2954_v61  ;;  %vm291_vm15 = vcmp.eq.s32.totalorder %v3327_v41, %v3088_v51  ;;  %vm280_vm1 = vcmp.eq.s32.totalorder %v3324_v40, %v3091_v52  ;;  %vm3581_vm10 = vmpackc.low %vm290_vm8, %vm282_vm0  ;;  %v4186_v51 = vmov 0  ;;  %vm207_vm0 = vcmp.eq.s32.totalorder %v3078_v47, %v3562_v20 }
  0x4b   :  { %2349 = vmatprep.mubr.msk.bf16.mxu1 %vm3467_vm9, %v2954_v61  ;;  %vm297_vm9 = vcmp.eq.s32.totalorder %v3344_v54, %v3085_v50  ;;  %vm3553_vm13 = vmpackc.low %vm291_vm15, %vm283_vm4  ;;  %v4182_v50 = vmov 0  ;;  %vm205_vm15 = vcmp.eq.s32.totalorder %v3078_v47, %v3539_v16  ;;  %v4185_v46 = vsel %vm3581_vm10, 4294967295, %v4184_v46 }
  0x4c   :  { %v4181_v18 = vsel %vm3553_vm13, 4294967295, %v4180_v18  ;;  %vm3570_vm4 = vmpackc.low %vm288_vm3, %vm280_vm1  ;;  %vm4188_vm1 = vcmp.eq.s32.totalorder %v3070_v44, %v3100_v57  ;;  %vm4189_vm3 = vcmp.eq.s32.totalorder %v3073_v45, %v3100_v57  ;;  %vm215_vm8 = vcmp.eq.s32.totalorder %v3081_v48, %v3562_v20 }
  0x4d   :  { %v4183_v50 = vsel %vm3570_vm4, 4294967295, %v4182_v50  ;;  %vm3585_vm13 = vmpackc.low %vm305_vm5, %vm297_vm9  ;;  %vm4194_vm5 = vcmp.eq.s32.totalorder %v3070_v44, %v3103_v58 }
  0x4e   :  { %v4187_v51 = vsel %vm3585_vm13, 4294967295, %v4186_v51  ;;  %vm3595_vm4 = vmpackc.low %vm4189_vm3, %vm4188_vm1  ;;  %vm4195_vm13 = vcmp.eq.s32.totalorder %v3073_v45, %v3103_v58 }
  0x4f   :  { %v4191_v21 = vsel %vm3595_vm4, 4294967295, %v4190_v21  ;;  %vm3603_vm9 = vmpackc.low %vm307_vm12, %vm299_vm7  ;;  %vm296_vm7 = vcmp.eq.s32.totalorder %v3344_v54, %v3091_v52  ;;  %vm199_vm4 = vcmp.eq.s32.totalorder %v3073_v45, %v3562_v20 }
  0x50   :  { %v4193_v22 = vsel %vm3603_vm9, 4294967295, %v4192_v22  ;;  %vm3613_vm1 = vmpackc.low %vm4195_vm13, %vm4194_vm5  ;;  %vm231_vm5 = vcmp.eq.s32.totalorder %v3138_v0, %v3562_v20  ;;  %vm306_vm13 = vcmp.eq.s32.totalorder %v3394_v60, %v3094_v53  ;;  %vm4211_vm9 = vcmp.eq.s32.totalorder %v3135_v63, %v3539_v16 }
  0x51   :  { %v4197_v23 = vsel %vm3613_vm1, 4294967295, %v4196_v23  ;;  %2319 = vmatmul.mubr.msk.bf16.gmra.mrb[20].mxu0 %vm3486_vm2, %v2954_v61  ;;  %vm3620_vm3 = vmpackc.low %vm213_vm11, %vm205_vm15  ;;  %vm229_vm11 = vcmp.eq.s32.totalorder %v3138_v0, %v3539_v16  ;;  %vm4202_vm2 = vnez %v4181_v18  ;;  %vm4204_vm15 = vcmp.eq.s32.totalorder %v3081_v48, %v3100_v57 }
  0x52   :  { %v4199_v27 = vsel %vm3620_vm3, 4294967295, %v4198_v27  ;;  %2351 = vmatmul.mubr.msk.bf16.gmra.mrb[20].mxu1 %vm3503_vm6, %v2954_v61  ;;  %2321 = vmatprep.mubr.msk.bf16.mxu0 %vm3521_vm14, %v2954_v61  ;;  %vm3630_vm12 = vmpackc.low %vm215_vm8, %vm207_vm0  ;;  %vm304_vm6 = vcmp.eq.s32.totalorder %v3394_v60, %v3091_v52  ;;  %vm4203_vm14 = vcmp.eq.s32.totalorder %v3078_v47, %v3100_v57  ;;  %vm223_vm8 = vcmp.eq.s32.totalorder %v3135_v63, %v3562_v20 }
  0x53   :  { %v4201_v28 = vsel %vm3630_vm12, 4294967295, %v4200_v28  ;;  %2353 = vmatprep.mubr.msk.bf16.mxu1 %vm4202_vm2, %v2954_v61  ;;  %vm3651_vm0 = vmpackc.low %vm4204_vm15, %vm4203_vm14  ;;  %vm298_vm2 = vcmp.eq.s32.totalorder %v3344_v54, %v3094_v53  ;;  %vm189_vm12 = vcmp.eq.s32.totalorder %v3070_v44, %v3539_v16  ;;  %vm197_vm14 = vcmp.eq.s32.totalorder %v3073_v45, %v3539_v16 }
  0x54   :  { %v4206_v30 = vsel %vm3651_vm0, 4294967295, %v4205_v30  ;;  %vm4207_vm15 = vcmp.eq.s32.totalorder %v3078_v47, %v3103_v58  ;;  %vm4208_vm0 = vcmp.eq.s32.totalorder %v3081_v48, %v3103_v58  ;;  %v4209_v52 = vmov 0  ;;  %vm3684_vm10 = vmpackc.low %vm229_vm11, %vm4211_vm9  ;;  %v2949_v48 = vld [vmem:[%s4145_s6 + $0x18] sm:$0xff]  }
  0x55   :  { %vm3673_vm3 = vmpackc.low %vm4208_vm0, %vm4207_vm15  ;;  %vm191_vm1 = vcmp.eq.s32.totalorder %v3070_v44, %v3562_v20  ;;  %v4212_v53 = vmov 0  ;;  %vm245_vm9 = vcmp.eq.s32.totalorder %v3184_v10, %v3539_v16 }
  0x56   :  { %v4210_v52 = vsel %vm3673_vm3, 4294967295, %v4209_v52  ;;  %v4213_v53 = vsel %vm3684_vm10, 4294967295, %v4212_v53  ;;  %vm3688_vm0 = vmpackc.low %vm304_vm6, %vm296_vm7  ;;  %vm237_vm3 = vcmp.eq.s32.totalorder %v3181_v9, %v3539_v16  ;;  %vm4222_vm7 = vcmp.eq.s32.totalorder %v3135_v63, %v3100_v57 }
  0x57   :  { %vm3692_vm15 = vmpackc.low %vm231_vm5, %vm223_vm8  ;;  %vm4223_vm6 = vcmp.eq.s32.totalorder %v3138_v0, %v3100_v57  ;;  %vm247_vm5 = vcmp.eq.s32.totalorder %v3184_v10, %v3562_v20 }
  0x58   :  { %vm3700_vm11 = vmpackc.low %vm306_vm13, %vm298_vm2  ;;  %vm239_vm13 = vcmp.eq.s32.totalorder %v3181_v9, %v3562_v20  ;;  %vm4228_vm2 = vcmp.eq.s32.totalorder %v3135_v63, %v3103_v58  ;;  %v4237_v63 = vmov 0 }
  0x59   :  { %vm3704_vm10 = vmpackc.low %vm197_vm14, %vm189_vm12  ;;  %vm4229_vm14 = vcmp.eq.s32.totalorder %v3138_v0, %v3103_v58  ;;  %v4242_v0 = vmov 0 }
  0x5a   :  { %vm3714_vm8 = vmpackc.low %vm4223_vm6, %vm4222_vm7  ;;  %vm4232_vm6 = vnez %v4183_v50 }
  0x5b   :  { %v4225_v31 = vsel %vm3714_vm8, 4294967295, %v4224_v31  ;;  %vm3722_vm12 = vmpackc.low %vm199_vm4, %vm191_vm1  ;;  %2323 = vmatmul.mubr.msk.bf16.gmra.mrb[24].mxu0 %vm4232_vm6, %v2954_v61  ;;  %vm4235_vm4 = vnez %v4185_v46  ;;  %vm4236_vm1 = vnez %v4187_v51  ;;  %vm4240_vm6 = vcmp.eq.s32.totalorder %v3181_v9, %v3100_v57 }
  0x5c   :  { %vm3732_vm7 = vmpackc.low %vm4229_vm14, %vm4228_vm2  ;;  %2355 = vmatmul.mubr.msk.bf16.gmra.mrb[24].mxu1 %vm4235_vm4, %v2954_v61  ;;  %2325 = vmatprep.mubr.msk.bf16.mxu0 %vm4236_vm1, %v2954_v61  ;;  %vm253_vm14 = vcmp.eq.s32.totalorder %v3228_v24, %v3539_v16  ;;  %vm4241_vm4 = vcmp.eq.s32.totalorder %v3184_v10, %v3100_v57  ;;  %vm263_vm1 = vcmp.eq.s32.totalorder %v3231_v25, %v3562_v20 }
  0x5d   :  { %v4231_v33 = vsel %vm3732_vm7, 4294967295, %v4230_v33  ;;  %vm3739_vm8 = vmpackc.low %vm245_vm9, %vm237_vm3  ;;  %vm261_vm3 = vcmp.eq.s32.totalorder %v3231_v25, %v3539_v16  ;;  %vm4239_vm9 = vnez %v4193_v22  ;;  %vm277_vm7 = vcmp.eq.s32.totalorder %v3257_v29, %v3539_v16 }
  0x5e   :  { %v4234_v34 = vsel %vm3739_vm8, 4294967295, %v4233_v34  ;;  %vm3749_vm2 = vmpackc.low %vm247_vm5, %vm239_vm13  ;;  %2357 = vmatprep.mubr.msk.bf16.mxu1 %vm4239_vm9, %v2954_v61  ;;  %vm255_vm5 = vcmp.eq.s32.totalorder %v3228_v24, %v3562_v20  ;;  %vm4245_vm9 = vcmp.eq.s32.totalorder %v3184_v10, %v3103_v58 }
  0x5f   :  { %v4238_v63 = vsel %vm3749_vm2, 4294967295, %v4237_v63  ;;  %vm3766_vm13 = vmpackc.low %vm4241_vm4, %vm4240_vm6  ;;  %vm4244_vm2 = vcmp.eq.s32.totalorder %v3181_v9, %v3103_v58 }
  0x60   :  { %v4243_v0 = vsel %vm3766_vm13, 4294967295, %v4242_v0  ;;  %vm3780_vm8 = vmpackc.low %vm4245_vm9, %vm4244_vm2  ;;  %vm269_vm13 = vcmp.eq.s32.totalorder %v3234_v26, %v3539_v16  ;;  %vm4252_vm2 = vcmp.eq.s32.totalorder %v3228_v24, %v3100_v57  ;;  %vm4253_vm9 = vcmp.eq.s32.totalorder %v3231_v25, %v3100_v57 }
  0x61   :  { %vm3784_vm6 = vmpackc.low %vm261_vm3, %vm253_vm14  ;;  %vm271_vm3 = vcmp.eq.s32.totalorder %v3234_v26, %v3562_v20 }
  0x62   :  { %v4249_v36 = vsel %vm3784_vm6, 4294967295, %v4248_v36  ;;  %vm3788_vm4 = vmpackc.low %vm263_vm1, %vm255_vm5  ;;  %vm279_vm5 = vcmp.eq.s32.totalorder %v3257_v29, %v3562_v20  ;;  %vm4256_vm1 = vcmp.eq.s32.totalorder %v3228_v24, %v3103_v58  ;;  %v4262_v24 = vmov 0 }
  0x63   :  { %v4251_v38 = vsel %vm3788_vm4, 4294967295, %v4250_v38  ;;  %vm3802_vm14 = vmpackc.low %vm4253_vm9, %vm4252_vm2  ;;  %vm4257_vm4 = vcmp.eq.s32.totalorder %v3231_v25, %v3103_v58  ;;  %2327 = vmatmul.mubr.msk.bf16.gmra.mrb[28].mxu0 %vm3688_vm0, %v2954_v61  ;;  %vm285_vm9 = vcmp.eq.s32.totalorder %v3324_v40, %v3539_v16  ;;  %vm293_vm0 = vcmp.eq.s32.totalorder %v3327_v41, %v3539_v16 }
  0x64   :  { %vm3816_vm6 = vmpackc.low %vm4257_vm4, %vm4256_vm1  ;;  %2359 = vmatmul.mubr.msk.bf16.gmra.mrb[28].mxu1 %vm3700_vm11, %v2954_v61  ;;  %2361 = vmatprep.mubr.msk.bf16.mxu0 %vm3704_vm10, %v2954_v61  ;;  %vm4264_vm11 = vcmp.eq.s32.totalorder %v3234_v26, %v3100_v57  ;;  %vm4265_vm10 = vcmp.eq.s32.totalorder %v3257_v29, %v3100_v57  ;;  %v4266_v25 = vmov 0 }
  0x65   :  { %vm3823_vm2 = vmpackc.low %vm277_vm7, %vm269_vm13  ;;  %2393 = vmatprep.mubr.msk.bf16.mxu1 %vm3722_vm12, %v2954_v61  ;;  %vm287_vm13 = vcmp.eq.s32.totalorder %v3324_v40, %v3562_v20  ;;  %vm4269_vm12 = vcmp.eq.s32.totalorder %v3257_v29, %v3103_v58 }
  0x66   :  { %vm3833_vm4 = vmpackc.low %vm279_vm5, %vm271_vm3  ;;  %vm295_vm3 = vcmp.eq.s32.totalorder %v3327_v41, %v3562_v20  ;;  %vm4268_vm5 = vcmp.eq.s32.totalorder %v3234_v26, %v3103_v58  ;;  %v4278_v26 = vmov 0 }
  0x67   :  { %v4263_v24 = vsel %vm3833_vm4, 4294967295, %v4262_v24  ;;  %vm3850_vm7 = vmpackc.low %vm4265_vm10, %vm4264_vm11  ;;  %vm309_vm4 = vcmp.eq.s32.totalorder %v3394_v60, %v3539_v16 }
  0x68   :  { %v4267_v25 = vsel %vm3850_vm7, 4294967295, %v4266_v25  ;;  %vm3864_vm1 = vmpackc.low %vm4269_vm12, %vm4268_vm5  ;;  %vm301_vm7 = vcmp.eq.s32.totalorder %v3344_v54, %v3539_v16  ;;  %vm4276_vm5 = vcmp.eq.s32.totalorder %v3324_v40, %v3100_v57  ;;  %vm4277_vm12 = vcmp.eq.s32.totalorder %v3327_v41, %v3100_v57  ;;  %v2947_v16 = vld [vmem:[%s4145_s6 + $0x8] sm:$0xff]  }
  0x69   :  { %v4271_v42 = vsel %vm3864_vm1, 4294967295, %v4270_v42  ;;  %vm3868_vm11 = vmpackc.low %vm293_vm0, %vm285_vm9  ;;  %vm303_vm0 = vcmp.eq.s32.totalorder %v3344_v54, %v3562_v20  ;;  %vm4288_vm1 = vnez %v4199_v27 }
  0x6a   :  { %v4273_v43 = vsel %vm3868_vm11, 4294967295, %v4272_v43  ;;  %vm3872_vm10 = vmpackc.low %vm295_vm3, %vm287_vm13  ;;  %vm311_vm13 = vcmp.eq.s32.totalorder %v3394_v60, %v3562_v20  ;;  %vm4280_vm3 = vcmp.eq.s32.totalorder %v3324_v40, %v3103_v58  ;;  %v2948_v20 = vld [vmem:[%s4145_s6 + $0x10] sm:$0xff]  }
  0x6b   :  { %v4275_v49 = vsel %vm3872_vm10, 4294967295, %v4274_v49  ;;  %vm3886_vm9 = vmpackc.low %vm4277_vm12, %vm4276_vm5  ;;  %vm4281_vm10 = vcmp.eq.s32.totalorder %v3327_v41, %v3103_v58  ;;  %vm4284_vm5 = vnez %v4191_v21 }
  0x6c   :  { %v4279_v26 = vsel %vm3886_vm9, 4294967295, %v4278_v26  ;;  %vm3900_vm11 = vmpackc.low %vm4281_vm10, %vm4280_vm3  ;;  %2363 = vmatmul.mubr.msk.bf16.vlgmr.msra.gmra.mrb[32].mxu0 %vm4284_vm5, %v2954_v61  ;;  %vm4287_vm9 = vnez %v4197_v23  ;;  %vm4291_vm3 = vnez %v4201_v28 }
  0x6d   :  { %vm3907_vm12 = vmpackc.low %vm309_vm4, %vm301_vm7  ;;  %2395 = vmatmul.mubr.msk.bf16.vlgmr.msra.gmra.mrb[32].mxu1 %vm4287_vm9, %v2954_v61  ;;  %2365 = vmatprep.mubr.msk.bf16.mxu0 %vm4288_vm1, %v2954_v61  ;;  %vm4292_vm4 = vcmp.eq.s32.totalorder %v3344_v54, %v3100_v57  ;;  %vm4293_vm7 = vcmp.eq.s32.totalorder %v3394_v60, %v3100_v57  ;;  %vm4296_vm1 = vcmp.eq.s32.totalorder %v3344_v54, %v3103_v58  ;;  %v2938_v57 = vld [vmem:[%s4144_s4] sm:$0xff]   ;;  %v2940_v54 = vld [vmem:[%s4144_s4 + $0x10] sm:$0xff]  }
  0x6e   :  { %vm3917_vm10 = vmpackc.low %vm311_vm13, %vm303_vm0  ;;  %2397 = vmatprep.mubr.msk.bf16.mxu1 %vm4291_vm3, %v2954_v61  ;;  %vm4297_vm9 = vcmp.eq.s32.totalorder %v3394_v60, %v3103_v58  ;;  %vm4300_vm13 = vnez %v4206_v30  ;;  %vm4301_vm3 = vnez %v4210_v52  ;;  %2809 = vmatprep.subr.bf16.mxu0 %v2938_v57  ;;  %v2939_v58 = vld [vmem:[%s4144_s4 + $0x8] sm:$0xff]  }
  0x6f   :  { %vm3930_vm5 = vmpackc.low %vm4293_vm7, %vm4292_vm4  ;;  %vm4302_vm4 = vnez %v4213_v53  ;;  %vm4303_vm7 = vnez %v4225_v31  ;;  %2810 = vmatpush3.bf16.msra.mxu0 %v2938_v57  ;;  %v2943_v60 = vld [vmem:[%s4144_s4 + $0x28] sm:$0xff]   ;;  %2842 = vmatpush3.bf16.msra.mxu1 %v2946_v15 }
  0x70   :  { %vm3940_vm0 = vmpackc.low %vm4297_vm9, %vm4296_vm1  ;;  %vm4304_vm1 = vnez %v4231_v33  ;;  %vm4305_vm9 = vnez %v4234_v34  ;;  %2811 = vmatprep.subr.bf16.mxu0 %v2939_v58  ;;  %2843 = vmatprep.subr.bf16.mxu1 %v2947_v16  ;;  %v2950_v33 = vld [vmem:[%s4145_s6 + $0x20] sm:$0xff]  }
  0x73   :  { %2812 = vmatpush3.bf16.msra.mxu0 %v2939_v58  ;;  %2844 = vmatpush3.bf16.msra.mxu1 %v2947_v16 }
  0x74   :  { %2367 = vmatmul.mubr.msk.bf16.gmra.mrb[36].mxu0 %vm4300_vm13, %v2954_v61  ;;  %vm4306_vm13 = vnez %v4238_v63  ;;  %2813 = vmatprep.subr.bf16.mxu0 %v2940_v54 }
  0x75   :  { %2399 = vmatmul.mubr.msk.bf16.gmra.mrb[36].mxu1 %vm4301_vm3, %v2954_v61  ;;  %2369 = vmatprep.mubr.msk.bf16.mxu0 %vm4302_vm4, %v2954_v61  ;;  %vm4307_vm3 = vnez %v4243_v0  ;;  %vm4309_vm4 = vnez %v4251_v38 }
  0x76   :  { %2401 = vmatprep.mubr.msk.bf16.mxu1 %vm3692_vm15, %v2954_v61  ;;  %vm4308_vm15 = vnez %v4249_v36  ;;  %2845 = vmatprep.subr.bf16.mxu1 %v2948_v20 }
  0x77   :  { %2814 = vmatpush3.bf16.msra.mxu0 %v2940_v54  ;;  %2846 = vmatpush3.bf16.msra.mxu1 %v2948_v20 }
  0x78   :  { %2847 = vmatprep.subr.bf16.mxu1 %v2949_v48 }
  0x7b   :  { %2848 = vmatpush3.bf16.msra.mxu1 %v2949_v48 }
  0x7c   :  { %2371 = vmatmul.mubr.msk.bf16.gmra.mrb[40].mxu0 %vm4303_vm7, %v2954_v61  ;;  %vm4311_vm7 = vnez %v4267_v25  ;;  %2849 = vmatprep.subr.bf16.mxu1 %v2950_v33  ;;  %v2951_v25 = vld [vmem:[%s4145_s6 + $0x28] sm:$0xff]  }
  0x7d   :  { %2403 = vmatmul.mubr.msk.bf16.gmra.mrb[40].mxu1 %vm4304_vm1, %v2954_v61  ;;  %2373 = vmatprep.mubr.msk.bf16.mxu0 %vm4305_vm9, %v2954_v61  ;;  %vm4312_vm1 = vnez %v4271_v42 }
  0x7e   :  { %2405 = vmatprep.mubr.msk.bf16.mxu1 %vm4306_vm13, %v2954_v61 }
  0x7f   :  { %2850 = vmatpush3.bf16.msra.mxu1 %v2950_v33 }
  0x80   :  { %2851 = vmatprep.subr.bf16.mxu1 %v2951_v25 }
  0x83   :  { %2852 = vmatpush3.bf16.msra.mxu1 %v2951_v25 }
  0x84   :  { %2375 = vmatmul.mubr.msk.bf16.gmra.mrb[44].mxu0 %vm4307_vm3, %v2954_v61 }
  0x85   :  { %2407 = vmatmul.mubr.msk.bf16.gmra.mrb[44].mxu1 %vm3780_vm8, %v2954_v61  ;;  %2377 = vmatprep.mubr.msk.bf16.mxu0 %vm4308_vm15, %v2954_v61  ;;  %vm4310_vm8 = vnez %v4263_v24 }
  0x86   :  { %2409 = vmatprep.mubr.msk.bf16.mxu1 %vm4309_vm4, %v2954_v61 }
  0x8c   :  { %2379 = vmatmul.mubr.msk.bf16.gmra.mrb[48].mxu0 %vm3802_vm14, %v2954_v61  ;;  %vm4313_vm14 = vnez %v4273_v43 }
  0x8d   :  { %2411 = vmatmul.mubr.msk.bf16.gmra.mrb[48].mxu1 %vm3816_vm6, %v2954_v61  ;;  %2381 = vmatprep.mubr.msk.bf16.mxu0 %vm3823_vm2, %v2954_v61  ;;  %vm4314_vm6 = vnez %v4275_v49  ;;  %vm4315_vm2 = vnez %v4279_v26 }
  0x8e   :  { %2413 = vmatprep.mubr.msk.bf16.mxu1 %vm4310_vm8, %v2954_v61 }
  0x94   :  { %2383 = vmatmul.mubr.msk.bf16.gmra.mrb[52].mxu0 %vm4311_vm7, %v2954_v61 }
  0x95   :  { %2415 = vmatmul.mubr.msk.bf16.gmra.mrb[52].mxu1 %vm4312_vm1, %v2954_v61  ;;  %2385 = vmatprep.mubr.msk.bf16.mxu0 %vm4313_vm14, %v2954_v61 }
  0x96   :  { %2417 = vmatprep.mubr.msk.bf16.mxu1 %vm4314_vm6, %v2954_v61 }
  0x9c   :  { %2387 = vmatmul.mubr.msk.bf16.gmra.mrb[56].mxu0 %vm4315_vm2, %v2954_v61 }
  0x9d   :  { %2419 = vmatmul.mubr.msk.bf16.gmra.mrb[56].mxu1 %vm3900_vm11, %v2954_v61  ;;  %2389 = vmatprep.mubr.msk.bf16.mxu0 %vm3907_vm12, %v2954_v61 }
  0x9e   :  { %2421 = vmatprep.mubr.msk.bf16.mxu1 %vm3917_vm10, %v2954_v61 }
  0xa4   :  { %2391 = vmatmul.mubr.msk.bf16.gmra.mrb[60].mxu0 %vm3930_vm5, %v2954_v61 }
  0xa5   :  { %2423 = vmatmul.mubr.msk.bf16.gmra.mrb[60].mxu1 %vm3940_vm0, %v2954_v61  ;;  %v2941_v61 = vld [vmem:[%s4144_s4 + $0x18] sm:$0xff]  }
  0xa6   :  { %2815 = vmatprep.subr.bf16.mxu0 %v2941_v61 }
  0xa7   :  { %2816 = vmatpush3.bf16.msra.mxu0 %v2941_v61 }
  0xa8   :  { %2817 = vmatprep.subr.bf16.mxu0 %v2942_v59 }
  0xab   :  { %2818 = vmatpush3.bf16.msra.mxu0 %v2942_v59 }
  0xac   :  { %2819 = vmatprep.subr.bf16.mxu0 %v2943_v60 }
  0xaf   :  { %2820 = vmatpush3.bf16.msra.mxu0 %v2943_v60 }
  0xb0   :  { %2821 = vmatprep.subr.bf16.mxu0 %v2944_v62 }
  0xb3   :  { %2822 = vmatpush3.bf16.msra.mxu0 %v2944_v62 }
  0xb4   :  { %2823 = vmatprep.subr.bf16.mxu0 %v2945_v1 }
  0xb7   :  { %2824 = vmatpush3.bf16.msra.mxu0 %v2945_v1 }
  0xfc   :  { %v2537_v37 = vpop.f32.mrb[0].mxu0 }
  0xfd   :  { %v2601_v2 = vpop.f32.mrb[0].mxu1  ;;  %v2538_v3 = vpop.f32.mrb[1].mxu0 }
  0xfe   :  { %v2539_v4 = vadd.f32 %v2538_v3, %v2537_v37  ;;  %v2602_v5 = vpop.f32.mrb[1].mxu1  ;;  %v2540_v6 = vpop.f32.mrb[2].mxu0 }
  0xff   :  { %v2603_v7 = vadd.f32 %v2602_v5, %v2601_v2  ;;  %v2604_v8 = vpop.f32.mrb[2].mxu1  ;;  %v2541_v11 = vpop.f32.mrb[3].mxu0 }
 0x100   :  { %v2542_v12 = vadd.f32 %v2541_v11, %v2540_v6  ;;  %v2605_v13 = vpop.f32.mrb[3].mxu1 }
 0x101   :  { %v4046_v14 = vadd.f32 %v2603_v7, %v2539_v4  ;;  %v2606_v19 = vadd.f32 %v2605_v13, %v2604_v8 }
 0x103   :  { %v4054_v17 = vadd.f32 %v2606_v19, %v2542_v12 }
 0x104   :  { %v2543_v18 = vpop.f32.mrb[4].mxu0 }
 0x105   :  { %v2607_v50 = vpop.f32.mrb[4].mxu1  ;;  %v2544_v46 = vpop.f32.mrb[5].mxu0 }
 0x106   :  { %v2545_v51 = vadd.f32 %v2544_v46, %v2543_v18  ;;  %v2608_v21 = vpop.f32.mrb[5].mxu1  ;;  %v2546_v22 = vpop.f32.mrb[6].mxu0 }
 0x107   :  { %v2609_v23 = vadd.f32 %v2608_v21, %v2607_v50  ;;  %v2610_v27 = vpop.f32.mrb[6].mxu1  ;;  %v2547_v28 = vpop.f32.mrb[7].mxu0 }
 0x108   :  { %v2548_v30 = vadd.f32 %v2547_v28, %v2546_v22  ;;  %v2611_v52 = vpop.f32.mrb[7].mxu1 }
 0x109   :  { %v4059_v53 = vadd.f32 %v2609_v23, %v2545_v51  ;;  %v2612_v47 = vadd.f32 %v2611_v52, %v2610_v27 }
 0x10b   :  { %v4064_v44 = vadd.f32 %v2612_v47, %v2548_v30 }
 0x10c   :  { %v2549_v45 = vpop.f32.mrb[8].mxu0 }
 0x10d   :  { %v2613_v31 = vpop.f32.mrb[8].mxu1  ;;  %v2550_v32 = vpop.f32.mrb[9].mxu0 }
 0x10e   :  { %v2551_v34 = vadd.f32 %v2550_v32, %v2549_v45  ;;  %v2614_v63 = vpop.f32.mrb[9].mxu1  ;;  %v2552_v0 = vpop.f32.mrb[10].mxu0 }
 0x10f   :  { %v2615_v35 = vadd.f32 %v2614_v63, %v2613_v31  ;;  %v2616_v36 = vpop.f32.mrb[10].mxu1  ;;  %v2553_v38 = vpop.f32.mrb[11].mxu0 }
 0x110   :  { %v2554_v9 = vadd.f32 %v2553_v38, %v2552_v0  ;;  %v2617_v10 = vpop.f32.mrb[11].mxu1 }
 0x111   :  { %v4069_v39 = vadd.f32 %v2615_v35, %v2551_v34  ;;  %v2618_v24 = vadd.f32 %v2617_v10, %v2616_v36 }
 0x113   :  { %v4074_v42 = vadd.f32 %v2618_v24, %v2554_v9 }
 0x114   :  { %v2555_v43 = vpop.f32.mrb[12].mxu0 }
 0x115   :  { %v2619_v49 = vpop.f32.mrb[12].mxu1  ;;  %v2556_v26 = vpop.f32.mrb[13].mxu0 }
 0x116   :  { %v2557_v29 = vadd.f32 %v2556_v26, %v2555_v43  ;;  %v2620_v55 = vpop.f32.mrb[13].mxu1  ;;  %v2558_v40 = vpop.f32.mrb[14].mxu0 }
 0x117   :  { %v2621_v41 = vadd.f32 %v2620_v55, %v2619_v49  ;;  %v2622_v56 = vpop.f32.mrb[14].mxu1  ;;  %v2559_v57 = vpop.f32.mrb[15].mxu0 }
 0x118   :  { %v2560_v58 = vadd.f32 %v2559_v57, %v2558_v40  ;;  %v2623_v54 = vpop.f32.mrb[15].mxu1 }
 0x119   :  { %v4076_v61 = vadd.f32 %v2621_v41, %v2557_v29  ;;  %v2624_v59 = vadd.f32 %v2623_v54, %v2622_v56 }
 0x11b   :  { %v4078_v60 = vadd.f32 %v2624_v59, %v2560_v58 }
 0x11c   :  { %v2561_v62 = vpop.f32.mrb[16].mxu0 }
 0x11d   :  { %v2625_v1 = vpop.f32.mrb[16].mxu1  ;;  %v2562_v37 = vpop.f32.mrb[17].mxu0 }
 0x11e   :  { %v2563_v2 = vadd.f32 %v2562_v37, %v2561_v62  ;;  %v2626_v3 = vpop.f32.mrb[17].mxu1  ;;  %v2564_v4 = vpop.f32.mrb[18].mxu0 }
 0x11f   :  { %v2627_v5 = vadd.f32 %v2626_v3, %v2625_v1  ;;  %v2628_v6 = vpop.f32.mrb[18].mxu1  ;;  %v2565_v7 = vpop.f32.mrb[19].mxu0 }
 0x120   :  { %v2566_v8 = vadd.f32 %v2565_v7, %v2564_v4  ;;  %v2629_v11 = vpop.f32.mrb[19].mxu1 }
 0x121   :  { %v4080_v12 = vadd.f32 %v2627_v5, %v2563_v2  ;;  %v2630_v13 = vadd.f32 %v2629_v11, %v2628_v6 }
 0x123   :  { %v4082_v19 = vadd.f32 %v2630_v13, %v2566_v8 }
 0x124   :  { %v2567_v15 = vpop.f32.mrb[20].mxu0 }
 0x125   :  { %v2631_v16 = vpop.f32.mrb[20].mxu1  ;;  %v2568_v18 = vpop.f32.mrb[21].mxu0 }
 0x126   :  { %v2569_v20 = vadd.f32 %v2568_v18, %v2567_v15  ;;  %v2632_v50 = vpop.f32.mrb[21].mxu1  ;;  %v2570_v46 = vpop.f32.mrb[22].mxu0 }
 0x127   :  { %v2633_v51 = vadd.f32 %v2632_v50, %v2631_v16  ;;  %v2634_v21 = vpop.f32.mrb[22].mxu1  ;;  %v2571_v22 = vpop.f32.mrb[23].mxu0 }
 0x128   :  { %v2572_v23 = vadd.f32 %v2571_v22, %v2570_v46  ;;  %v2635_v27 = vpop.f32.mrb[23].mxu1 }
 0x129   :  { %v4084_v28 = vadd.f32 %v2633_v51, %v2569_v20  ;;  %v2636_v30 = vadd.f32 %v2635_v27, %v2634_v21 }
 0x12b   :  { %v4086_v52 = vadd.f32 %v2636_v30, %v2572_v23 }
 0x12e   :  { %v2573_v47 = vpop.f32.mrb[24].mxu0 }
 0x12f   :  { %v2637_v48 = vpop.f32.mrb[24].mxu1  ;;  %v2574_v45 = vpop.f32.mrb[25].mxu0 }
 0x130   :  { %v2575_v31 = vadd.f32 %v2574_v45, %v2573_v47  ;;  %v2638_v32 = vpop.f32.mrb[25].mxu1  ;;  %v2576_v33 = vpop.f32.mrb[26].mxu0 }
 0x131   :  { %v2639_v34 = vadd.f32 %v2638_v32, %v2637_v48  ;;  %v2640_v63 = vpop.f32.mrb[26].mxu1  ;;  %v2577_v0 = vpop.f32.mrb[27].mxu0 }
 0x132   :  { %v2578_v35 = vadd.f32 %v2577_v0, %v2576_v33  ;;  %v2641_v36 = vpop.f32.mrb[27].mxu1 }
 0x133   :  { %v4088_v38 = vadd.f32 %v2639_v34, %v2575_v31  ;;  %v2642_v9 = vadd.f32 %v2641_v36, %v2640_v63 }
 0x135   :  { %v4090_v10 = vadd.f32 %v2642_v9, %v2578_v35 }
 0x136   :  { %v2579_v24 = vpop.f32.mrb[28].mxu0 }
 0x137   :  { %v2643_v25 = vpop.f32.mrb[28].mxu1  ;;  %v2580_v43 = vpop.f32.mrb[29].mxu0 }
 0x138   :  { %v2581_v49 = vadd.f32 %v2580_v43, %v2579_v24  ;;  %v2644_v26 = vpop.f32.mrb[29].mxu1  ;;  %v2582_v29 = vpop.f32.mrb[30].mxu0 }
 0x139   :  { %v2645_v55 = vadd.f32 %v2644_v26, %v2643_v25  ;;  %v2646_v40 = vpop.f32.mrb[30].mxu1  ;;  %v2583_v41 = vpop.f32.mrb[31].mxu0 }
 0x13a   :  { %v2584_v56 = vadd.f32 %v2583_v41, %v2582_v29  ;;  %v2647_v57 = vpop.f32.mrb[31].mxu1 }
 0x13b   :  { %v4092_v58 = vadd.f32 %v2645_v55, %v2581_v49  ;;  %v2648_v54 = vadd.f32 %v2647_v57, %v2646_v40 }
 0x13d   :  { %v4094_v59 = vadd.f32 %v2648_v54, %v2584_v56 }
 0x13f   :  { %v2665_v62 = vpop.f32.mrb[32].mxu0 }
 0x140   :  { %v2729_v1 = vpop.f32.mrb[32].mxu1  ;;  %v2666_v37 = vpop.f32.mrb[33].mxu0 }
 0x141   :  { %v2667_v2 = vadd.f32 %v2666_v37, %v2665_v62  ;;  %v2730_v3 = vpop.f32.mrb[33].mxu1  ;;  %v2668_v4 = vpop.f32.mrb[34].mxu0 }
 0x142   :  { %v2731_v5 = vadd.f32 %v2730_v3, %v2729_v1  ;;  %v2732_v6 = vpop.f32.mrb[34].mxu1  ;;  %v2669_v7 = vpop.f32.mrb[35].mxu0 }
 0x143   :  { %v1389_v8 = vadd.f32 %v2667_v2, %v4046_v14  ;;  %v2670_v11 = vadd.f32 %v2669_v7, %v2668_v4  ;;  %v2733_v13 = vpop.f32.mrb[35].mxu1 }
 0x144   :  { %v2734_v15 = vadd.f32 %v2733_v13, %v2732_v6 }
 0x145   :  { %v1486_v16 = vadd.f32 %v2731_v5, %v1389_v8  ;;  %v1392_v18 = vadd.f32 %v2670_v11, %v4054_v17 }
 0x147   :  { %v1489_v20 = vadd.f32 %v2734_v15, %v1392_v18  ;;  %v2671_v50 = vpop.f32.mrb[36].mxu0 }
 0x148   :  { %v2735_v46 = vpop.f32.mrb[36].mxu1  ;;  %v2672_v51 = vpop.f32.mrb[37].mxu0 }
 0x149   :  { %v2673_v21 = vadd.f32 %v2672_v51, %v2671_v50  ;;  %v2736_v22 = vpop.f32.mrb[37].mxu1  ;;  %v2674_v23 = vpop.f32.mrb[38].mxu0  ;;  %v1599_v27 = vpack.c.bf16 %v1489_v20, %v1486_v16 }
 0x14a   :  { %v2737_v30 = vadd.f32 %v2736_v22, %v2735_v46  ;;  %v2738_v47 = vpop.f32.mrb[38].mxu1  ;;  %v2675_v48 = vpop.f32.mrb[39].mxu0 }
 0x14b   :  { %v1397_v45 = vadd.f32 %v2673_v21, %v4059_v53  ;;  %v2676_v14 = vadd.f32 %v2675_v48, %v2674_v23  ;;  %v2739_v31 = vpop.f32.mrb[39].mxu1  ;;  %2825 = vmatprep.mubr.bf16.mxu0 %v1599_v27 }
 0x14c   :  { %v2740_v32 = vadd.f32 %v2739_v31, %v2738_v47 }
 0x14d   :  { %v1494_v33 = vadd.f32 %v2737_v30, %v1397_v45  ;;  %v1400_v17 = vadd.f32 %v2676_v14, %v4064_v44 }
 0x14f   :  { %v1497_v34 = vadd.f32 %v2740_v32, %v1400_v17  ;;  %v2677_v63 = vpop.f32.mrb[40].mxu0 }
 0x150   :  { %v2741_v0 = vpop.f32.mrb[40].mxu1  ;;  %v2678_v35 = vpop.f32.mrb[41].mxu0 }
 0x151   :  { %v1600_v36 = vpack.c.bf16 %v1497_v34, %v1494_v33  ;;  %v2679_v9 = vadd.f32 %v2678_v35, %v2677_v63  ;;  %v2742_v24 = vpop.f32.mrb[41].mxu1  ;;  %v2680_v25 = vpop.f32.mrb[42].mxu0 }
 0x152   :  { %v2743_v43 = vadd.f32 %v2742_v24, %v2741_v0  ;;  %v2744_v49 = vpop.f32.mrb[42].mxu1  ;;  %v2681_v26 = vpop.f32.mrb[43].mxu0 }
 0x153   :  { %v1405_v53 = vadd.f32 %v2679_v9, %v4069_v39  ;;  %v2682_v29 = vadd.f32 %v2681_v26, %v2680_v25  ;;  %v2745_v55 = vpop.f32.mrb[43].mxu1  ;;  %2826 = vmatmul.mubr.bf16.vlgmr.msra.gmra.mrb[64].mxu0 %v1600_v36 }
 0x154   :  { %v2746_v40 = vadd.f32 %v2745_v55, %v2744_v49 }
 0x155   :  { %v1502_v41 = vadd.f32 %v2743_v43, %v1405_v53  ;;  %v1408_v44 = vadd.f32 %v2682_v29, %v4074_v42 }
 0x157   :  { %v1505_v56 = vadd.f32 %v2746_v40, %v1408_v44  ;;  %v2683_v57 = vpop.f32.mrb[44].mxu0 }
 0x158   :  { %v2747_v54 = vpop.f32.mrb[44].mxu1  ;;  %v2684_v62 = vpop.f32.mrb[45].mxu0 }
 0x159   :  { %v2685_v1 = vadd.f32 %v2684_v62, %v2683_v57  ;;  %v2748_v37 = vpop.f32.mrb[45].mxu1  ;;  %v2686_v2 = vpop.f32.mrb[46].mxu0  ;;  %v1601_v3 = vpack.c.bf16 %v1505_v56, %v1502_v41 }
 0x15a   :  { %v2749_v4 = vadd.f32 %v2748_v37, %v2747_v54  ;;  %v2750_v5 = vpop.f32.mrb[46].mxu1  ;;  %v2687_v6 = vpop.f32.mrb[47].mxu0 }
 0x15b   :  { %v1413_v39 = vadd.f32 %v2685_v1, %v4076_v61  ;;  %v2688_v7 = vadd.f32 %v2687_v6, %v2686_v2  ;;  %v2751_v8 = vpop.f32.mrb[47].mxu1  ;;  %2829 = vmatprep.mubr.bf16.mxu0 %v1601_v3 }
 0x15c   :  { %v2752_v11 = vadd.f32 %v2751_v8, %v2750_v5 }
 0x15d   :  { %v1510_v13 = vadd.f32 %v2749_v4, %v1413_v39  ;;  %v1416_v42 = vadd.f32 %v2688_v7, %v4078_v60 }
 0x15f   :  { %v1513_v15 = vadd.f32 %v2752_v11, %v1416_v42  ;;  %v2689_v16 = vpop.f32.mrb[48].mxu0 }
 0x160   :  { %v2753_v18 = vpop.f32.mrb[48].mxu1  ;;  %v2690_v20 = vpop.f32.mrb[49].mxu0 }
 0x161   :  { %v2691_v50 = vadd.f32 %v2690_v20, %v2689_v16  ;;  %v2754_v46 = vpop.f32.mrb[49].mxu1  ;;  %v2692_v51 = vpop.f32.mrb[50].mxu0  ;;  %v1602_v21 = vpack.c.bf16 %v1513_v15, %v1510_v13 }
 0x162   :  { %v2755_v22 = vadd.f32 %v2754_v46, %v2753_v18  ;;  %v2756_v23 = vpop.f32.mrb[50].mxu1  ;;  %v2693_v27 = vpop.f32.mrb[51].mxu0 }
 0x163   :  { %v1421_v61 = vadd.f32 %v2691_v50, %v4080_v12  ;;  %v2694_v30 = vadd.f32 %v2693_v27, %v2692_v51  ;;  %v2757_v47 = vpop.f32.mrb[51].mxu1  ;;  %2830 = vmatmul.mubr.bf16.gmra.mrb[68].mxu0 %v1602_v21 }
 0x164   :  { %v2758_v48 = vadd.f32 %v2757_v47, %v2756_v23  ;;  %v2424_v23 = vld [vmem:[%s4146_s5] ss:$0 sm:$0xff] }
 0x165   :  { %v1518_v45 = vadd.f32 %v2755_v22, %v1421_v61  ;;  %v1424_v60 = vadd.f32 %v2694_v30, %v4082_v19  ;;  %v2952_v22 = vld [vmem:[%s4145_s6 + $0x30] sm:$0xff]  }
 0x166   :  { %2853 = vmatprep.subr.bf16.mxu1 %v2952_v22 }
 0x167   :  { %v1521_v14 = vadd.f32 %v2758_v48, %v1424_v60  ;;  %v2695_v31 = vpop.f32.mrb[52].mxu0  ;;  %2854 = vmatpush3.bf16.msra.mxu1 %v2952_v22 }
 0x168   :  { %v2759_v32 = vpop.f32.mrb[52].mxu1  ;;  %v2696_v33 = vpop.f32.mrb[53].mxu0 }
 0x169   :  { %v2697_v17 = vadd.f32 %v2696_v33, %v2695_v31  ;;  %v2760_v34 = vpop.f32.mrb[53].mxu1  ;;  %v2698_v63 = vpop.f32.mrb[54].mxu0  ;;  %v1603_v0 = vpack.c.bf16 %v1521_v14, %v1518_v45 }
 0x16a   :  { %v2761_v35 = vadd.f32 %v2760_v34, %v2759_v32  ;;  %v2762_v36 = vpop.f32.mrb[54].mxu1  ;;  %v2699_v9 = vpop.f32.mrb[55].mxu0 }
 0x16b   :  { %v1429_v12 = vadd.f32 %v2697_v17, %v4084_v28  ;;  %v2700_v24 = vadd.f32 %v2699_v9, %v2698_v63  ;;  %v2763_v25 = vpop.f32.mrb[55].mxu1  ;;  %2833 = vmatprep.mubr.bf16.mxu0 %v1603_v0 }
 0x16c   :  { %v2764_v43 = vadd.f32 %v2763_v25, %v2762_v36 }
 0x16d   :  { %v1526_v49 = vadd.f32 %v2761_v35, %v1429_v12  ;;  %v1432_v19 = vadd.f32 %v2700_v24, %v4086_v52 }
 0x16f   :  { %v1529_v26 = vadd.f32 %v2764_v43, %v1432_v19  ;;  %v2701_v53 = vpop.f32.mrb[56].mxu0 }
 0x170   :  { %v2765_v29 = vpop.f32.mrb[56].mxu1  ;;  %v2702_v55 = vpop.f32.mrb[57].mxu0 }
 0x171   :  { %v2703_v40 = vadd.f32 %v2702_v55, %v2701_v53  ;;  %v2766_v41 = vpop.f32.mrb[57].mxu1  ;;  %v2704_v44 = vpop.f32.mrb[58].mxu0  ;;  %v1604_v56 = vpack.c.bf16 %v1529_v26, %v1526_v49 }
 0x172   :  { %v2767_v57 = vadd.f32 %v2766_v41, %v2765_v29  ;;  %v2768_v54 = vpop.f32.mrb[58].mxu1  ;;  %v2705_v62 = vpop.f32.mrb[59].mxu0 }
 0x173   :  { %v1437_v28 = vadd.f32 %v2703_v40, %v4088_v38  ;;  %v2706_v1 = vadd.f32 %v2705_v62, %v2704_v44  ;;  %v2769_v37 = vpop.f32.mrb[59].mxu1  ;;  %2834 = vmatmul.mubr.bf16.gmra.mrb[72].mxu0 %v1604_v56 }
 0x174   :  { %v2770_v2 = vadd.f32 %v2769_v37, %v2768_v54 }
 0x175   :  { %v1534_v3 = vadd.f32 %v2767_v57, %v1437_v28  ;;  %v1440_v52 = vadd.f32 %v2706_v1, %v4090_v10 }
 0x177   :  { %v1537_v4 = vadd.f32 %v2770_v2, %v1440_v52  ;;  %v2707_v5 = vpop.f32.mrb[60].mxu0 }
 0x178   :  { %v2771_v6 = vpop.f32.mrb[60].mxu1  ;;  %v2708_v39 = vpop.f32.mrb[61].mxu0 }
 0x179   :  { %v2709_v7 = vadd.f32 %v2708_v39, %v2707_v5  ;;  %v2772_v8 = vpop.f32.mrb[61].mxu1  ;;  %v2710_v11 = vpop.f32.mrb[62].mxu0  ;;  %v1605_v13 = vpack.c.bf16 %v1537_v4, %v1534_v3 }
 0x17a   :  { %v2773_v42 = vadd.f32 %v2772_v8, %v2771_v6  ;;  %v2774_v15 = vpop.f32.mrb[62].mxu1  ;;  %v2711_v16 = vpop.f32.mrb[63].mxu0 }
 0x17b   :  { %v1445_v38 = vadd.f32 %v2709_v7, %v4092_v58  ;;  %v2712_v18 = vadd.f32 %v2711_v16, %v2710_v11  ;;  %v2775_v20 = vpop.f32.mrb[63].mxu1  ;;  %2837 = vmatprep.mubr.bf16.mxu0 %v1605_v13  ;;  %v2953_v58 = vld [vmem:[%s4145_s6 + $0x38] sm:$0xff]  }
 0x17c   :  { %v2776_v50 = vadd.f32 %v2775_v20, %v2774_v15  ;;  %2855 = vmatprep.subr.bf16.mxu1 %v2953_v58 }
 0x17d   :  { %v1542_v46 = vadd.f32 %v2773_v42, %v1445_v38  ;;  %v1448_v10 = vadd.f32 %v2712_v18, %v4094_v59  ;;  %2856 = vmatpush3.bf16.msra.mxu1 %v2953_v58 }
 0x17f   :  { %v1545_v51 = vadd.f32 %v2776_v50, %v1448_v10  ;;  %v2433_v50 = vld [vmem:[%s4147_s7] ss:$0 sm:$0xff] }
 0x181   :  { %v1606_v21 = vpack.c.bf16 %v1545_v51, %v1542_v46 }
 0x183   :  { %2838 = vmatmul.mubr.bf16.gmra.mrb[76].mxu0 %v1606_v21 }
 0x226   :  { %v2827_v59 = vpop.f32.mrb[64].mxu0 }
 0x227   :  { %v1721_v27 = vadd.f32 %v2827_v59, %v2424_v23  ;;  %v1712_v61 = vpop.f32.mrb[65].mxu0 }
 0x228   :  { %v1713_v30 = vadd.f32 %v2424_v23, %v1712_v61  ;;  %v2828_v47 = vpop.f32.mrb[66].mxu0 }
 0x229   :  { %v1724_v48 = vadd.f32 %v2828_v47, %v2424_v23  ;;  %v1715_v45 = vpop.f32.mrb[67].mxu0  ;;  %v1777_v14 = vmax.f32 %v1721_v27, 0.0 }
 0x22a   :  { %v1716_v60 = vadd.f32 %v2424_v23, %v1715_v45  ;;  %v1775_v32 = vmax.f32 %v1713_v30, 0.0 }
 0x22b   :  { %v1778_v31 = vmax.f32 %v1724_v48, 0.0 }
 0x22c   :  { %v1776_v33 = vmax.f32 %v1716_v60, 0.0 }
 0x22d   :  { %v1792_v17 = vpack.c.bf16 %v1778_v31, %v1777_v14 }
 0x22e   :  { %v1791_v34 = vpack.c.bf16 %v1776_v33, %v1775_v32 }
 0x230   :  { %2857 = vmatprep.mubr.bf16.mxu1 %v1791_v34 }
 0x231   :  { %2858 = vmatmul.mubr.bf16.vlgmr.msra.gmra.mrb[64].mxu1 %v1792_v17 }
 0x236   :  { %v2831_v63 = vpop.f32.mrb[68].mxu0 }
 0x237   :  { %v1737_v0 = vadd.f32 %v2831_v63, %v2424_v23  ;;  %v1728_v35 = vpop.f32.mrb[69].mxu0 }
 0x238   :  { %v1729_v36 = vadd.f32 %v2424_v23, %v1728_v35  ;;  %v2832_v9 = vpop.f32.mrb[70].mxu0 }
 0x239   :  { %v1740_v12 = vadd.f32 %v2832_v9, %v2424_v23  ;;  %v1731_v24 = vpop.f32.mrb[71].mxu0  ;;  %v1781_v43 = vmax.f32 %v1737_v0, 0.0 }
 0x23a   :  { %v1732_v25 = vadd.f32 %v2424_v23, %v1731_v24  ;;  %v1779_v19 = vmax.f32 %v1729_v36, 0.0 }
 0x23b   :  { %v1782_v49 = vmax.f32 %v1740_v12, 0.0 }
 0x23c   :  { %v1780_v26 = vmax.f32 %v1732_v25, 0.0 }
 0x23d   :  { %v1794_v53 = vpack.c.bf16 %v1782_v49, %v1781_v43 }
 0x23e   :  { %v1793_v29 = vpack.c.bf16 %v1780_v26, %v1779_v19 }
 0x240   :  { %2861 = vmatprep.mubr.bf16.mxu1 %v1793_v29 }
 0x241   :  { %2862 = vmatmul.mubr.bf16.gmra.mrb[68].mxu1 %v1794_v53 }
 0x246   :  { %v2835_v55 = vpop.f32.mrb[72].mxu0 }
 0x247   :  { %v1753_v40 = vadd.f32 %v2835_v55, %v2424_v23  ;;  %v1744_v41 = vpop.f32.mrb[73].mxu0 }
 0x248   :  { %v1745_v44 = vadd.f32 %v2424_v23, %v1744_v41  ;;  %v2836_v56 = vpop.f32.mrb[74].mxu0 }
 0x249   :  { %v1756_v57 = vadd.f32 %v2836_v56, %v2424_v23  ;;  %v1747_v54 = vpop.f32.mrb[75].mxu0  ;;  %v1785_v28 = vmax.f32 %v1753_v40, 0.0 }
 0x24a   :  { %v1748_v62 = vadd.f32 %v2424_v23, %v1747_v54  ;;  %v1783_v37 = vmax.f32 %v1745_v44, 0.0 }
 0x24b   :  { %v1786_v1 = vmax.f32 %v1756_v57, 0.0 }
 0x24c   :  { %v1784_v2 = vmax.f32 %v1748_v62, 0.0 }
 0x24d   :  { %v1796_v3 = vpack.c.bf16 %v1786_v1, %v1785_v28 }
 0x24e   :  { %v1795_v52 = vpack.c.bf16 %v1784_v2, %v1783_v37 }
 0x250   :  { %2865 = vmatprep.mubr.bf16.mxu1 %v1795_v52 }
 0x251   :  { %2866 = vmatmul.mubr.bf16.gmra.mrb[72].mxu1 %v1796_v3 }
 0x256   :  { %v2839_v4 = vpop.f32.mrb[76].mxu0 }
 0x257   :  { %v1769_v5 = vadd.f32 %v2839_v4, %v2424_v23  ;;  %v1760_v6 = vpop.f32.mrb[77].mxu0 }
 0x258   :  { %v1761_v39 = vadd.f32 %v2424_v23, %v1760_v6  ;;  %v2840_v7 = vpop.f32.mrb[78].mxu0 }
 0x259   :  { %v1772_v8 = vadd.f32 %v2840_v7, %v2424_v23  ;;  %v1763_v11 = vpop.f32.mrb[79].mxu0  ;;  %v1789_v42 = vmax.f32 %v1769_v5, 0.0 }
 0x25a   :  { %v1764_v13 = vadd.f32 %v2424_v23, %v1763_v11  ;;  %v1787_v16 = vmax.f32 %v1761_v39, 0.0 }
 0x25b   :  { %v1790_v15 = vmax.f32 %v1772_v8, 0.0 }
 0x25c   :  { %v1788_v38 = vmax.f32 %v1764_v13, 0.0 }
 0x25d   :  { %v1798_v18 = vpack.c.bf16 %v1790_v15, %v1789_v42 }
 0x25e   :  { %v1797_v20 = vpack.c.bf16 %v1788_v38, %v1787_v16 }
 0x260   :  { %2869 = vmatprep.mubr.bf16.mxu1 %v1797_v20 }
 0x261   :  { %2870 = vmatmul.mubr.bf16.gmra.mrb[76].mxu1 %v1798_v18 }
 0x304   :  { %v2859_v46 = vpop.f32.mrb[64].mxu1 }
 0x305   :  { %v1913_v10 = vadd.f32 %v2859_v46, %v2433_v50  ;;  %v1904_v51 = vpop.f32.mrb[65].mxu1 }
 0x306   :  { %v1905_v21 = vadd.f32 %v2433_v50, %v1904_v51  ;;  %v2860_v22 = vpop.f32.mrb[66].mxu1 }
 0x307   :  { %v1916_v58 = vadd.f32 %v2860_v22, %v2433_v50  ;;  %v1907_v23 = vpop.f32.mrb[67].mxu1  ;;  %v1969_v27 = vmax.f32 %v1913_v10, 0.0 }
 0x308   :  { %v1908_v59 = vadd.f32 %v2433_v50, %v1907_v23  ;;  %v1967_v30 = vmax.f32 %v1905_v21, 0.0 }
 0x309   :  { %v1970_v61 = vmax.f32 %v1916_v58, 0.0 }
 0x30a   :  { %v1968_v47 = vmax.f32 %v1908_v59, 0.0 }
 0x30b   :  { %v2482_v48 = vpack.c.bf16 %v1970_v61, %v1969_v27 }
 0x30c   :  { %v2477_v45 = vpack.c.bf16 %v1968_v47, %v1967_v30 }
 0x30d   :  { %2514 = vst [vmem:[%s4130_s10 + $0x8] sm:$0xff] %v2482_v48  }
 0x30e   :  { %2478 = vst [vmem:[%s4130_s10] sm:$0xff] %v2477_v45  }
 0x314   :  { %v2863_v60 = vpop.f32.mrb[68].mxu1 }
 0x315   :  { %v1929_v14 = vadd.f32 %v2863_v60, %v2433_v50  ;;  %v1920_v31 = vpop.f32.mrb[69].mxu1 }
 0x316   :  { %v1921_v32 = vadd.f32 %v2433_v50, %v1920_v31  ;;  %v2864_v33 = vpop.f32.mrb[70].mxu1 }
 0x317   :  { %v1932_v17 = vadd.f32 %v2864_v33, %v2433_v50  ;;  %v1923_v34 = vpop.f32.mrb[71].mxu1  ;;  %v1973_v0 = vmax.f32 %v1929_v14, 0.0 }
 0x318   :  { %v1924_v63 = vadd.f32 %v2433_v50, %v1923_v34  ;;  %v1971_v36 = vmax.f32 %v1921_v32, 0.0 }
 0x319   :  { %v1974_v35 = vmax.f32 %v1932_v17, 0.0 }
 0x31a   :  { %v1972_v9 = vmax.f32 %v1924_v63, 0.0 }
 0x31b   :  { %v2492_v12 = vpack.c.bf16 %v1974_v35, %v1973_v0 }
 0x31c   :  { %v2487_v24 = vpack.c.bf16 %v1972_v9, %v1971_v36 }
 0x31d   :  { %2516 = vst [vmem:[%s4130_s10 + $0x18] sm:$0xff] %v2492_v12  }
 0x31e   :  { %2515 = vst [vmem:[%s4130_s10 + $0x10] sm:$0xff] %v2487_v24  }
 0x324   :  { %v2867_v25 = vpop.f32.mrb[72].mxu1 }
 0x325   :  { %v1945_v43 = vadd.f32 %v2867_v25, %v2433_v50  ;;  %v1936_v49 = vpop.f32.mrb[73].mxu1 }
 0x326   :  { %v1937_v19 = vadd.f32 %v2433_v50, %v1936_v49  ;;  %v2868_v26 = vpop.f32.mrb[74].mxu1 }
 0x327   :  { %v1948_v53 = vadd.f32 %v2868_v26, %v2433_v50  ;;  %v1939_v29 = vpop.f32.mrb[75].mxu1  ;;  %v1977_v40 = vmax.f32 %v1945_v43, 0.0 }
 0x328   :  { %v1940_v55 = vadd.f32 %v2433_v50, %v1939_v29  ;;  %v1975_v44 = vmax.f32 %v1937_v19, 0.0 }
 0x329   :  { %v1978_v41 = vmax.f32 %v1948_v53, 0.0 }
 0x32a   :  { %v1976_v56 = vmax.f32 %v1940_v55, 0.0 }
 0x32b   :  { %v2502_v57 = vpack.c.bf16 %v1978_v41, %v1977_v40 }
 0x32c   :  { %v2497_v54 = vpack.c.bf16 %v1976_v56, %v1975_v44 }
 0x32d   :  { %2518 = vst [vmem:[%s4130_s10 + $0x28] sm:$0xff] %v2502_v57  }
 0x32e   :  { %2517 = vst [vmem:[%s4130_s10 + $0x20] sm:$0xff] %v2497_v54  }
 0x334   :  { %v2871_v62 = vpop.f32.mrb[76].mxu1 }
 0x335   :  { %v1961_v28 = vadd.f32 %v2871_v62, %v2433_v50  ;;  %v1952_v1 = vpop.f32.mrb[77].mxu1 }
 0x336   :  { %v1953_v37 = vadd.f32 %v2433_v50, %v1952_v1  ;;  %v2872_v2 = vpop.f32.mrb[78].mxu1 }
 0x337   :  { %v1964_v3 = vadd.f32 %v2872_v2, %v2433_v50  ;;  %v1955_v52 = vpop.f32.mrb[79].mxu1  ;;  %v1981_v5 = vmax.f32 %v1961_v28, 0.0 }
 0x338   :  { %v1956_v4 = vadd.f32 %v2433_v50, %v1955_v52  ;;  %v1979_v39 = vmax.f32 %v1953_v37, 0.0 }
 0x339   :  { %v1982_v6 = vmax.f32 %v1964_v3, 0.0 }
 0x33a   :  { %v1980_v7 = vmax.f32 %v1956_v4, 0.0 }
 0x33b   :  { %v2512_v8 = vpack.c.bf16 %v1982_v6, %v1981_v5 }
 0x33c   :  { %v2507_v11 = vpack.c.bf16 %v1980_v7, %v1979_v39 }
 0x33d   :  { %2520 = vst [vmem:[%s4130_s10 + $0x38] sm:$0xff] %v2512_v8  }
 0x33e   :  { %2519 = vst [vmem:[%s4130_s10 + $0x30] sm:$0xff] %v2507_v11  }

// kernel: gnn_forward.4
= control target key start
LH: loop header
LB: loop body
LE: loop exit
PB: predicated region body
PF: predicated region fallthrough
CT: control target
= control target key end

     0   :  { %v117_v14 = vlaneseq  ;;  %v2938_v61 = vmov 1.0|1.0   ;;  %s4124_s1 = inlined_call_operand.<no memory space> [shape: s32[1], index: 1, kind: input, shape index: {}]   ;;  %s4125_s3 = inlined_call_operand.vmem [shape: bf16[1024,128], index: 3, kind: input, shape index: {}]   ;;  %s4126_s0 = inlined_call_operand.<no memory space> [shape: s32[1], index: 0, kind: input, shape index: {}]   ;;  %s4127_s2 = inlined_call_operand.vmem [shape: s32[1,1024], index: 2, kind: input, shape index: {}]   ;;  %s4128_s4 = inlined_call_operand.vmem [shape: bf16[128,128], index: 4, kind: input, shape index: {}]   ;;  %s4129_s6 = inlined_call_operand.vmem [shape: bf16[128,128], index: 6, kind: input, shape index: {}]   ;;  %s4130_s5 = inlined_call_operand.vmem [shape: f32[1,128], index: 5, kind: input, shape index: {}]   ;;  %s4131_s7 = inlined_call_operand.vmem [shape: f32[1,128], index: 7, kind: input, shape index: {}]   ;;  %s4132_s8 = inlined_call_operand.vmem [shape: bf16[128,128], index: 8, kind: output, shape index: {}]  }
   0x1   :  { %s2083_s29 = sshll.u32 %s4124_s1, 7  ;;  %s2082_s13 = sshll.u32 %s4124_s1, 3 }
   0x2   :  { %p68_p0 = scmp.lt.s32.totalorder %s2083_s29, 127  ;;  %v3013_v19 = vshrl.u32 %v117_v14, 7  ;;  %p3017_p1 = scmp.lt.s32.totalorder %s2082_s13, 7 }
   0x3   :  { %s2087_s16 = sshll.u32 %s4126_s0, 7  ;;  %s2085_s27 = sshll.u32 %s4126_s0, 4 }
   0x4   :  { %s4301_s29 = smov (!%p68_p0, %s2083_s29), 127  ;;  %v119_v24 = vadd.s32 8, %v3013_v19  ;;  %v158_v26 = vsub.s32 1, %v3013_v19  ;;  %v166_v28 = vsub.s32 3, %v3013_v19  ;;  %s4303_s13 = smov (!%p3017_p1, %s2082_s13), 7  ;;  %v154_v31 = vsub.s32 0, %v3013_v19 }
   0x5   :  { %s2084_s30 = sshll.u32 %s4301_s29, 2  ;;  %v162_v33 = vsub.s32 2, %v3013_v19  ;;  %v120_v35 = vadd.s32 16, %v3013_v19  ;;  %v3041_v37 = vstv %s2087_s16  ;;  %v121_v38 = vadd.s32 24, %v3013_v19  ;;  %s63_s19 = scalar_lea.vmem %s4127_s2, %s4303_s13 }
   0x6   :  { %s2990_s11 = scalar_lea.vmem %s4125_s3, %s2084_s30  ;;  %v170_v40 = vsub.s32 4, %v3013_v19  ;;  %v178_v42 = vsub.s32 6, %v3013_v19  ;;  %v3054_v44 = vadd.s32 %v3041_v37, %v3013_v19  ;;  %v3057_v45 = vadd.s32 %v3041_v37, %v119_v24  ;;  %v3059_v46 = vld [vmem:[%s63_s19] sm:$0xff]  ;;  %p76_p2 = scmp.lt.s32.totalorder %s2085_s27, 15 }
   0x7   :  { %v2858_v0 = vld [vmem:[%s2990_s11 + $0x40] sm:$0xff]   ;;  %v2862_v4 = vld [vmem:[%s2990_s11 + $0x48] sm:$0xff]   ;;  %v2866_v8 = vld [vmem:[%s2990_s11 + $0x50] sm:$0xff]   ;;  %v3062_v47 = vadd.s32 %v3041_v37, %v120_v35  ;;  %v3065_v48 = vadd.s32 %v3041_v37, %v121_v38  ;;  %v122_v49 = vadd.s32 32, %v3013_v19  ;;  %v3069_v50 = vrot.slane %v3059_v46, %v158_v26 }
   0x8   :  { %v2859_v1 = vld [vmem:[%s2990_s11 + $0xc0] sm:$0xff]   ;;  %2505 = vmatprep.subr.bf16.mxu0 %v2858_v0  ;;  %v2863_v5 = vld [vmem:[%s2990_s11 + $0xc8] sm:$0xff]   ;;  %v2867_v9 = vld [vmem:[%s2990_s11 + $0xd0] sm:$0xff]   ;;  %v3072_v51 = vrot.slane %v3059_v46, %v166_v28  ;;  %v3075_v52 = vrot.slane %v3059_v46, %v154_v31  ;;  %v3078_v53 = vrot.slane %v3059_v46, %v162_v33  ;;  %v123_v56 = vadd.s32 40, %v3013_v19  ;;  %s4305_s27 = smov (!%p76_p2, %s2085_s27), 15 }
   0x9   :  { %v2860_v2 = vld [vmem:[%s2990_s11] sm:$0xff]   ;;  %2569 = vmatprep.subr.bf16.mxu1 %v2859_v1  ;;  %v2864_v6 = vld [vmem:[%s2990_s11 + $0x8] sm:$0xff]   ;;  %v2868_v10 = vld [vmem:[%s2990_s11 + $0x10] sm:$0xff]   ;;  %v3084_v57 = vrot.slane %v3059_v46, %v170_v40  ;;  %v3087_v58 = vrot.slane %v3059_v46, %v178_v42  ;;  %vm185_vm0 = vcmp.eq.s32.totalorder %v3054_v44, %v3069_v50  ;;  %vm193_vm1 = vcmp.eq.s32.totalorder %v3057_v45, %v3069_v50  ;;  %s2086_s30 = sshll.u32 %s4305_s27, 2 }
   0xa   :  { %v2861_v3 = vld [vmem:[%s2990_s11 + $0x80] sm:$0xff]   ;;  %2506 = vmatpush3.bf16.msra.mxu0 %v2860_v2  ;;  %v2865_v7 = vld [vmem:[%s2990_s11 + $0x88] sm:$0xff]   ;;  %v2869_v11 = vld [vmem:[%s2990_s11 + $0x90] sm:$0xff]   ;;  %vm187_vm2 = vcmp.eq.s32.totalorder %v3054_v44, %v3072_v51  ;;  %vm195_vm3 = vcmp.eq.s32.totalorder %v3057_v45, %v3072_v51  ;;  %vm184_vm5 = vcmp.eq.s32.totalorder %v3054_v44, %v3075_v52  ;;  %vm192_vm6 = vcmp.eq.s32.totalorder %v3057_v45, %v3075_v52 }
   0xb   :  { %2570 = vmatpush3.bf16.msra.mxu1 %v2861_v3  ;;  %2507 = vmatprep.subr.bf16.mxu0 %v2862_v4  ;;  %v2870_v12 = vld [vmem:[%s2990_s11 + $0x58] sm:$0xff]   ;;  %v2874_v17 = vld [vmem:[%s2990_s11 + $0x60] sm:$0xff]   ;;  %v2878_v22 = vld [vmem:[%s2990_s11 + $0x68] sm:$0xff]   ;;  %vm186_vm7 = vcmp.eq.s32.totalorder %v3054_v44, %v3078_v53  ;;  %vm194_vm8 = vcmp.eq.s32.totalorder %v3057_v45, %v3078_v53  ;;  %vm201_vm10 = vcmp.eq.s32.totalorder %v3062_v47, %v3069_v50  ;;  %v124_v4 = vadd.s32 48, %v3013_v19 }
   0xc   :  { %2571 = vmatprep.subr.bf16.mxu1 %v2863_v5  ;;  %v2871_v13 = vld [vmem:[%s2990_s11 + $0xd8] sm:$0xff]   ;;  %v2875_v18 = vld [vmem:[%s2990_s11 + $0xe0] sm:$0xff]   ;;  %v2879_v23 = vld [vmem:[%s2990_s11 + $0xe8] sm:$0xff]   ;;  %vm209_vm11 = vcmp.eq.s32.totalorder %v3065_v48, %v3069_v50  ;;  %vm203_vm13 = vcmp.eq.s32.totalorder %v3062_v47, %v3072_v51  ;;  %vm211_vm14 = vcmp.eq.s32.totalorder %v3065_v48, %v3072_v51  ;;  %v3119_v63 = vadd.s32 %v3041_v37, %v122_v49 }
   0xd   :  { %v2872_v15 = vld [vmem:[%s2990_s11 + $0x18] sm:$0xff]   ;;  %v2876_v20 = vld [vmem:[%s2990_s11 + $0x20] sm:$0xff]   ;;  %v2880_v25 = vld [vmem:[%s2990_s11 + $0x28] sm:$0xff]   ;;  %v3122_v0 = vadd.s32 %v3041_v37, %v123_v56  ;;  %v125_v5 = vadd.s32 56, %v3013_v19  ;;  %v127_v14 = vadd.s32 72, %v3013_v19  ;;  %v133_v42 = vadd.s32 120, %v3013_v19 }
   0xe   :  { %2508 = vmatpush3.bf16.msra.mxu0 %v2864_v6  ;;  %v2873_v16 = vld [vmem:[%s2990_s11 + $0x98] sm:$0xff]   ;;  %v2877_v21 = vld [vmem:[%s2990_s11 + $0xa0] sm:$0xff]   ;;  %v2881_v27 = vld [vmem:[%s2990_s11 + $0xa8] sm:$0xff]   ;;  %v4234_v38 = vmov 0 }
   0xf   :  { %2572 = vmatpush3.bf16.msra.mxu1 %v2865_v7  ;;  %2509 = vmatprep.subr.bf16.mxu0 %v2866_v8  ;;  %v2882_v29 = vld [vmem:[%s2990_s11 + $0x70] sm:$0xff]   ;;  %v2886_v36 = vld [vmem:[%s2990_s11 + $0x78] sm:$0xff]   ;;  %v2890_v54 = vld [vmem:[%s2990_s11 + $0x140] sm:$0xff]  }
  0x10   :  { %2573 = vmatprep.subr.bf16.mxu1 %v2867_v9  ;;  %v2883_v30 = vld [vmem:[%s2990_s11 + $0xf0] sm:$0xff]   ;;  %v2887_v39 = vld [vmem:[%s2990_s11 + $0xf8] sm:$0xff]   ;;  %v2891_v55 = vld [vmem:[%s2990_s11 + $0x100] sm:$0xff]   ;;  %v3165_v9 = vadd.s32 %v3041_v37, %v124_v4  ;;  %v174_v4 = vsub.s32 5, %v3013_v19 }
  0x11   :  { %v2884_v32 = vld [vmem:[%s2990_s11 + $0x30] sm:$0xff]   ;;  %v2888_v41 = vld [vmem:[%s2990_s11 + $0x38] sm:$0xff]   ;;  %v2892_v59 = vld [vmem:[%s2990_s11 + $0x1c0] sm:$0xff]  }
  0x12   :  { %2510 = vmatpush3.bf16.msra.mxu0 %v2868_v10  ;;  %v2885_v34 = vld [vmem:[%s2990_s11 + $0xb0] sm:$0xff]   ;;  %v2889_v43 = vld [vmem:[%s2990_s11 + $0xb8] sm:$0xff]   ;;  %vm2280_vm4 = vmpackc.low %vm193_vm1, %vm185_vm0  ;;  %vm200_vm1 = vcmp.eq.s32.totalorder %v3062_v47, %v3075_v52  ;;  %v3168_v10 = vadd.s32 %v3041_v37, %v125_v5 }
  0x13   :  { %2574 = vmatpush3.bf16.msra.mxu1 %v2869_v11  ;;  %2511 = vmatprep.subr.bf16.mxu0 %v2870_v12  ;;  %v2893_v60 = vld [vmem:[%s2990_s11 + $0x180] sm:$0xff]   ;;  %vm2312_vm9 = vmpackc.low %vm195_vm3, %vm187_vm2  ;;  %v2894_v62 = vld [vmem:[%s2990_s11 + $0x148] sm:$0xff]   ;;  %vm208_vm2 = vcmp.eq.s32.totalorder %v3065_v48, %v3075_v52 }
  0x14   :  { %2575 = vmatprep.subr.bf16.mxu1 %v2871_v13  ;;  %2281 = vmatprep.mubr.msk.bf16.mxu0 %vm2280_vm4, %v2938_v61  ;;  %vm2282_vm12 = vmpackc.low %vm192_vm6, %vm184_vm5  ;;  %v2895_v1 = vld [vmem:[%s2990_s11 + $0x108] sm:$0xff]   ;;  %vm202_vm4 = vcmp.eq.s32.totalorder %v3062_v47, %v3078_v53  ;;  %vm210_vm5 = vcmp.eq.s32.totalorder %v3065_v48, %v3078_v53  ;;  %vm217_vm6 = vcmp.eq.s32.totalorder %v3119_v63, %v3069_v50  ;;  %v2898_v6 = vld [vmem:[%s2990_s11 + $0x150] sm:$0xff]   ;;  %v126_v13 = vadd.s32 64, %v3013_v19 }
  0x15   :  { %2313 = vmatprep.mubr.msk.bf16.mxu1 %vm2312_vm9, %v2938_v61  ;;  %vm2314_vm15 = vmpackc.low %vm194_vm8, %vm186_vm7  ;;  %v2896_v2 = vld [vmem:[%s2990_s11 + $0x1c8] sm:$0xff]   ;;  %vm225_vm7 = vcmp.eq.s32.totalorder %v3122_v0, %v3069_v50  ;;  %vm219_vm9 = vcmp.eq.s32.totalorder %v3119_v63, %v3072_v51  ;;  %v2899_v7 = vld [vmem:[%s2990_s11 + $0x110] sm:$0xff]  }
  0x16   :  { %2512 = vmatpush3.bf16.msra.mxu0 %v2872_v15  ;;  %vm2284_vm0 = vmpackc.low %vm209_vm11, %vm201_vm10  ;;  %v2897_v3 = vld [vmem:[%s2990_s11 + $0x188] sm:$0xff]   ;;  %vm227_vm10 = vcmp.eq.s32.totalorder %v3122_v0, %v3072_v51  ;;  %v2900_v8 = vld [vmem:[%s2990_s11 + $0x1d0] sm:$0xff]   ;;  %v128_v15 = vadd.s32 80, %v3013_v19  ;;  %v3212_v24 = vadd.s32 %v3041_v37, %v126_v13  ;;  %v182_v13 = vsub.s32 7, %v3013_v19 }
  0x17   :  { %2576 = vmatpush3.bf16.msra.mxu1 %v2873_v16  ;;  %2513 = vmatprep.subr.bf16.mxu0 %v2874_v17  ;;  %vm2316_vm3 = vmpackc.low %vm211_vm14, %vm203_vm13  ;;  %vm216_vm14 = vcmp.eq.s32.totalorder %v3119_v63, %v3075_v52  ;;  %v2901_v11 = vld [vmem:[%s2990_s11 + $0x190] sm:$0xff]   ;;  %v2902_v12 = vld [vmem:[%s2990_s11 + $0x158] sm:$0xff]   ;;  %v3523_v16 = vrot.slane %v3059_v46, %v174_v4 }
  0x18   :  { %2577 = vmatprep.subr.bf16.mxu1 %v2875_v18  ;;  %vm2286_vm8 = vmpackc.low %vm208_vm2, %vm200_vm1  ;;  %vm226_vm1 = vcmp.eq.s32.totalorder %v3122_v0, %v3078_v53  ;;  %v2903_v18 = vld [vmem:[%s2990_s11 + $0x118] sm:$0xff]   ;;  %v3218_v26 = vadd.s32 %v3041_v37, %v128_v15  ;;  %v2906_v28 = vld [vmem:[%s2990_s11 + $0x160] sm:$0xff]  }
  0x19   :  { %vm2318_vm11 = vmpackc.low %vm210_vm5, %vm202_vm4  ;;  %vm241_vm4 = vcmp.eq.s32.totalorder %v3168_v10, %v3069_v50  ;;  %v2907_v31 = vld [vmem:[%s2990_s11 + $0x120] sm:$0xff]   ;;  %v2911_v49 = vld [vmem:[%s2990_s11 + $0x128] sm:$0xff]  }
  0x1a   :  { %2514 = vmatpush3.bf16.msra.mxu0 %v2876_v20  ;;  %vm2320_vm13 = vmpackc.low %vm227_vm10, %vm219_vm9  ;;  %v129_v20 = vadd.s32 88, %v3013_v19  ;;  %v2908_v33 = vld [vmem:[%s2990_s11 + $0x1e0] sm:$0xff]   ;;  %v2912_v56 = vld [vmem:[%s2990_s11 + $0x1e8] sm:$0xff]  }
  0x1b   :  { %2578 = vmatpush3.bf16.msra.mxu1 %v2877_v21  ;;  %2515 = vmatprep.subr.bf16.mxu0 %v2878_v22  ;;  %v2904_v21 = vld [vmem:[%s2990_s11 + $0x1d8] sm:$0xff]   ;;  %v2909_v35 = vld [vmem:[%s2990_s11 + $0x1a0] sm:$0xff]   ;;  %v2916_v5 = vld [vmem:[%s2990_s11 + $0x1f0] sm:$0xff]   ;;  %v4176_v22 = vmov 0 }
  0x1c   :  { %2579 = vmatprep.subr.bf16.mxu1 %v2879_v23  ;;  %v2905_v23 = vld [vmem:[%s2990_s11 + $0x198] sm:$0xff]  }
  0x1d   :  { %v2920_v15 = vld [vmem:[%s2990_s11 + $0x1f8] sm:$0xff]  }
  0x1e   :  { %2516 = vmatpush3.bf16.msra.mxu0 %v2880_v25  ;;  %v3215_v25 = vadd.s32 %v3041_v37, %v127_v14  ;;  %v2921_v17 = vld [vmem:[%s2990_s11 + $0x1b8] sm:$0xff]  }
  0x1f   :  { %2580 = vmatpush3.bf16.msra.mxu1 %v2881_v27  ;;  %2517 = vmatprep.subr.bf16.mxu0 %v2882_v29  ;;  %v3241_v29 = vadd.s32 %v3041_v37, %v129_v20  ;;  %v3546_v20 = vrot.slane %v3059_v46, %v182_v13  ;;  %v4168_v46 = vmov 0  ;;  %v4182_v27 = vmov 0 }
  0x20   :  { %2581 = vmatprep.subr.bf16.mxu1 %v2883_v30  ;;  %v130_v30 = vadd.s32 96, %v3013_v19 }
  0x22   :  { %2518 = vmatpush3.bf16.msra.mxu0 %v2884_v32  ;;  %v131_v32 = vadd.s32 104, %v3013_v19  ;;  %v3308_v40 = vadd.s32 %v3041_v37, %v130_v30  ;;  %v4189_v30 = vmov 0 }
  0x23   :  { %2582 = vmatpush3.bf16.msra.mxu1 %v2885_v34  ;;  %2519 = vmatprep.subr.bf16.mxu0 %v2886_v36  ;;  %v132_v34 = vadd.s32 112, %v3013_v19  ;;  %v2919_v19 = vld [vmem:[%s2990_s11 + $0x138] sm:$0xff]   ;;  %v4232_v36 = vmov 0 }
  0x24   :  { %2583 = vmatprep.subr.bf16.mxu1 %v2887_v39  ;;  %v2910_v39 = vld [vmem:[%s2990_s11 + $0x168] sm:$0xff]  }
  0x26   :  { %2520 = vmatpush3.bf16.msra.mxu0 %v2888_v41  ;;  %v3311_v41 = vadd.s32 %v3041_v37, %v131_v32 }
  0x27   :  { %2584 = vmatpush3.bf16.msra.mxu1 %v2889_v43  ;;  %2633 = vmatprep.subr.bf16.mxu0 %v2890_v54  ;;  %v3328_v54 = vadd.s32 %v3041_v37, %v132_v34  ;;  %v4217_v34 = vmov 0  ;;  %v4256_v43 = vmov 0 }
  0x28   :  { %2697 = vmatprep.subr.bf16.mxu1 %v2892_v59  ;;  %v2913_v59 = vld [vmem:[%s2990_s11 + $0x1a8] sm:$0xff]  }
  0x29   :  { %2283 = vmatmul.mubr.msk.bf16.vlgmr.msra.gmra.mrb[0].mxu0 %vm2282_vm12, %v2938_v61  ;;  %vm2288_vm12 = vmpackc.low %vm225_vm7, %vm217_vm6  ;;  %vm235_vm6 = vcmp.eq.s32.totalorder %v3165_v9, %v3072_v51  ;;  %vm243_vm7 = vcmp.eq.s32.totalorder %v3168_v10, %v3072_v51 }
  0x2a   :  { %2315 = vmatmul.mubr.msk.bf16.vlgmr.msra.gmra.mrb[0].mxu1 %vm2314_vm15, %v2938_v61  ;;  %2634 = vmatpush3.bf16.msra.mxu0 %v2891_v55  ;;  %vm224_vm15 = vcmp.eq.s32.totalorder %v3122_v0, %v3075_v52  ;;  %vm3220_vm9 = vmpackc.low %vm243_vm7, %vm235_vm6  ;;  %vm249_vm6 = vcmp.eq.s32.totalorder %v3212_v24, %v3069_v50  ;;  %vm257_vm7 = vcmp.eq.s32.totalorder %v3215_v25, %v3069_v50 }
  0x2b   :  { %2698 = vmatpush3.bf16.msra.mxu1 %v2893_v60  ;;  %2285 = vmatprep.mubr.msk.bf16.mxu0 %vm2284_vm0, %v2938_v61  ;;  %vm218_vm0 = vcmp.eq.s32.totalorder %v3119_v63, %v3078_v53  ;;  %vm3187_vm2 = vmpackc.low %vm224_vm15, %vm216_vm14  ;;  %vm232_vm14 = vcmp.eq.s32.totalorder %v3165_v9, %v3075_v52  ;;  %vm240_vm15 = vcmp.eq.s32.totalorder %v3168_v10, %v3075_v52 }
  0x2c   :  { %2317 = vmatprep.mubr.msk.bf16.mxu1 %vm2316_vm3, %v2938_v61  ;;  %2635 = vmatprep.subr.bf16.mxu0 %v2894_v62  ;;  %vm233_vm3 = vcmp.eq.s32.totalorder %v3165_v9, %v3069_v50  ;;  %vm3195_vm5 = vmpackc.low %vm226_vm1, %vm218_vm0  ;;  %vm234_vm0 = vcmp.eq.s32.totalorder %v3165_v9, %v3078_v53  ;;  %vm250_vm1 = vcmp.eq.s32.totalorder %v3212_v24, %v3078_v53  ;;  %v2928_v62 = vld [vmem:[%s4128_s4 + $0x30] sm:$0xff]  }
  0x2d   :  { %2699 = vmatprep.subr.bf16.mxu1 %v2896_v2  ;;  %v3378_v60 = vadd.s32 %v3041_v37, %v133_v42  ;;  %v4254_v42 = vmov 0 }
  0x2e   :  { %2636 = vmatpush3.bf16.msra.mxu0 %v2895_v1  ;;  %v2914_v1 = vld [vmem:[%s2990_s11 + $0x170] sm:$0xff]  }
  0x2f   :  { %2700 = vmatpush3.bf16.msra.mxu1 %v2897_v3  ;;  %2637 = vmatprep.subr.bf16.mxu0 %v2898_v6  ;;  %v2915_v3 = vld [vmem:[%s2990_s11 + $0x130] sm:$0xff]  }
  0x30   :  { %2701 = vmatprep.subr.bf16.mxu1 %v2900_v8 }
  0x31   :  { %2287 = vmatmul.mubr.msk.bf16.gmra.mrb[4].mxu0 %vm2286_vm8, %v2938_v61  ;;  %vm3206_vm8 = vmpackc.low %vm241_vm4, %vm233_vm3  ;;  %vm242_vm3 = vcmp.eq.s32.totalorder %v3168_v10, %v3078_v53  ;;  %vm259_vm4 = vcmp.eq.s32.totalorder %v3215_v25, %v3072_v51 }
  0x32   :  { %2319 = vmatmul.mubr.msk.bf16.gmra.mrb[4].mxu1 %vm2318_vm11, %v2938_v61  ;;  %2289 = vmatprep.mubr.msk.bf16.mxu0 %vm2288_vm12, %v2938_v61  ;;  %vm307_vm12 = vcmp.eq.s32.totalorder %v3378_v60, %v3072_v51  ;;  %vm213_vm11 = vcmp.eq.s32.totalorder %v3065_v48, %v3523_v16 }
  0x33   :  { %2321 = vmatprep.mubr.msk.bf16.mxu1 %vm2320_vm13, %v2938_v61  ;;  %2638 = vmatpush3.bf16.msra.mxu0 %v2899_v7  ;;  %v2917_v7 = vld [vmem:[%s2990_s11 + $0x1b0] sm:$0xff]  }
  0x34   :  { %2702 = vmatpush3.bf16.msra.mxu1 %v2901_v11  ;;  %2639 = vmatprep.subr.bf16.mxu0 %v2902_v12  ;;  %v2918_v12 = vld [vmem:[%s2990_s11 + $0x178] sm:$0xff]   ;;  %s4114_s11 = scalar_lea.vmem %s4132_s8, %s2086_s30 }
  0x35   :  { %2703 = vmatprep.subr.bf16.mxu1 %v2904_v21  ;;  %v4174_v21 = vmov 0 }
  0x37   :  { %2640 = vmatpush3.bf16.msra.mxu0 %v2903_v18  ;;  %v4164_v18 = vmov 0 }
  0x38   :  { %2704 = vmatpush3.bf16.msra.mxu1 %v2905_v23  ;;  %2641 = vmatprep.subr.bf16.mxu0 %v2906_v28  ;;  %v4180_v23 = vmov 0  ;;  %v4184_v28 = vmov 0 }
  0x39   :  { %2291 = vmatmul.mubr.msk.bf16.gmra.mrb[8].mxu0 %vm3187_vm2, %v2938_v61  ;;  %2705 = vmatprep.subr.bf16.mxu1 %v2908_v33  ;;  %vm275_vm2 = vcmp.eq.s32.totalorder %v3241_v29, %v3072_v51  ;;  %v4214_v33 = vmov 0 }
  0x3a   :  { %2323 = vmatmul.mubr.msk.bf16.gmra.mrb[8].mxu1 %vm3195_vm5, %v2938_v61  ;;  %2293 = vmatprep.mubr.msk.bf16.mxu0 %vm3206_vm8, %v2938_v61  ;;  %vm251_vm8 = vcmp.eq.s32.totalorder %v3212_v24, %v3072_v51  ;;  %vm3284_vm5 = vmpackc.low %vm240_vm15, %vm232_vm14  ;;  %vm256_vm15 = vcmp.eq.s32.totalorder %v3215_v25, %v3075_v52 }
  0x3b   :  { %2325 = vmatprep.mubr.msk.bf16.mxu1 %vm3220_vm9, %v2938_v61  ;;  %2642 = vmatpush3.bf16.msra.mxu0 %v2907_v31  ;;  %vm3302_vm14 = vmpackc.low %vm242_vm3, %vm234_vm0  ;;  %vm289_vm3 = vcmp.eq.s32.totalorder %v3311_v41, %v3069_v50  ;;  %v4208_v31 = vmov 0 }
  0x3c   :  { %2706 = vmatpush3.bf16.msra.mxu1 %v2909_v35  ;;  %vm3322_vm0 = vmpackc.low %vm257_vm7, %vm249_vm6  ;;  %vm248_vm7 = vcmp.eq.s32.totalorder %v3212_v24, %v3075_v52  ;;  %2643 = vmatprep.subr.bf16.mxu0 %v2910_v39 }
  0x3d   :  { %vm3342_vm6 = vmpackc.low %vm259_vm4, %vm251_vm8  ;;  %vm258_vm4 = vcmp.eq.s32.totalorder %v3215_v25, %v3078_v53  ;;  %vm273_vm8 = vcmp.eq.s32.totalorder %v3241_v29, %v3069_v50  ;;  %2707 = vmatprep.subr.bf16.mxu1 %v2912_v56 }
  0x3f   :  { %2644 = vmatpush3.bf16.msra.mxu0 %v2911_v49  ;;  %v4258_v49 = vmov 0 }
  0x40   :  { %2708 = vmatpush3.bf16.msra.mxu1 %v2913_v59  ;;  %2645 = vmatprep.subr.bf16.mxu0 %v2914_v1  ;;  %v2926_v59 = vld [vmem:[%s4128_s4 + $0x20] sm:$0xff]   ;;  %v2929_v1 = vld [vmem:[%s4128_s4 + $0x38] sm:$0xff]  }
  0x41   :  { %2295 = vmatmul.mubr.msk.bf16.gmra.mrb[12].mxu0 %vm3284_vm5, %v2938_v61  ;;  %vm265_vm5 = vcmp.eq.s32.totalorder %v3218_v26, %v3069_v50  ;;  %2709 = vmatprep.subr.bf16.mxu1 %v2916_v5 }
  0x42   :  { %2327 = vmatmul.mubr.msk.bf16.gmra.mrb[12].mxu1 %vm3302_vm14, %v2938_v61  ;;  %2297 = vmatprep.mubr.msk.bf16.mxu0 %vm3322_vm0, %v2938_v61  ;;  %vm3389_vm14 = vmpackc.low %vm256_vm15, %vm248_vm7  ;;  %vm267_vm7 = vcmp.eq.s32.totalorder %v3218_v26, %v3072_v51  ;;  %vm281_vm0 = vcmp.eq.s32.totalorder %v3308_v40, %v3069_v50 }
  0x43   :  { %2329 = vmatprep.mubr.msk.bf16.mxu1 %vm3342_vm6, %v2938_v61  ;;  %vm3406_vm15 = vmpackc.low %vm258_vm4, %vm250_vm1  ;;  %vm264_vm6 = vcmp.eq.s32.totalorder %v3218_v26, %v3075_v52  ;;  %vm272_vm4 = vcmp.eq.s32.totalorder %v3241_v29, %v3075_v52  ;;  %2646 = vmatpush3.bf16.msra.mxu0 %v2915_v3 }
  0x44   :  { %vm3424_vm1 = vmpackc.low %vm273_vm8, %vm265_vm5  ;;  %vm266_vm8 = vcmp.eq.s32.totalorder %v3218_v26, %v3078_v53  ;;  %vm274_vm5 = vcmp.eq.s32.totalorder %v3241_v29, %v3078_v53  ;;  %2710 = vmatpush3.bf16.msra.mxu1 %v2917_v7  ;;  %2647 = vmatprep.subr.bf16.mxu0 %v2918_v12 }
  0x45   :  { %vm3451_vm9 = vmpackc.low %vm275_vm2, %vm267_vm7  ;;  %vm299_vm7 = vcmp.eq.s32.totalorder %v3328_v54, %v3072_v51  ;;  %2711 = vmatprep.subr.bf16.mxu1 %v2920_v15  ;;  %v2930_v15 = vld [vmem:[%s4129_s6] sm:$0xff]  }
  0x46   :  { %vm3470_vm2 = vmpackc.low %vm272_vm4, %vm264_vm6  ;;  %vm283_vm4 = vcmp.eq.s32.totalorder %v3308_v40, %v3072_v51 }
  0x47   :  { %vm3487_vm6 = vmpackc.low %vm274_vm5, %vm266_vm8  ;;  %vm290_vm8 = vcmp.eq.s32.totalorder %v3311_v41, %v3078_v53  ;;  %vm305_vm5 = vcmp.eq.s32.totalorder %v3378_v60, %v3069_v50  ;;  %2648 = vmatpush3.bf16.msra.mxu0 %v2919_v19 }
  0x48   :  { %2712 = vmatpush3.bf16.msra.mxu1 %v2921_v17 }
  0x49   :  { %2299 = vmatmul.mubr.msk.bf16.gmra.mrb[16].mxu0 %vm3389_vm14, %v2938_v61  ;;  %vm3505_vm14 = vmpackc.low %vm289_vm3, %vm281_vm0  ;;  %vm288_vm3 = vcmp.eq.s32.totalorder %v3311_v41, %v3075_v52  ;;  %vm282_vm0 = vcmp.eq.s32.totalorder %v3308_v40, %v3078_v53  ;;  %2825 = vmatprep.subr.bf16.mxu1 %v2930_v15 }
  0x4a   :  { %2331 = vmatmul.mubr.msk.bf16.gmra.mrb[16].mxu1 %vm3406_vm15, %v2938_v61  ;;  %2301 = vmatprep.mubr.msk.bf16.mxu0 %vm3424_vm1, %v2938_v61  ;;  %vm291_vm15 = vcmp.eq.s32.totalorder %v3311_v41, %v3072_v51  ;;  %vm280_vm1 = vcmp.eq.s32.totalorder %v3308_v40, %v3075_v52  ;;  %vm3565_vm10 = vmpackc.low %vm290_vm8, %vm282_vm0  ;;  %v4170_v51 = vmov 0  ;;  %vm207_vm0 = vcmp.eq.s32.totalorder %v3062_v47, %v3546_v20 }
  0x4b   :  { %2333 = vmatprep.mubr.msk.bf16.mxu1 %vm3451_vm9, %v2938_v61  ;;  %vm297_vm9 = vcmp.eq.s32.totalorder %v3328_v54, %v3069_v50  ;;  %vm3537_vm13 = vmpackc.low %vm291_vm15, %vm283_vm4  ;;  %v4166_v50 = vmov 0  ;;  %vm205_vm15 = vcmp.eq.s32.totalorder %v3062_v47, %v3523_v16  ;;  %v4169_v46 = vsel %vm3565_vm10, 4294967295, %v4168_v46 }
  0x4c   :  { %v4165_v18 = vsel %vm3537_vm13, 4294967295, %v4164_v18  ;;  %vm3554_vm4 = vmpackc.low %vm288_vm3, %vm280_vm1  ;;  %vm4172_vm1 = vcmp.eq.s32.totalorder %v3054_v44, %v3084_v57  ;;  %vm4173_vm3 = vcmp.eq.s32.totalorder %v3057_v45, %v3084_v57  ;;  %vm215_vm8 = vcmp.eq.s32.totalorder %v3065_v48, %v3546_v20 }
  0x4d   :  { %v4167_v50 = vsel %vm3554_vm4, 4294967295, %v4166_v50  ;;  %vm3569_vm13 = vmpackc.low %vm305_vm5, %vm297_vm9  ;;  %vm4178_vm5 = vcmp.eq.s32.totalorder %v3054_v44, %v3087_v58 }
  0x4e   :  { %v4171_v51 = vsel %vm3569_vm13, 4294967295, %v4170_v51  ;;  %vm3579_vm4 = vmpackc.low %vm4173_vm3, %vm4172_vm1  ;;  %vm4179_vm13 = vcmp.eq.s32.totalorder %v3057_v45, %v3087_v58 }
  0x4f   :  { %v4175_v21 = vsel %vm3579_vm4, 4294967295, %v4174_v21  ;;  %vm3587_vm9 = vmpackc.low %vm307_vm12, %vm299_vm7  ;;  %vm296_vm7 = vcmp.eq.s32.totalorder %v3328_v54, %v3075_v52  ;;  %vm199_vm4 = vcmp.eq.s32.totalorder %v3057_v45, %v3546_v20 }
  0x50   :  { %v4177_v22 = vsel %vm3587_vm9, 4294967295, %v4176_v22  ;;  %vm3597_vm1 = vmpackc.low %vm4179_vm13, %vm4178_vm5  ;;  %vm231_vm5 = vcmp.eq.s32.totalorder %v3122_v0, %v3546_v20  ;;  %vm306_vm13 = vcmp.eq.s32.totalorder %v3378_v60, %v3078_v53  ;;  %vm4195_vm9 = vcmp.eq.s32.totalorder %v3119_v63, %v3523_v16 }
  0x51   :  { %v4181_v23 = vsel %vm3597_vm1, 4294967295, %v4180_v23  ;;  %2303 = vmatmul.mubr.msk.bf16.gmra.mrb[20].mxu0 %vm3470_vm2, %v2938_v61  ;;  %vm3604_vm3 = vmpackc.low %vm213_vm11, %vm205_vm15  ;;  %vm229_vm11 = vcmp.eq.s32.totalorder %v3122_v0, %v3523_v16  ;;  %vm4186_vm2 = vnez %v4165_v18  ;;  %vm4188_vm15 = vcmp.eq.s32.totalorder %v3065_v48, %v3084_v57 }
  0x52   :  { %v4183_v27 = vsel %vm3604_vm3, 4294967295, %v4182_v27  ;;  %2335 = vmatmul.mubr.msk.bf16.gmra.mrb[20].mxu1 %vm3487_vm6, %v2938_v61  ;;  %2305 = vmatprep.mubr.msk.bf16.mxu0 %vm3505_vm14, %v2938_v61  ;;  %vm3614_vm12 = vmpackc.low %vm215_vm8, %vm207_vm0  ;;  %vm304_vm6 = vcmp.eq.s32.totalorder %v3378_v60, %v3075_v52  ;;  %vm4187_vm14 = vcmp.eq.s32.totalorder %v3062_v47, %v3084_v57  ;;  %vm223_vm8 = vcmp.eq.s32.totalorder %v3119_v63, %v3546_v20 }
  0x53   :  { %v4185_v28 = vsel %vm3614_vm12, 4294967295, %v4184_v28  ;;  %2337 = vmatprep.mubr.msk.bf16.mxu1 %vm4186_vm2, %v2938_v61  ;;  %vm3635_vm0 = vmpackc.low %vm4188_vm15, %vm4187_vm14  ;;  %vm298_vm2 = vcmp.eq.s32.totalorder %v3328_v54, %v3078_v53  ;;  %vm189_vm12 = vcmp.eq.s32.totalorder %v3054_v44, %v3523_v16  ;;  %vm197_vm14 = vcmp.eq.s32.totalorder %v3057_v45, %v3523_v16 }
  0x54   :  { %v4190_v30 = vsel %vm3635_vm0, 4294967295, %v4189_v30  ;;  %vm4191_vm15 = vcmp.eq.s32.totalorder %v3062_v47, %v3087_v58  ;;  %vm4192_vm0 = vcmp.eq.s32.totalorder %v3065_v48, %v3087_v58  ;;  %v4193_v52 = vmov 0  ;;  %vm3668_vm10 = vmpackc.low %vm229_vm11, %vm4195_vm9  ;;  %v2933_v48 = vld [vmem:[%s4129_s6 + $0x18] sm:$0xff]  }
  0x55   :  { %vm3657_vm3 = vmpackc.low %vm4192_vm0, %vm4191_vm15  ;;  %vm191_vm1 = vcmp.eq.s32.totalorder %v3054_v44, %v3546_v20  ;;  %v4196_v53 = vmov 0  ;;  %vm245_vm9 = vcmp.eq.s32.totalorder %v3168_v10, %v3523_v16 }
  0x56   :  { %v4194_v52 = vsel %vm3657_vm3, 4294967295, %v4193_v52  ;;  %v4197_v53 = vsel %vm3668_vm10, 4294967295, %v4196_v53  ;;  %vm3672_vm0 = vmpackc.low %vm304_vm6, %vm296_vm7  ;;  %vm237_vm3 = vcmp.eq.s32.totalorder %v3165_v9, %v3523_v16  ;;  %vm4206_vm7 = vcmp.eq.s32.totalorder %v3119_v63, %v3084_v57 }
  0x57   :  { %vm3676_vm15 = vmpackc.low %vm231_vm5, %vm223_vm8  ;;  %vm4207_vm6 = vcmp.eq.s32.totalorder %v3122_v0, %v3084_v57  ;;  %vm247_vm5 = vcmp.eq.s32.totalorder %v3168_v10, %v3546_v20 }
  0x58   :  { %vm3684_vm11 = vmpackc.low %vm306_vm13, %vm298_vm2  ;;  %vm239_vm13 = vcmp.eq.s32.totalorder %v3165_v9, %v3546_v20  ;;  %vm4212_vm2 = vcmp.eq.s32.totalorder %v3119_v63, %v3087_v58  ;;  %v4221_v63 = vmov 0 }
  0x59   :  { %vm3688_vm10 = vmpackc.low %vm197_vm14, %vm189_vm12  ;;  %vm4213_vm14 = vcmp.eq.s32.totalorder %v3122_v0, %v3087_v58  ;;  %v4226_v0 = vmov 0 }
  0x5a   :  { %vm3698_vm8 = vmpackc.low %vm4207_vm6, %vm4206_vm7  ;;  %vm4216_vm6 = vnez %v4167_v50 }
  0x5b   :  { %v4209_v31 = vsel %vm3698_vm8, 4294967295, %v4208_v31  ;;  %vm3706_vm12 = vmpackc.low %vm199_vm4, %vm191_vm1  ;;  %2307 = vmatmul.mubr.msk.bf16.gmra.mrb[24].mxu0 %vm4216_vm6, %v2938_v61  ;;  %vm4219_vm4 = vnez %v4169_v46  ;;  %vm4220_vm1 = vnez %v4171_v51  ;;  %vm4224_vm6 = vcmp.eq.s32.totalorder %v3165_v9, %v3084_v57 }
  0x5c   :  { %vm3716_vm7 = vmpackc.low %vm4213_vm14, %vm4212_vm2  ;;  %2339 = vmatmul.mubr.msk.bf16.gmra.mrb[24].mxu1 %vm4219_vm4, %v2938_v61  ;;  %2309 = vmatprep.mubr.msk.bf16.mxu0 %vm4220_vm1, %v2938_v61  ;;  %vm253_vm14 = vcmp.eq.s32.totalorder %v3212_v24, %v3523_v16  ;;  %vm4225_vm4 = vcmp.eq.s32.totalorder %v3168_v10, %v3084_v57  ;;  %vm263_vm1 = vcmp.eq.s32.totalorder %v3215_v25, %v3546_v20 }
  0x5d   :  { %v4215_v33 = vsel %vm3716_vm7, 4294967295, %v4214_v33  ;;  %vm3723_vm8 = vmpackc.low %vm245_vm9, %vm237_vm3  ;;  %vm261_vm3 = vcmp.eq.s32.totalorder %v3215_v25, %v3523_v16  ;;  %vm4223_vm9 = vnez %v4177_v22  ;;  %vm277_vm7 = vcmp.eq.s32.totalorder %v3241_v29, %v3523_v16 }
  0x5e   :  { %v4218_v34 = vsel %vm3723_vm8, 4294967295, %v4217_v34  ;;  %vm3733_vm2 = vmpackc.low %vm247_vm5, %vm239_vm13  ;;  %2341 = vmatprep.mubr.msk.bf16.mxu1 %vm4223_vm9, %v2938_v61  ;;  %vm255_vm5 = vcmp.eq.s32.totalorder %v3212_v24, %v3546_v20  ;;  %vm4229_vm9 = vcmp.eq.s32.totalorder %v3168_v10, %v3087_v58 }
  0x5f   :  { %v4222_v63 = vsel %vm3733_vm2, 4294967295, %v4221_v63  ;;  %vm3750_vm13 = vmpackc.low %vm4225_vm4, %vm4224_vm6  ;;  %vm4228_vm2 = vcmp.eq.s32.totalorder %v3165_v9, %v3087_v58 }
  0x60   :  { %v4227_v0 = vsel %vm3750_vm13, 4294967295, %v4226_v0  ;;  %vm3764_vm8 = vmpackc.low %vm4229_vm9, %vm4228_vm2  ;;  %vm269_vm13 = vcmp.eq.s32.totalorder %v3218_v26, %v3523_v16  ;;  %vm4236_vm2 = vcmp.eq.s32.totalorder %v3212_v24, %v3084_v57  ;;  %vm4237_vm9 = vcmp.eq.s32.totalorder %v3215_v25, %v3084_v57 }
  0x61   :  { %vm3768_vm6 = vmpackc.low %vm261_vm3, %vm253_vm14  ;;  %vm271_vm3 = vcmp.eq.s32.totalorder %v3218_v26, %v3546_v20 }
  0x62   :  { %v4233_v36 = vsel %vm3768_vm6, 4294967295, %v4232_v36  ;;  %vm3772_vm4 = vmpackc.low %vm263_vm1, %vm255_vm5  ;;  %vm279_vm5 = vcmp.eq.s32.totalorder %v3241_v29, %v3546_v20  ;;  %vm4240_vm1 = vcmp.eq.s32.totalorder %v3212_v24, %v3087_v58  ;;  %v4246_v24 = vmov 0 }
  0x63   :  { %v4235_v38 = vsel %vm3772_vm4, 4294967295, %v4234_v38  ;;  %vm3786_vm14 = vmpackc.low %vm4237_vm9, %vm4236_vm2  ;;  %vm4241_vm4 = vcmp.eq.s32.totalorder %v3215_v25, %v3087_v58  ;;  %2311 = vmatmul.mubr.msk.bf16.gmra.mrb[28].mxu0 %vm3672_vm0, %v2938_v61  ;;  %vm285_vm9 = vcmp.eq.s32.totalorder %v3308_v40, %v3523_v16  ;;  %vm293_vm0 = vcmp.eq.s32.totalorder %v3311_v41, %v3523_v16 }
  0x64   :  { %vm3800_vm6 = vmpackc.low %vm4241_vm4, %vm4240_vm1  ;;  %2343 = vmatmul.mubr.msk.bf16.gmra.mrb[28].mxu1 %vm3684_vm11, %v2938_v61  ;;  %2345 = vmatprep.mubr.msk.bf16.mxu0 %vm3688_vm10, %v2938_v61  ;;  %vm4248_vm11 = vcmp.eq.s32.totalorder %v3218_v26, %v3084_v57  ;;  %vm4249_vm10 = vcmp.eq.s32.totalorder %v3241_v29, %v3084_v57  ;;  %v4250_v25 = vmov 0 }
  0x65   :  { %vm3807_vm2 = vmpackc.low %vm277_vm7, %vm269_vm13  ;;  %2377 = vmatprep.mubr.msk.bf16.mxu1 %vm3706_vm12, %v2938_v61  ;;  %vm287_vm13 = vcmp.eq.s32.totalorder %v3308_v40, %v3546_v20  ;;  %vm4253_vm12 = vcmp.eq.s32.totalorder %v3241_v29, %v3087_v58 }
  0x66   :  { %vm3817_vm4 = vmpackc.low %vm279_vm5, %vm271_vm3  ;;  %vm295_vm3 = vcmp.eq.s32.totalorder %v3311_v41, %v3546_v20  ;;  %vm4252_vm5 = vcmp.eq.s32.totalorder %v3218_v26, %v3087_v58  ;;  %v4262_v26 = vmov 0 }
  0x67   :  { %v4247_v24 = vsel %vm3817_vm4, 4294967295, %v4246_v24  ;;  %vm3834_vm7 = vmpackc.low %vm4249_vm10, %vm4248_vm11  ;;  %vm309_vm4 = vcmp.eq.s32.totalorder %v3378_v60, %v3523_v16 }
  0x68   :  { %v4251_v25 = vsel %vm3834_vm7, 4294967295, %v4250_v25  ;;  %vm3848_vm1 = vmpackc.low %vm4253_vm12, %vm4252_vm5  ;;  %vm301_vm7 = vcmp.eq.s32.totalorder %v3328_v54, %v3523_v16  ;;  %vm4260_vm5 = vcmp.eq.s32.totalorder %v3308_v40, %v3084_v57  ;;  %vm4261_vm12 = vcmp.eq.s32.totalorder %v3311_v41, %v3084_v57  ;;  %v2931_v16 = vld [vmem:[%s4129_s6 + $0x8] sm:$0xff]  }
  0x69   :  { %v4255_v42 = vsel %vm3848_vm1, 4294967295, %v4254_v42  ;;  %vm3852_vm11 = vmpackc.low %vm293_vm0, %vm285_vm9  ;;  %vm303_vm0 = vcmp.eq.s32.totalorder %v3328_v54, %v3546_v20  ;;  %vm4272_vm1 = vnez %v4183_v27 }
  0x6a   :  { %v4257_v43 = vsel %vm3852_vm11, 4294967295, %v4256_v43  ;;  %vm3856_vm10 = vmpackc.low %vm295_vm3, %vm287_vm13  ;;  %vm311_vm13 = vcmp.eq.s32.totalorder %v3378_v60, %v3546_v20  ;;  %vm4264_vm3 = vcmp.eq.s32.totalorder %v3308_v40, %v3087_v58  ;;  %v2932_v20 = vld [vmem:[%s4129_s6 + $0x10] sm:$0xff]  }
  0x6b   :  { %v4259_v49 = vsel %vm3856_vm10, 4294967295, %v4258_v49  ;;  %vm3870_vm9 = vmpackc.low %vm4261_vm12, %vm4260_vm5  ;;  %vm4265_vm10 = vcmp.eq.s32.totalorder %v3311_v41, %v3087_v58  ;;  %vm4268_vm5 = vnez %v4175_v21 }
  0x6c   :  { %v4263_v26 = vsel %vm3870_vm9, 4294967295, %v4262_v26  ;;  %vm3884_vm11 = vmpackc.low %vm4265_vm10, %vm4264_vm3  ;;  %2347 = vmatmul.mubr.msk.bf16.vlgmr.msra.gmra.mrb[32].mxu0 %vm4268_vm5, %v2938_v61  ;;  %vm4271_vm9 = vnez %v4181_v23  ;;  %vm4275_vm3 = vnez %v4185_v28 }
  0x6d   :  { %vm3891_vm12 = vmpackc.low %vm309_vm4, %vm301_vm7  ;;  %2379 = vmatmul.mubr.msk.bf16.vlgmr.msra.gmra.mrb[32].mxu1 %vm4271_vm9, %v2938_v61  ;;  %2349 = vmatprep.mubr.msk.bf16.mxu0 %vm4272_vm1, %v2938_v61  ;;  %vm4276_vm4 = vcmp.eq.s32.totalorder %v3328_v54, %v3084_v57  ;;  %vm4277_vm7 = vcmp.eq.s32.totalorder %v3378_v60, %v3084_v57  ;;  %vm4280_vm1 = vcmp.eq.s32.totalorder %v3328_v54, %v3087_v58  ;;  %v2922_v57 = vld [vmem:[%s4128_s4] sm:$0xff]   ;;  %v2924_v54 = vld [vmem:[%s4128_s4 + $0x10] sm:$0xff]  }
  0x6e   :  { %vm3901_vm10 = vmpackc.low %vm311_vm13, %vm303_vm0  ;;  %2381 = vmatprep.mubr.msk.bf16.mxu1 %vm4275_vm3, %v2938_v61  ;;  %vm4281_vm9 = vcmp.eq.s32.totalorder %v3378_v60, %v3087_v58  ;;  %vm4284_vm13 = vnez %v4190_v30  ;;  %vm4285_vm3 = vnez %v4194_v52  ;;  %2793 = vmatprep.subr.bf16.mxu0 %v2922_v57  ;;  %v2923_v58 = vld [vmem:[%s4128_s4 + $0x8] sm:$0xff]  }
  0x6f   :  { %vm3914_vm5 = vmpackc.low %vm4277_vm7, %vm4276_vm4  ;;  %vm4286_vm4 = vnez %v4197_v53  ;;  %vm4287_vm7 = vnez %v4209_v31  ;;  %2794 = vmatpush3.bf16.msra.mxu0 %v2922_v57  ;;  %v2927_v60 = vld [vmem:[%s4128_s4 + $0x28] sm:$0xff]   ;;  %2826 = vmatpush3.bf16.msra.mxu1 %v2930_v15 }
  0x70   :  { %vm3924_vm0 = vmpackc.low %vm4281_vm9, %vm4280_vm1  ;;  %vm4288_vm1 = vnez %v4215_v33  ;;  %vm4289_vm9 = vnez %v4218_v34  ;;  %2795 = vmatprep.subr.bf16.mxu0 %v2923_v58  ;;  %2827 = vmatprep.subr.bf16.mxu1 %v2931_v16  ;;  %v2934_v33 = vld [vmem:[%s4129_s6 + $0x20] sm:$0xff]  }
  0x73   :  { %2796 = vmatpush3.bf16.msra.mxu0 %v2923_v58  ;;  %2828 = vmatpush3.bf16.msra.mxu1 %v2931_v16 }
  0x74   :  { %2351 = vmatmul.mubr.msk.bf16.gmra.mrb[36].mxu0 %vm4284_vm13, %v2938_v61  ;;  %vm4290_vm13 = vnez %v4222_v63  ;;  %2797 = vmatprep.subr.bf16.mxu0 %v2924_v54 }
  0x75   :  { %2383 = vmatmul.mubr.msk.bf16.gmra.mrb[36].mxu1 %vm4285_vm3, %v2938_v61  ;;  %2353 = vmatprep.mubr.msk.bf16.mxu0 %vm4286_vm4, %v2938_v61  ;;  %vm4291_vm3 = vnez %v4227_v0  ;;  %vm4293_vm4 = vnez %v4235_v38 }
  0x76   :  { %2385 = vmatprep.mubr.msk.bf16.mxu1 %vm3676_vm15, %v2938_v61  ;;  %vm4292_vm15 = vnez %v4233_v36  ;;  %2829 = vmatprep.subr.bf16.mxu1 %v2932_v20 }
  0x77   :  { %2798 = vmatpush3.bf16.msra.mxu0 %v2924_v54  ;;  %2830 = vmatpush3.bf16.msra.mxu1 %v2932_v20 }
  0x78   :  { %2831 = vmatprep.subr.bf16.mxu1 %v2933_v48 }
  0x7b   :  { %2832 = vmatpush3.bf16.msra.mxu1 %v2933_v48 }
  0x7c   :  { %2355 = vmatmul.mubr.msk.bf16.gmra.mrb[40].mxu0 %vm4287_vm7, %v2938_v61  ;;  %vm4295_vm7 = vnez %v4251_v25  ;;  %2833 = vmatprep.subr.bf16.mxu1 %v2934_v33  ;;  %v2935_v25 = vld [vmem:[%s4129_s6 + $0x28] sm:$0xff]  }
  0x7d   :  { %2387 = vmatmul.mubr.msk.bf16.gmra.mrb[40].mxu1 %vm4288_vm1, %v2938_v61  ;;  %2357 = vmatprep.mubr.msk.bf16.mxu0 %vm4289_vm9, %v2938_v61  ;;  %vm4296_vm1 = vnez %v4255_v42 }
  0x7e   :  { %2389 = vmatprep.mubr.msk.bf16.mxu1 %vm4290_vm13, %v2938_v61 }
  0x7f   :  { %2834 = vmatpush3.bf16.msra.mxu1 %v2934_v33 }
  0x80   :  { %2835 = vmatprep.subr.bf16.mxu1 %v2935_v25 }
  0x83   :  { %2836 = vmatpush3.bf16.msra.mxu1 %v2935_v25 }
  0x84   :  { %2359 = vmatmul.mubr.msk.bf16.gmra.mrb[44].mxu0 %vm4291_vm3, %v2938_v61 }
  0x85   :  { %2391 = vmatmul.mubr.msk.bf16.gmra.mrb[44].mxu1 %vm3764_vm8, %v2938_v61  ;;  %2361 = vmatprep.mubr.msk.bf16.mxu0 %vm4292_vm15, %v2938_v61  ;;  %vm4294_vm8 = vnez %v4247_v24 }
  0x86   :  { %2393 = vmatprep.mubr.msk.bf16.mxu1 %vm4293_vm4, %v2938_v61 }
  0x8c   :  { %2363 = vmatmul.mubr.msk.bf16.gmra.mrb[48].mxu0 %vm3786_vm14, %v2938_v61  ;;  %vm4297_vm14 = vnez %v4257_v43 }
  0x8d   :  { %2395 = vmatmul.mubr.msk.bf16.gmra.mrb[48].mxu1 %vm3800_vm6, %v2938_v61  ;;  %2365 = vmatprep.mubr.msk.bf16.mxu0 %vm3807_vm2, %v2938_v61  ;;  %vm4298_vm6 = vnez %v4259_v49  ;;  %vm4299_vm2 = vnez %v4263_v26 }
  0x8e   :  { %2397 = vmatprep.mubr.msk.bf16.mxu1 %vm4294_vm8, %v2938_v61 }
  0x94   :  { %2367 = vmatmul.mubr.msk.bf16.gmra.mrb[52].mxu0 %vm4295_vm7, %v2938_v61 }
  0x95   :  { %2399 = vmatmul.mubr.msk.bf16.gmra.mrb[52].mxu1 %vm4296_vm1, %v2938_v61  ;;  %2369 = vmatprep.mubr.msk.bf16.mxu0 %vm4297_vm14, %v2938_v61 }
  0x96   :  { %2401 = vmatprep.mubr.msk.bf16.mxu1 %vm4298_vm6, %v2938_v61 }
  0x9c   :  { %2371 = vmatmul.mubr.msk.bf16.gmra.mrb[56].mxu0 %vm4299_vm2, %v2938_v61 }
  0x9d   :  { %2403 = vmatmul.mubr.msk.bf16.gmra.mrb[56].mxu1 %vm3884_vm11, %v2938_v61  ;;  %2373 = vmatprep.mubr.msk.bf16.mxu0 %vm3891_vm12, %v2938_v61 }
  0x9e   :  { %2405 = vmatprep.mubr.msk.bf16.mxu1 %vm3901_vm10, %v2938_v61 }
  0xa4   :  { %2375 = vmatmul.mubr.msk.bf16.gmra.mrb[60].mxu0 %vm3914_vm5, %v2938_v61 }
  0xa5   :  { %2407 = vmatmul.mubr.msk.bf16.gmra.mrb[60].mxu1 %vm3924_vm0, %v2938_v61  ;;  %v2925_v61 = vld [vmem:[%s4128_s4 + $0x18] sm:$0xff]  }
  0xa6   :  { %2799 = vmatprep.subr.bf16.mxu0 %v2925_v61 }
  0xa7   :  { %2800 = vmatpush3.bf16.msra.mxu0 %v2925_v61 }
  0xa8   :  { %2801 = vmatprep.subr.bf16.mxu0 %v2926_v59 }
  0xab   :  { %2802 = vmatpush3.bf16.msra.mxu0 %v2926_v59 }
  0xac   :  { %2803 = vmatprep.subr.bf16.mxu0 %v2927_v60 }
  0xaf   :  { %2804 = vmatpush3.bf16.msra.mxu0 %v2927_v60 }
  0xb0   :  { %2805 = vmatprep.subr.bf16.mxu0 %v2928_v62 }
  0xb3   :  { %2806 = vmatpush3.bf16.msra.mxu0 %v2928_v62 }
  0xb4   :  { %2807 = vmatprep.subr.bf16.mxu0 %v2929_v1 }
  0xb7   :  { %2808 = vmatpush3.bf16.msra.mxu0 %v2929_v1 }
  0xfc   :  { %v2521_v37 = vpop.f32.mrb[0].mxu0 }
  0xfd   :  { %v2585_v2 = vpop.f32.mrb[0].mxu1  ;;  %v2522_v3 = vpop.f32.mrb[1].mxu0 }
  0xfe   :  { %v2523_v4 = vadd.f32 %v2522_v3, %v2521_v37  ;;  %v2586_v5 = vpop.f32.mrb[1].mxu1  ;;  %v2524_v6 = vpop.f32.mrb[2].mxu0 }
  0xff   :  { %v2587_v7 = vadd.f32 %v2586_v5, %v2585_v2  ;;  %v2588_v8 = vpop.f32.mrb[2].mxu1  ;;  %v2525_v11 = vpop.f32.mrb[3].mxu0 }
 0x100   :  { %v2526_v12 = vadd.f32 %v2525_v11, %v2524_v6  ;;  %v2589_v13 = vpop.f32.mrb[3].mxu1 }
 0x101   :  { %v4030_v14 = vadd.f32 %v2587_v7, %v2523_v4  ;;  %v2590_v19 = vadd.f32 %v2589_v13, %v2588_v8 }
 0x103   :  { %v4038_v17 = vadd.f32 %v2590_v19, %v2526_v12 }
 0x104   :  { %v2527_v18 = vpop.f32.mrb[4].mxu0 }
 0x105   :  { %v2591_v50 = vpop.f32.mrb[4].mxu1  ;;  %v2528_v46 = vpop.f32.mrb[5].mxu0 }
 0x106   :  { %v2529_v51 = vadd.f32 %v2528_v46, %v2527_v18  ;;  %v2592_v21 = vpop.f32.mrb[5].mxu1  ;;  %v2530_v22 = vpop.f32.mrb[6].mxu0 }
 0x107   :  { %v2593_v23 = vadd.f32 %v2592_v21, %v2591_v50  ;;  %v2594_v27 = vpop.f32.mrb[6].mxu1  ;;  %v2531_v28 = vpop.f32.mrb[7].mxu0 }
 0x108   :  { %v2532_v30 = vadd.f32 %v2531_v28, %v2530_v22  ;;  %v2595_v52 = vpop.f32.mrb[7].mxu1 }
 0x109   :  { %v4043_v53 = vadd.f32 %v2593_v23, %v2529_v51  ;;  %v2596_v47 = vadd.f32 %v2595_v52, %v2594_v27 }
 0x10b   :  { %v4048_v44 = vadd.f32 %v2596_v47, %v2532_v30 }
 0x10c   :  { %v2533_v45 = vpop.f32.mrb[8].mxu0 }
 0x10d   :  { %v2597_v31 = vpop.f32.mrb[8].mxu1  ;;  %v2534_v32 = vpop.f32.mrb[9].mxu0 }
 0x10e   :  { %v2535_v34 = vadd.f32 %v2534_v32, %v2533_v45  ;;  %v2598_v63 = vpop.f32.mrb[9].mxu1  ;;  %v2536_v0 = vpop.f32.mrb[10].mxu0 }
 0x10f   :  { %v2599_v35 = vadd.f32 %v2598_v63, %v2597_v31  ;;  %v2600_v36 = vpop.f32.mrb[10].mxu1  ;;  %v2537_v38 = vpop.f32.mrb[11].mxu0 }
 0x110   :  { %v2538_v9 = vadd.f32 %v2537_v38, %v2536_v0  ;;  %v2601_v10 = vpop.f32.mrb[11].mxu1 }
 0x111   :  { %v4053_v39 = vadd.f32 %v2599_v35, %v2535_v34  ;;  %v2602_v24 = vadd.f32 %v2601_v10, %v2600_v36 }
 0x113   :  { %v4058_v42 = vadd.f32 %v2602_v24, %v2538_v9 }
 0x114   :  { %v2539_v43 = vpop.f32.mrb[12].mxu0 }
 0x115   :  { %v2603_v49 = vpop.f32.mrb[12].mxu1  ;;  %v2540_v26 = vpop.f32.mrb[13].mxu0 }
 0x116   :  { %v2541_v29 = vadd.f32 %v2540_v26, %v2539_v43  ;;  %v2604_v55 = vpop.f32.mrb[13].mxu1  ;;  %v2542_v40 = vpop.f32.mrb[14].mxu0 }
 0x117   :  { %v2605_v41 = vadd.f32 %v2604_v55, %v2603_v49  ;;  %v2606_v56 = vpop.f32.mrb[14].mxu1  ;;  %v2543_v57 = vpop.f32.mrb[15].mxu0 }
 0x118   :  { %v2544_v58 = vadd.f32 %v2543_v57, %v2542_v40  ;;  %v2607_v54 = vpop.f32.mrb[15].mxu1 }
 0x119   :  { %v4060_v61 = vadd.f32 %v2605_v41, %v2541_v29  ;;  %v2608_v59 = vadd.f32 %v2607_v54, %v2606_v56 }
 0x11b   :  { %v4062_v60 = vadd.f32 %v2608_v59, %v2544_v58 }
 0x11c   :  { %v2545_v62 = vpop.f32.mrb[16].mxu0 }
 0x11d   :  { %v2609_v1 = vpop.f32.mrb[16].mxu1  ;;  %v2546_v37 = vpop.f32.mrb[17].mxu0 }
 0x11e   :  { %v2547_v2 = vadd.f32 %v2546_v37, %v2545_v62  ;;  %v2610_v3 = vpop.f32.mrb[17].mxu1  ;;  %v2548_v4 = vpop.f32.mrb[18].mxu0 }
 0x11f   :  { %v2611_v5 = vadd.f32 %v2610_v3, %v2609_v1  ;;  %v2612_v6 = vpop.f32.mrb[18].mxu1  ;;  %v2549_v7 = vpop.f32.mrb[19].mxu0 }
 0x120   :  { %v2550_v8 = vadd.f32 %v2549_v7, %v2548_v4  ;;  %v2613_v11 = vpop.f32.mrb[19].mxu1 }
 0x121   :  { %v4064_v12 = vadd.f32 %v2611_v5, %v2547_v2  ;;  %v2614_v13 = vadd.f32 %v2613_v11, %v2612_v6 }
 0x123   :  { %v4066_v19 = vadd.f32 %v2614_v13, %v2550_v8 }
 0x124   :  { %v2551_v15 = vpop.f32.mrb[20].mxu0 }
 0x125   :  { %v2615_v16 = vpop.f32.mrb[20].mxu1  ;;  %v2552_v18 = vpop.f32.mrb[21].mxu0 }
 0x126   :  { %v2553_v20 = vadd.f32 %v2552_v18, %v2551_v15  ;;  %v2616_v50 = vpop.f32.mrb[21].mxu1  ;;  %v2554_v46 = vpop.f32.mrb[22].mxu0 }
 0x127   :  { %v2617_v51 = vadd.f32 %v2616_v50, %v2615_v16  ;;  %v2618_v21 = vpop.f32.mrb[22].mxu1  ;;  %v2555_v22 = vpop.f32.mrb[23].mxu0 }
 0x128   :  { %v2556_v23 = vadd.f32 %v2555_v22, %v2554_v46  ;;  %v2619_v27 = vpop.f32.mrb[23].mxu1 }
 0x129   :  { %v4068_v28 = vadd.f32 %v2617_v51, %v2553_v20  ;;  %v2620_v30 = vadd.f32 %v2619_v27, %v2618_v21 }
 0x12b   :  { %v4070_v52 = vadd.f32 %v2620_v30, %v2556_v23 }
 0x12e   :  { %v2557_v47 = vpop.f32.mrb[24].mxu0 }
 0x12f   :  { %v2621_v48 = vpop.f32.mrb[24].mxu1  ;;  %v2558_v45 = vpop.f32.mrb[25].mxu0 }
 0x130   :  { %v2559_v31 = vadd.f32 %v2558_v45, %v2557_v47  ;;  %v2622_v32 = vpop.f32.mrb[25].mxu1  ;;  %v2560_v33 = vpop.f32.mrb[26].mxu0 }
 0x131   :  { %v2623_v34 = vadd.f32 %v2622_v32, %v2621_v48  ;;  %v2624_v63 = vpop.f32.mrb[26].mxu1  ;;  %v2561_v0 = vpop.f32.mrb[27].mxu0 }
 0x132   :  { %v2562_v35 = vadd.f32 %v2561_v0, %v2560_v33  ;;  %v2625_v36 = vpop.f32.mrb[27].mxu1 }
 0x133   :  { %v4072_v38 = vadd.f32 %v2623_v34, %v2559_v31  ;;  %v2626_v9 = vadd.f32 %v2625_v36, %v2624_v63 }
 0x135   :  { %v4074_v10 = vadd.f32 %v2626_v9, %v2562_v35 }
 0x136   :  { %v2563_v24 = vpop.f32.mrb[28].mxu0 }
 0x137   :  { %v2627_v25 = vpop.f32.mrb[28].mxu1  ;;  %v2564_v43 = vpop.f32.mrb[29].mxu0 }
 0x138   :  { %v2565_v49 = vadd.f32 %v2564_v43, %v2563_v24  ;;  %v2628_v26 = vpop.f32.mrb[29].mxu1  ;;  %v2566_v29 = vpop.f32.mrb[30].mxu0 }
 0x139   :  { %v2629_v55 = vadd.f32 %v2628_v26, %v2627_v25  ;;  %v2630_v40 = vpop.f32.mrb[30].mxu1  ;;  %v2567_v41 = vpop.f32.mrb[31].mxu0 }
 0x13a   :  { %v2568_v56 = vadd.f32 %v2567_v41, %v2566_v29  ;;  %v2631_v57 = vpop.f32.mrb[31].mxu1 }
 0x13b   :  { %v4076_v58 = vadd.f32 %v2629_v55, %v2565_v49  ;;  %v2632_v54 = vadd.f32 %v2631_v57, %v2630_v40 }
 0x13d   :  { %v4078_v59 = vadd.f32 %v2632_v54, %v2568_v56 }
 0x13f   :  { %v2649_v62 = vpop.f32.mrb[32].mxu0 }
 0x140   :  { %v2713_v1 = vpop.f32.mrb[32].mxu1  ;;  %v2650_v37 = vpop.f32.mrb[33].mxu0 }
 0x141   :  { %v2651_v2 = vadd.f32 %v2650_v37, %v2649_v62  ;;  %v2714_v3 = vpop.f32.mrb[33].mxu1  ;;  %v2652_v4 = vpop.f32.mrb[34].mxu0 }
 0x142   :  { %v2715_v5 = vadd.f32 %v2714_v3, %v2713_v1  ;;  %v2716_v6 = vpop.f32.mrb[34].mxu1  ;;  %v2653_v7 = vpop.f32.mrb[35].mxu0 }
 0x143   :  { %v1389_v8 = vadd.f32 %v2651_v2, %v4030_v14  ;;  %v2654_v11 = vadd.f32 %v2653_v7, %v2652_v4  ;;  %v2717_v13 = vpop.f32.mrb[35].mxu1 }
 0x144   :  { %v2718_v15 = vadd.f32 %v2717_v13, %v2716_v6 }
 0x145   :  { %v1486_v16 = vadd.f32 %v2715_v5, %v1389_v8  ;;  %v1392_v18 = vadd.f32 %v2654_v11, %v4038_v17 }
 0x147   :  { %v1489_v20 = vadd.f32 %v2718_v15, %v1392_v18  ;;  %v2655_v50 = vpop.f32.mrb[36].mxu0 }
 0x148   :  { %v2719_v46 = vpop.f32.mrb[36].mxu1  ;;  %v2656_v51 = vpop.f32.mrb[37].mxu0 }
 0x149   :  { %v2657_v21 = vadd.f32 %v2656_v51, %v2655_v50  ;;  %v2720_v22 = vpop.f32.mrb[37].mxu1  ;;  %v2658_v23 = vpop.f32.mrb[38].mxu0  ;;  %v1599_v27 = vpack.c.bf16 %v1489_v20, %v1486_v16 }
 0x14a   :  { %v2721_v30 = vadd.f32 %v2720_v22, %v2719_v46  ;;  %v2722_v47 = vpop.f32.mrb[38].mxu1  ;;  %v2659_v48 = vpop.f32.mrb[39].mxu0 }
 0x14b   :  { %v1397_v45 = vadd.f32 %v2657_v21, %v4043_v53  ;;  %v2660_v14 = vadd.f32 %v2659_v48, %v2658_v23  ;;  %v2723_v31 = vpop.f32.mrb[39].mxu1  ;;  %2809 = vmatprep.mubr.bf16.mxu0 %v1599_v27 }
 0x14c   :  { %v2724_v32 = vadd.f32 %v2723_v31, %v2722_v47 }
 0x14d   :  { %v1494_v33 = vadd.f32 %v2721_v30, %v1397_v45  ;;  %v1400_v17 = vadd.f32 %v2660_v14, %v4048_v44 }
 0x14f   :  { %v1497_v34 = vadd.f32 %v2724_v32, %v1400_v17  ;;  %v2661_v63 = vpop.f32.mrb[40].mxu0 }
 0x150   :  { %v2725_v0 = vpop.f32.mrb[40].mxu1  ;;  %v2662_v35 = vpop.f32.mrb[41].mxu0 }
 0x151   :  { %v1600_v36 = vpack.c.bf16 %v1497_v34, %v1494_v33  ;;  %v2663_v9 = vadd.f32 %v2662_v35, %v2661_v63  ;;  %v2726_v24 = vpop.f32.mrb[41].mxu1  ;;  %v2664_v25 = vpop.f32.mrb[42].mxu0 }
 0x152   :  { %v2727_v43 = vadd.f32 %v2726_v24, %v2725_v0  ;;  %v2728_v49 = vpop.f32.mrb[42].mxu1  ;;  %v2665_v26 = vpop.f32.mrb[43].mxu0 }
 0x153   :  { %v1405_v53 = vadd.f32 %v2663_v9, %v4053_v39  ;;  %v2666_v29 = vadd.f32 %v2665_v26, %v2664_v25  ;;  %v2729_v55 = vpop.f32.mrb[43].mxu1  ;;  %2810 = vmatmul.mubr.bf16.vlgmr.msra.gmra.mrb[64].mxu0 %v1600_v36 }
 0x154   :  { %v2730_v40 = vadd.f32 %v2729_v55, %v2728_v49 }
 0x155   :  { %v1502_v41 = vadd.f32 %v2727_v43, %v1405_v53  ;;  %v1408_v44 = vadd.f32 %v2666_v29, %v4058_v42 }
 0x157   :  { %v1505_v56 = vadd.f32 %v2730_v40, %v1408_v44  ;;  %v2667_v57 = vpop.f32.mrb[44].mxu0 }
 0x158   :  { %v2731_v54 = vpop.f32.mrb[44].mxu1  ;;  %v2668_v62 = vpop.f32.mrb[45].mxu0 }
 0x159   :  { %v2669_v1 = vadd.f32 %v2668_v62, %v2667_v57  ;;  %v2732_v37 = vpop.f32.mrb[45].mxu1  ;;  %v2670_v2 = vpop.f32.mrb[46].mxu0  ;;  %v1601_v3 = vpack.c.bf16 %v1505_v56, %v1502_v41 }
 0x15a   :  { %v2733_v4 = vadd.f32 %v2732_v37, %v2731_v54  ;;  %v2734_v5 = vpop.f32.mrb[46].mxu1  ;;  %v2671_v6 = vpop.f32.mrb[47].mxu0 }
 0x15b   :  { %v1413_v39 = vadd.f32 %v2669_v1, %v4060_v61  ;;  %v2672_v7 = vadd.f32 %v2671_v6, %v2670_v2  ;;  %v2735_v8 = vpop.f32.mrb[47].mxu1  ;;  %2813 = vmatprep.mubr.bf16.mxu0 %v1601_v3 }
 0x15c   :  { %v2736_v11 = vadd.f32 %v2735_v8, %v2734_v5 }
 0x15d   :  { %v1510_v13 = vadd.f32 %v2733_v4, %v1413_v39  ;;  %v1416_v42 = vadd.f32 %v2672_v7, %v4062_v60 }
 0x15f   :  { %v1513_v15 = vadd.f32 %v2736_v11, %v1416_v42  ;;  %v2673_v16 = vpop.f32.mrb[48].mxu0 }
 0x160   :  { %v2737_v18 = vpop.f32.mrb[48].mxu1  ;;  %v2674_v20 = vpop.f32.mrb[49].mxu0 }
 0x161   :  { %v2675_v50 = vadd.f32 %v2674_v20, %v2673_v16  ;;  %v2738_v46 = vpop.f32.mrb[49].mxu1  ;;  %v2676_v51 = vpop.f32.mrb[50].mxu0  ;;  %v1602_v21 = vpack.c.bf16 %v1513_v15, %v1510_v13 }
 0x162   :  { %v2739_v22 = vadd.f32 %v2738_v46, %v2737_v18  ;;  %v2740_v23 = vpop.f32.mrb[50].mxu1  ;;  %v2677_v27 = vpop.f32.mrb[51].mxu0 }
 0x163   :  { %v1421_v61 = vadd.f32 %v2675_v50, %v4064_v12  ;;  %v2678_v30 = vadd.f32 %v2677_v27, %v2676_v51  ;;  %v2741_v47 = vpop.f32.mrb[51].mxu1  ;;  %2814 = vmatmul.mubr.bf16.gmra.mrb[68].mxu0 %v1602_v21 }
 0x164   :  { %v2742_v48 = vadd.f32 %v2741_v47, %v2740_v23  ;;  %v2408_v23 = vld [vmem:[%s4130_s5] ss:$0 sm:$0xff] }
 0x165   :  { %v1518_v45 = vadd.f32 %v2739_v22, %v1421_v61  ;;  %v1424_v60 = vadd.f32 %v2678_v30, %v4066_v19  ;;  %v2936_v22 = vld [vmem:[%s4129_s6 + $0x30] sm:$0xff]  }
 0x166   :  { %2837 = vmatprep.subr.bf16.mxu1 %v2936_v22 }
 0x167   :  { %v1521_v14 = vadd.f32 %v2742_v48, %v1424_v60  ;;  %v2679_v31 = vpop.f32.mrb[52].mxu0  ;;  %2838 = vmatpush3.bf16.msra.mxu1 %v2936_v22 }
 0x168   :  { %v2743_v32 = vpop.f32.mrb[52].mxu1  ;;  %v2680_v33 = vpop.f32.mrb[53].mxu0 }
 0x169   :  { %v2681_v17 = vadd.f32 %v2680_v33, %v2679_v31  ;;  %v2744_v34 = vpop.f32.mrb[53].mxu1  ;;  %v2682_v63 = vpop.f32.mrb[54].mxu0  ;;  %v1603_v0 = vpack.c.bf16 %v1521_v14, %v1518_v45 }
 0x16a   :  { %v2745_v35 = vadd.f32 %v2744_v34, %v2743_v32  ;;  %v2746_v36 = vpop.f32.mrb[54].mxu1  ;;  %v2683_v9 = vpop.f32.mrb[55].mxu0 }
 0x16b   :  { %v1429_v12 = vadd.f32 %v2681_v17, %v4068_v28  ;;  %v2684_v24 = vadd.f32 %v2683_v9, %v2682_v63  ;;  %v2747_v25 = vpop.f32.mrb[55].mxu1  ;;  %2817 = vmatprep.mubr.bf16.mxu0 %v1603_v0 }
 0x16c   :  { %v2748_v43 = vadd.f32 %v2747_v25, %v2746_v36 }
 0x16d   :  { %v1526_v49 = vadd.f32 %v2745_v35, %v1429_v12  ;;  %v1432_v19 = vadd.f32 %v2684_v24, %v4070_v52 }
 0x16f   :  { %v1529_v26 = vadd.f32 %v2748_v43, %v1432_v19  ;;  %v2685_v53 = vpop.f32.mrb[56].mxu0 }
 0x170   :  { %v2749_v29 = vpop.f32.mrb[56].mxu1  ;;  %v2686_v55 = vpop.f32.mrb[57].mxu0 }
 0x171   :  { %v2687_v40 = vadd.f32 %v2686_v55, %v2685_v53  ;;  %v2750_v41 = vpop.f32.mrb[57].mxu1  ;;  %v2688_v44 = vpop.f32.mrb[58].mxu0  ;;  %v1604_v56 = vpack.c.bf16 %v1529_v26, %v1526_v49 }
 0x172   :  { %v2751_v57 = vadd.f32 %v2750_v41, %v2749_v29  ;;  %v2752_v54 = vpop.f32.mrb[58].mxu1  ;;  %v2689_v62 = vpop.f32.mrb[59].mxu0 }
 0x173   :  { %v1437_v28 = vadd.f32 %v2687_v40, %v4072_v38  ;;  %v2690_v1 = vadd.f32 %v2689_v62, %v2688_v44  ;;  %v2753_v37 = vpop.f32.mrb[59].mxu1  ;;  %2818 = vmatmul.mubr.bf16.gmra.mrb[72].mxu0 %v1604_v56 }
 0x174   :  { %v2754_v2 = vadd.f32 %v2753_v37, %v2752_v54 }
 0x175   :  { %v1534_v3 = vadd.f32 %v2751_v57, %v1437_v28  ;;  %v1440_v52 = vadd.f32 %v2690_v1, %v4074_v10 }
 0x177   :  { %v1537_v4 = vadd.f32 %v2754_v2, %v1440_v52  ;;  %v2691_v5 = vpop.f32.mrb[60].mxu0 }
 0x178   :  { %v2755_v6 = vpop.f32.mrb[60].mxu1  ;;  %v2692_v39 = vpop.f32.mrb[61].mxu0 }
 0x179   :  { %v2693_v7 = vadd.f32 %v2692_v39, %v2691_v5  ;;  %v2756_v8 = vpop.f32.mrb[61].mxu1  ;;  %v2694_v11 = vpop.f32.mrb[62].mxu0  ;;  %v1605_v13 = vpack.c.bf16 %v1537_v4, %v1534_v3 }
 0x17a   :  { %v2757_v42 = vadd.f32 %v2756_v8, %v2755_v6  ;;  %v2758_v15 = vpop.f32.mrb[62].mxu1  ;;  %v2695_v16 = vpop.f32.mrb[63].mxu0 }
 0x17b   :  { %v1445_v38 = vadd.f32 %v2693_v7, %v4076_v58  ;;  %v2696_v18 = vadd.f32 %v2695_v16, %v2694_v11  ;;  %v2759_v20 = vpop.f32.mrb[63].mxu1  ;;  %2821 = vmatprep.mubr.bf16.mxu0 %v1605_v13  ;;  %v2937_v58 = vld [vmem:[%s4129_s6 + $0x38] sm:$0xff]  }
 0x17c   :  { %v2760_v50 = vadd.f32 %v2759_v20, %v2758_v15  ;;  %2839 = vmatprep.subr.bf16.mxu1 %v2937_v58 }
 0x17d   :  { %v1542_v46 = vadd.f32 %v2757_v42, %v1445_v38  ;;  %v1448_v10 = vadd.f32 %v2696_v18, %v4078_v59  ;;  %2840 = vmatpush3.bf16.msra.mxu1 %v2937_v58 }
 0x17f   :  { %v1545_v51 = vadd.f32 %v2760_v50, %v1448_v10 }
 0x181   :  { %v1606_v21 = vpack.c.bf16 %v1545_v51, %v1542_v46  ;;  %v2417_v46 = vld [vmem:[%s4131_s7] ss:$0 sm:$0xff] }
 0x183   :  { %2822 = vmatmul.mubr.bf16.gmra.mrb[76].mxu0 %v1606_v21 }
 0x226   :  { %v2811_v59 = vpop.f32.mrb[64].mxu0 }
 0x227   :  { %v1721_v27 = vadd.f32 %v2811_v59, %v2408_v23  ;;  %v1712_v61 = vpop.f32.mrb[65].mxu0 }
 0x228   :  { %v1713_v30 = vadd.f32 %v2408_v23, %v1712_v61  ;;  %v2812_v47 = vpop.f32.mrb[66].mxu0 }
 0x229   :  { %v1724_v48 = vadd.f32 %v2812_v47, %v2408_v23  ;;  %v1715_v45 = vpop.f32.mrb[67].mxu0  ;;  %v1777_v14 = vmax.f32 %v1721_v27, 0.0 }
 0x22a   :  { %v1716_v60 = vadd.f32 %v2408_v23, %v1715_v45  ;;  %v1775_v32 = vmax.f32 %v1713_v30, 0.0 }
 0x22b   :  { %v1778_v31 = vmax.f32 %v1724_v48, 0.0 }
 0x22c   :  { %v1776_v33 = vmax.f32 %v1716_v60, 0.0 }
 0x22d   :  { %v1792_v17 = vpack.c.bf16 %v1778_v31, %v1777_v14 }
 0x22e   :  { %v1791_v34 = vpack.c.bf16 %v1776_v33, %v1775_v32 }
 0x230   :  { %2841 = vmatprep.mubr.bf16.mxu1 %v1791_v34 }
 0x231   :  { %2842 = vmatmul.mubr.bf16.vlgmr.msra.gmra.mrb[64].mxu1 %v1792_v17 }
 0x236   :  { %v2815_v63 = vpop.f32.mrb[68].mxu0 }
 0x237   :  { %v1737_v0 = vadd.f32 %v2815_v63, %v2408_v23  ;;  %v1728_v35 = vpop.f32.mrb[69].mxu0 }
 0x238   :  { %v1729_v36 = vadd.f32 %v2408_v23, %v1728_v35  ;;  %v2816_v9 = vpop.f32.mrb[70].mxu0 }
 0x239   :  { %v1740_v12 = vadd.f32 %v2816_v9, %v2408_v23  ;;  %v1731_v24 = vpop.f32.mrb[71].mxu0  ;;  %v1781_v43 = vmax.f32 %v1737_v0, 0.0 }
 0x23a   :  { %v1732_v25 = vadd.f32 %v2408_v23, %v1731_v24  ;;  %v1779_v19 = vmax.f32 %v1729_v36, 0.0 }
 0x23b   :  { %v1782_v49 = vmax.f32 %v1740_v12, 0.0 }
 0x23c   :  { %v1780_v26 = vmax.f32 %v1732_v25, 0.0 }
 0x23d   :  { %v1794_v53 = vpack.c.bf16 %v1782_v49, %v1781_v43 }
 0x23e   :  { %v1793_v29 = vpack.c.bf16 %v1780_v26, %v1779_v19 }
 0x240   :  { %2845 = vmatprep.mubr.bf16.mxu1 %v1793_v29 }
 0x241   :  { %2846 = vmatmul.mubr.bf16.gmra.mrb[68].mxu1 %v1794_v53 }
 0x246   :  { %v2819_v55 = vpop.f32.mrb[72].mxu0 }
 0x247   :  { %v1753_v40 = vadd.f32 %v2819_v55, %v2408_v23  ;;  %v1744_v41 = vpop.f32.mrb[73].mxu0 }
 0x248   :  { %v1745_v44 = vadd.f32 %v2408_v23, %v1744_v41  ;;  %v2820_v56 = vpop.f32.mrb[74].mxu0 }
 0x249   :  { %v1756_v57 = vadd.f32 %v2820_v56, %v2408_v23  ;;  %v1747_v54 = vpop.f32.mrb[75].mxu0  ;;  %v1785_v28 = vmax.f32 %v1753_v40, 0.0 }
 0x24a   :  { %v1748_v62 = vadd.f32 %v2408_v23, %v1747_v54  ;;  %v1783_v37 = vmax.f32 %v1745_v44, 0.0 }
 0x24b   :  { %v1786_v1 = vmax.f32 %v1756_v57, 0.0 }
 0x24c   :  { %v1784_v2 = vmax.f32 %v1748_v62, 0.0 }
 0x24d   :  { %v1796_v3 = vpack.c.bf16 %v1786_v1, %v1785_v28 }
 0x24e   :  { %v1795_v52 = vpack.c.bf16 %v1784_v2, %v1783_v37 }
 0x250   :  { %2849 = vmatprep.mubr.bf16.mxu1 %v1795_v52 }
 0x251   :  { %2850 = vmatmul.mubr.bf16.gmra.mrb[72].mxu1 %v1796_v3 }
 0x256   :  { %v2823_v4 = vpop.f32.mrb[76].mxu0 }
 0x257   :  { %v1769_v5 = vadd.f32 %v2823_v4, %v2408_v23  ;;  %v1760_v6 = vpop.f32.mrb[77].mxu0 }
 0x258   :  { %v1761_v39 = vadd.f32 %v2408_v23, %v1760_v6  ;;  %v2824_v7 = vpop.f32.mrb[78].mxu0 }
 0x259   :  { %v1772_v8 = vadd.f32 %v2824_v7, %v2408_v23  ;;  %v1763_v11 = vpop.f32.mrb[79].mxu0  ;;  %v1789_v42 = vmax.f32 %v1769_v5, 0.0 }
 0x25a   :  { %v1764_v13 = vadd.f32 %v2408_v23, %v1763_v11  ;;  %v1787_v16 = vmax.f32 %v1761_v39, 0.0 }
 0x25b   :  { %v1790_v15 = vmax.f32 %v1772_v8, 0.0 }
 0x25c   :  { %v1788_v38 = vmax.f32 %v1764_v13, 0.0 }
 0x25d   :  { %v1798_v18 = vpack.c.bf16 %v1790_v15, %v1789_v42 }
 0x25e   :  { %v1797_v20 = vpack.c.bf16 %v1788_v38, %v1787_v16 }
 0x260   :  { %2853 = vmatprep.mubr.bf16.mxu1 %v1797_v20 }
 0x261   :  { %2854 = vmatmul.mubr.bf16.gmra.mrb[76].mxu1 %v1798_v18 }
 0x304   :  { %v2843_v50 = vpop.f32.mrb[64].mxu1 }
 0x305   :  { %v1904_v10 = vpop.f32.mrb[65].mxu1  ;;  %v1913_v21 = vadd.f32 %v2843_v50, %v2417_v46 }
 0x306   :  { %v2844_v51 = vpop.f32.mrb[66].mxu1  ;;  %v1905_v23 = vadd.f32 %v2417_v46, %v1904_v10 }
 0x307   :  { %v1916_v22 = vadd.f32 %v2844_v51, %v2417_v46  ;;  %v1907_v58 = vpop.f32.mrb[67].mxu1 }
 0x308   :  { %v1908_v59 = vadd.f32 %v2417_v46, %v1907_v58 }
 0x309   :  { %v2466_v27 = vpack.c.bf16 %v1916_v22, %v1913_v21 }
 0x30a   :  { %v2461_v61 = vpack.c.bf16 %v1908_v59, %v1905_v23 }
 0x30b   :  { %2498 = vst [vmem:[%s4114_s11 + $0x8] sm:$0xff] %v2466_v27  }
 0x30c   :  { %2462 = vst [vmem:[%s4114_s11] sm:$0xff] %v2461_v61  }
 0x314   :  { %v2847_v30 = vpop.f32.mrb[68].mxu1 }
 0x315   :  { %v1920_v47 = vpop.f32.mrb[69].mxu1  ;;  %v1929_v45 = vadd.f32 %v2847_v30, %v2417_v46 }
 0x316   :  { %v2848_v48 = vpop.f32.mrb[70].mxu1  ;;  %v1921_v31 = vadd.f32 %v2417_v46, %v1920_v47 }
 0x317   :  { %v1932_v60 = vadd.f32 %v2848_v48, %v2417_v46  ;;  %v1923_v14 = vpop.f32.mrb[71].mxu1 }
 0x318   :  { %v1924_v32 = vadd.f32 %v2417_v46, %v1923_v14 }
 0x319   :  { %v2476_v33 = vpack.c.bf16 %v1932_v60, %v1929_v45 }
 0x31a   :  { %v2471_v17 = vpack.c.bf16 %v1924_v32, %v1921_v31 }
 0x31b   :  { %2500 = vst [vmem:[%s4114_s11 + $0x18] sm:$0xff] %v2476_v33  }
 0x31c   :  { %2499 = vst [vmem:[%s4114_s11 + $0x10] sm:$0xff] %v2471_v17  }
 0x324   :  { %v2851_v34 = vpop.f32.mrb[72].mxu1 }
 0x325   :  { %v1936_v63 = vpop.f32.mrb[73].mxu1  ;;  %v1945_v35 = vadd.f32 %v2851_v34, %v2417_v46 }
 0x326   :  { %v2852_v0 = vpop.f32.mrb[74].mxu1  ;;  %v1937_v12 = vadd.f32 %v2417_v46, %v1936_v63 }
 0x327   :  { %v1948_v36 = vadd.f32 %v2852_v0, %v2417_v46  ;;  %v1939_v9 = vpop.f32.mrb[75].mxu1 }
 0x328   :  { %v1940_v24 = vadd.f32 %v2417_v46, %v1939_v9 }
 0x329   :  { %v2486_v25 = vpack.c.bf16 %v1948_v36, %v1945_v35 }
 0x32a   :  { %v2481_v43 = vpack.c.bf16 %v1940_v24, %v1937_v12 }
 0x32b   :  { %2502 = vst [vmem:[%s4114_s11 + $0x28] sm:$0xff] %v2486_v25  }
 0x32c   :  { %2501 = vst [vmem:[%s4114_s11 + $0x20] sm:$0xff] %v2481_v43  }
 0x334   :  { %v2855_v49 = vpop.f32.mrb[76].mxu1 }
 0x335   :  { %v1952_v19 = vpop.f32.mrb[77].mxu1  ;;  %v1961_v53 = vadd.f32 %v2855_v49, %v2417_v46 }
 0x336   :  { %v2856_v26 = vpop.f32.mrb[78].mxu1  ;;  %v1953_v40 = vadd.f32 %v2417_v46, %v1952_v19 }
 0x337   :  { %v1964_v29 = vadd.f32 %v2856_v26, %v2417_v46  ;;  %v1955_v55 = vpop.f32.mrb[79].mxu1 }
 0x338   :  { %v1956_v41 = vadd.f32 %v2417_v46, %v1955_v55 }
 0x339   :  { %v2496_v44 = vpack.c.bf16 %v1964_v29, %v1961_v53 }
 0x33a   :  { %v2491_v56 = vpack.c.bf16 %v1956_v41, %v1953_v40 }
 0x33b   :  { %2504 = vst [vmem:[%s4114_s11 + $0x38] sm:$0xff] %v2496_v44  }
 0x33c   :  { %2503 = vst [vmem:[%s4114_s11 + $0x30] sm:$0xff] %v2491_v56  }

</bundles_post_ra>
